<compile_context>
chip_gen: v7x
topology: tpu7x:2x2x1
jax: 0.10.0
libtpu: 0.0.40
codegen_flags: <defaults>
</compile_context>

<pallas_src>
import jax
import jax.numpy as jnp
from jax.experimental import pallas as pl
from jax.experimental.pallas import tpu as pltpu

EPS = 1e-5


# ----------------------------------------------------------------------------
# Fused AdaAttN kernel: one grid step per batch element.
#   content     : (C,  Lq)   style      : (C,  Lk)
#   content_key : (Ck, Lq)   style_key  : (Ck, Lk)
#   weights are (Cout, Cin), biases (Cout, 1)
#   output      : (C,  Lq)
# ----------------------------------------------------------------------------
def _ada_attn_kernel(c_ref, s_ref, ck_ref, sk_ref,
                     fw_ref, fb_ref, gw_ref, gb_ref,
                     hw_ref, hb_ref, c0w_ref, c0b_ref,
                     o_ref):
    c = c_ref[0].astype(jnp.float32)                       # (C, Lq)
    s = s_ref[0].astype(jnp.float32)                       # (C, Lk)
    ck = ck_ref[0].astype(jnp.float32)                     # (Ck, Lq)
    sk = sk_ref[0].astype(jnp.float32)                     # (Ck, Lk)

    def mvn(x):
        # per-channel spatial normalization, unbiased variance (ddof=1) like torch
        n = x.shape[1]
        mean = jnp.mean(x, axis=1, keepdims=True)
        var = jnp.sum((x - mean) ** 2, axis=1, keepdims=True) / (n - 1) + EPS
        return (x - mean) * jax.lax.rsqrt(var)

    def conv1x1(x, w_ref, b_ref):
        # (Cout, Cin) @ (Cin, L) + b  -> lane-dense over L
        return jnp.dot(w_ref[...].astype(jnp.bfloat16),
                       x.astype(jnp.bfloat16),
                       preferred_element_type=jnp.float32) + b_ref[...]

    F = conv1x1(mvn(ck), fw_ref, fb_ref)                   # (Ck, Lq)
    G = conv1x1(mvn(sk), gw_ref, gb_ref)                   # (Ck, Lk)
    Hm = conv1x1(mvn(s), hw_ref, hb_ref)                   # (C,  Lk)

    # scores (Lq, Lk) = F^T @ G  (contract Ck on both sides; no data transpose)
    scores = jax.lax.dot_general(
        F.astype(jnp.bfloat16), G.astype(jnp.bfloat16),
        (((0,), (0,)), ((), ())), preferred_element_type=jnp.float32)
    scores = scores - jnp.max(scores, axis=-1, keepdims=True)
    p = jnp.exp(scores)
    p = p * pl.reciprocal(jnp.sum(p, axis=-1, keepdims=True), approx=True)

    # mean (C, Lq) = Hm @ P^T  (contract Lk) -> lands directly in channel-first layout
    mean = jax.lax.dot_general(
        Hm.astype(jnp.bfloat16), p.astype(jnp.bfloat16),
        (((1,), (1,)), ((), ())), preferred_element_type=jnp.float32)
    mean = conv1x1(mean, c0w_ref, c0b_ref)                 # (C, Lq)

    # adain(content, mean): std(mean) * (content - mu_c) / std_c + mu(mean)
    nq = c.shape[1]
    c_mean = jnp.mean(c, axis=1, keepdims=True)
    c_var = jnp.sum((c - c_mean) ** 2, axis=1, keepdims=True) / (nq - 1) + EPS
    m_mean = jnp.mean(mean, axis=1, keepdims=True)
    m_var = jnp.sum((mean - m_mean) ** 2, axis=1, keepdims=True) / (nq - 1) + EPS
    out = jnp.sqrt(m_var) * (c - c_mean) * jax.lax.rsqrt(c_var) + m_mean
    o_ref[0] = out.astype(o_ref.dtype)


def ada_attn(p, content, style, content_key, style_key):
    B, C, Hc, Wc = content.shape
    _, Ck, _, _ = content_key.shape
    _, _, Hs, Ws = style.shape
    Lq, Lk = Hc * Wc, Hs * Ws

    cf = content.reshape(B, C, Lq)
    sf = style.reshape(B, C, Lk)
    ckf = content_key.reshape(B, Ck, Lq)
    skf = style_key.reshape(B, Ck, Lk)

    out = pl.pallas_call(
        _ada_attn_kernel,
        out_shape=jax.ShapeDtypeStruct((B, C, Lq), content.dtype),
        grid=(B,),
        in_specs=[
            pl.BlockSpec((1, C, Lq), lambda b: (b, 0, 0)),
            pl.BlockSpec((1, C, Lk), lambda b: (b, 0, 0)),
            pl.BlockSpec((1, Ck, Lq), lambda b: (b, 0, 0)),
            pl.BlockSpec((1, Ck, Lk), lambda b: (b, 0, 0)),
            pl.BlockSpec((Ck, Ck), lambda b: (0, 0)),
            pl.BlockSpec((Ck, 1), lambda b: (0, 0)),
            pl.BlockSpec((Ck, Ck), lambda b: (0, 0)),
            pl.BlockSpec((Ck, 1), lambda b: (0, 0)),
            pl.BlockSpec((C, C), lambda b: (0, 0)),
            pl.BlockSpec((C, 1), lambda b: (0, 0)),
            pl.BlockSpec((C, C), lambda b: (0, 0)),
            pl.BlockSpec((C, 1), lambda b: (0, 0)),
        ],
        out_specs=pl.BlockSpec((1, C, Lq), lambda b: (b, 0, 0)),
        compiler_params=pltpu.CompilerParams(dimension_semantics=("parallel",)),
    )(cf, sf, ckf, skf,
      p["f_w"], p["f_b"], p["g_w"], p["g_b"],
      p["h_w"], p["h_b"], p["conv0_w"], p["conv0_b"])
    return out.reshape(B, C, Hc, Wc)


# ----------------------------------------------------------------------------
# 3x3 merge conv (reflection pad) as a single im2col matmul per batch:
#   out (Cout, HW) = W (Cout, 9*Cin) @ patches (9*Cin, HW) + b
# ----------------------------------------------------------------------------
def _merge_conv_kernel(p_ref, w_ref, b_ref, o_ref):
    acc = jnp.dot(w_ref[...].astype(jnp.bfloat16),
                  p_ref[0].astype(jnp.bfloat16),
                  preferred_element_type=jnp.float32)
    o_ref[0] = (acc + b_ref[...]).astype(o_ref.dtype)


def merge_conv_reflect(x, w_oihw, b):
    # x: (B, Cin, H, W) ; w_oihw: (Cout, Cin, 3, 3) ; b: (Cout,)
    B, Cin, H, W = x.shape
    Cout = w_oihw.shape[0]
    HW = H * W
    K = 9 * Cin

    xp = jnp.pad(x, ((0, 0), (0, 0), (1, 1), (1, 1)), mode="reflect")
    # im2col patches: index k = (dy*3 + dx)*Cin + ci
    pats = jnp.stack([xp[:, :, dy:dy + H, dx:dx + W]
                      for dy in range(3) for dx in range(3)], axis=1)
    pats = pats.reshape(B, K, HW)
    # matching flat weight: (Cout, 3, 3, Cin) -> (Cout, 9*Cin)
    w_flat = w_oihw.transpose(0, 2, 3, 1).reshape(Cout, K)

    out = pl.pallas_call(
        _merge_conv_kernel,
        out_shape=jax.ShapeDtypeStruct((B, Cout, HW), x.dtype),
        grid=(B,),
        in_specs=[pl.BlockSpec((1, K, HW), lambda b_: (b_, 0, 0)),
                  pl.BlockSpec((Cout, K), lambda b_: (0, 0)),
                  pl.BlockSpec((Cout, 1), lambda b_: (0, 0))],
        out_specs=pl.BlockSpec((1, Cout, HW), lambda b_: (b_, 0, 0)),
        compiler_params=pltpu.CompilerParams(dimension_semantics=("parallel",)),
    )(pats, w_flat, b.reshape(Cout, 1))
    return out.reshape(B, Cout, H, W)


# ----------------------------------------------------------------------------
# Transformer forward (mirrors the PyTorch module)
# ----------------------------------------------------------------------------
def transformer_forward(params, c4, s4, c5, s5, ck4, sk4, ck5, sk5):
    out4 = ada_attn(params["attn4"], c4, s4, ck4, sk4)          # (B, C, H4, W4)
    out5 = ada_attn(params["attn5"], c5, s5, ck5, sk5)          # (B, C, H5, W5)
    up5 = jnp.repeat(jnp.repeat(out5, 2, axis=2), 2, axis=3)    # nearest x2
    merged = out4 + up5
    return merge_conv_reflect(merged, params["merge_w"], params["merge_b"])


# ----------------------------------------------------------------------------
# Deterministic parameter init (shapes follow the nn.Module __init__;
# 1x1 conv weights stored as (Cout, Cin), biases as (Cout, 1)).
# ----------------------------------------------------------------------------
def _init_adaattn(key, in_planes, key_planes):
    ks = jax.random.split(key, 8)

    def wmat(k, co, ci):
        return jax.random.normal(k, (co, ci), jnp.float32) * (1.0 / jnp.sqrt(ci))

    def bvec(k, co):
        return jax.random.normal(k, (co, 1), jnp.float32) * 0.01

    return {
        "f_w": wmat(ks[0], key_planes, key_planes), "f_b": bvec(ks[1], key_planes),
        "g_w": wmat(ks[2], key_planes, key_planes), "g_b": bvec(ks[3], key_planes),
        "h_w": wmat(ks[4], in_planes, in_planes),   "h_b": bvec(ks[5], in_planes),
        "conv0_w": wmat(ks[6], in_planes, in_planes), "conv0_b": bvec(ks[7], in_planes),
    }


def init_params(key, in_planes, key_planes):
    k4, k5, kw, kb = jax.random.split(key, 4)
    return {
        "attn4": _init_adaattn(k4, in_planes, key_planes),
        "attn5": _init_adaattn(k5, in_planes, key_planes),   # shallow_layer=False
        "merge_w": jax.random.normal(kw, (in_planes, in_planes, 3, 3), jnp.float32)
                   * (1.0 / jnp.sqrt(9 * in_planes)),
        "merge_b": jax.random.normal(kb, (in_planes,), jnp.float32) * 0.01,
    }


if __name__ == "__main__":
    B, C = 2, 32            # in_planes = key_planes = 32
    H4 = W4 = 16            # relu4_1 feature resolution
    H5 = W5 = 8             # relu5_1 feature resolution (upsampled x2 to match)

    root = jax.random.PRNGKey(0)
    kp, *kx = jax.random.split(root, 9)
    params = init_params(kp, C, C)

    content4_1 = jax.random.normal(kx[0], (B, C, H4, W4), jnp.float32)
    style4_1   = jax.random.normal(kx[1], (B, C, H4, W4), jnp.float32)
    content5_1 = jax.random.normal(kx[2], (B, C, H5, W5), jnp.float32)
    style5_1   = jax.random.normal(kx[3], (B, C, H5, W5), jnp.float32)
    content4_1_key = jax.random.normal(kx[4], (B, C, H4, W4), jnp.float32)
    style4_1_key   = jax.random.normal(kx[5], (B, C, H4, W4), jnp.float32)
    content5_1_key = jax.random.normal(kx[6], (B, C, H5, W5), jnp.float32)
    style5_1_key   = jax.random.normal(kx[7], (B, C, H5, W5), jnp.float32)

    fwd = jax.jit(transformer_forward)
    out = fwd(params, content4_1, style4_1, content5_1, style5_1,
              content4_1_key, style4_1_key, content5_1_key, style5_1_key)
    jax.block_until_ready(out)
    assert out.shape == (B, C, H4, W4), out.shape
    assert bool(jnp.all(jnp.isfinite(out)))
    print("KERNEL_OK")
</pallas_src>

<mosaic_0001>
module attributes {stable_mosaic.version = 11 : i64} {
  func.func @_ada_attn_kernel(%arg0: i32, %arg1: memref<1x32x64xf32, #tpu.memory_space<vmem>>, %arg2: memref<1x32x64xf32, #tpu.memory_space<vmem>>, %arg3: memref<1x32x64xf32, #tpu.memory_space<vmem>>, %arg4: memref<1x32x64xf32, #tpu.memory_space<vmem>>, %arg5: memref<32x32xf32, #tpu.memory_space<vmem>>, %arg6: memref<32x1xf32, #tpu.memory_space<vmem>>, %arg7: memref<32x32xf32, #tpu.memory_space<vmem>>, %arg8: memref<32x1xf32, #tpu.memory_space<vmem>>, %arg9: memref<32x32xf32, #tpu.memory_space<vmem>>, %arg10: memref<32x1xf32, #tpu.memory_space<vmem>>, %arg11: memref<32x32xf32, #tpu.memory_space<vmem>>, %arg12: memref<32x1xf32, #tpu.memory_space<vmem>>, %arg13: memref<1x32x64xf32, #tpu.memory_space<vmem>>) attributes {dimension_semantics = [#tpu.dimension_semantics<parallel>], iteration_bounds = array<i64: 2>, scalar_prefetch = 0 : i64, scratch_operands = 0 : i64, tpu.core_type = #tpu.core_type<tc>, window_params = [{transform_indices = @transform_0, window_bounds = array<i64: 1, 32, 64>}, {transform_indices = @transform_1, window_bounds = array<i64: 1, 32, 64>}, {transform_indices = @transform_2, window_bounds = array<i64: 1, 32, 64>}, {transform_indices = @transform_3, window_bounds = array<i64: 1, 32, 64>}, {pipeline_mode = #tpu.pipeline_mode<synchronous>, transform_indices = @transform_4, window_bounds = array<i64: 32, 32>}, {pipeline_mode = #tpu.pipeline_mode<synchronous>, transform_indices = @transform_5, window_bounds = array<i64: 32, 1>}, {pipeline_mode = #tpu.pipeline_mode<synchronous>, transform_indices = @transform_6, window_bounds = array<i64: 32, 32>}, {pipeline_mode = #tpu.pipeline_mode<synchronous>, transform_indices = @transform_7, window_bounds = array<i64: 32, 1>}, {pipeline_mode = #tpu.pipeline_mode<synchronous>, transform_indices = @transform_8, window_bounds = array<i64: 32, 32>}, {pipeline_mode = #tpu.pipeline_mode<synchronous>, transform_indices = @transform_9, window_bounds = array<i64: 32, 1>}, {pipeline_mode = #tpu.pipeline_mode<synchronous>, transform_indices = @transform_10, window_bounds = array<i64: 32, 32>}, {pipeline_mode = #tpu.pipeline_mode<synchronous>, transform_indices = @transform_11, window_bounds = array<i64: 32, 1>}, {transform_indices = @transform_12, window_bounds = array<i64: 1, 32, 64>}]} {
    %c0 = arith.constant 0 : index
    %c0_0 = arith.constant 0 : index
    %c0_1 = arith.constant 0 : index
    %0 = vector.load %arg1[%c0, %c0_0, %c0_1] : memref<1x32x64xf32, #tpu.memory_space<vmem>>, vector<1x32x64xf32>
    %1 = vector.shape_cast %0 : vector<1x32x64xf32> to vector<32x64xf32>
    %c0_2 = arith.constant 0 : index
    %c0_3 = arith.constant 0 : index
    %c0_4 = arith.constant 0 : index
    %2 = vector.load %arg2[%c0_2, %c0_3, %c0_4] : memref<1x32x64xf32, #tpu.memory_space<vmem>>, vector<1x32x64xf32>
    %3 = vector.shape_cast %2 : vector<1x32x64xf32> to vector<32x64xf32>
    %c0_5 = arith.constant 0 : index
    %c0_6 = arith.constant 0 : index
    %c0_7 = arith.constant 0 : index
    %4 = vector.load %arg3[%c0_5, %c0_6, %c0_7] : memref<1x32x64xf32, #tpu.memory_space<vmem>>, vector<1x32x64xf32>
    %5 = vector.shape_cast %4 : vector<1x32x64xf32> to vector<32x64xf32>
    %c0_8 = arith.constant 0 : index
    %c0_9 = arith.constant 0 : index
    %c0_10 = arith.constant 0 : index
    %6 = vector.load %arg4[%c0_8, %c0_9, %c0_10] : memref<1x32x64xf32, #tpu.memory_space<vmem>>, vector<1x32x64xf32>
    %7 = vector.shape_cast %6 : vector<1x32x64xf32> to vector<32x64xf32>
    %cst = arith.constant dense<0.000000e+00> : vector<32xf32>
    %8 = vector.multi_reduction <add>, %5, %cst [1] : vector<32x64xf32> to vector<32xf32>
    %9 = vector.shape_cast %8 : vector<32xf32> to vector<32x1xf32>
    %cst_11 = arith.constant 6.400000e+01 : f32
    %10 = vector.broadcast %cst_11 : f32 to vector<32x1xf32>
    %11 = arith.divf %9, %10 : vector<32x1xf32>
    %12 = vector.broadcast %11 : vector<32x1xf32> to vector<32x64xf32>
    %13 = arith.subf %5, %12 : vector<32x64xf32>
    %14 = arith.mulf %13, %13 : vector<32x64xf32>
    %cst_12 = arith.constant dense<0.000000e+00> : vector<32xf32>
    %15 = vector.multi_reduction <add>, %14, %cst_12 [1] : vector<32x64xf32> to vector<32xf32>
    %16 = vector.shape_cast %15 : vector<32xf32> to vector<32x1xf32>
    %cst_13 = arith.constant 6.300000e+01 : f32
    %17 = vector.broadcast %cst_13 : f32 to vector<32x1xf32>
    %18 = arith.divf %16, %17 : vector<32x1xf32>
    %cst_14 = arith.constant 9.99999974E-6 : f32
    %19 = vector.broadcast %cst_14 : f32 to vector<32x1xf32>
    %20 = arith.addf %18, %19 : vector<32x1xf32>
    %21 = vector.broadcast %11 : vector<32x1xf32> to vector<32x64xf32>
    %22 = arith.subf %5, %21 : vector<32x64xf32>
    %23 = math.rsqrt %20 : vector<32x1xf32>
    %24 = vector.broadcast %23 : vector<32x1xf32> to vector<32x64xf32>
    %25 = arith.mulf %22, %24 : vector<32x64xf32>
    %c0_15 = arith.constant 0 : index
    %c0_16 = arith.constant 0 : index
    %26 = vector.load %arg5[%c0_15, %c0_16] : memref<32x32xf32, #tpu.memory_space<vmem>>, vector<32x32xf32>
    %27 = arith.truncf %26 : vector<32x32xf32> to vector<32x32xbf16>
    %28 = arith.truncf %25 : vector<32x64xf32> to vector<32x64xbf16>
    %cst_17 = arith.constant dense<0.000000e+00> : vector<32x64xf32>
    %29 = tpu.matmul %27, %28, %cst_17 {dimension_numbers = #tpu.dot_dimension_numbers<[1], [0], [0], [1], [0, 0, 1, 1], [], []>} : vector<32x32xbf16>, vector<32x64xbf16>, vector<32x64xf32> -> vector<32x64xf32>
    %c0_18 = arith.constant 0 : index
    %c0_19 = arith.constant 0 : index
    %30 = vector.load %arg6[%c0_18, %c0_19] : memref<32x1xf32, #tpu.memory_space<vmem>>, vector<32x1xf32>
    %31 = vector.broadcast %30 : vector<32x1xf32> to vector<32x64xf32>
    %32 = arith.addf %29, %31 : vector<32x64xf32>
    %cst_20 = arith.constant dense<0.000000e+00> : vector<32xf32>
    %33 = vector.multi_reduction <add>, %7, %cst_20 [1] : vector<32x64xf32> to vector<32xf32>
    %34 = vector.shape_cast %33 : vector<32xf32> to vector<32x1xf32>
    %cst_21 = arith.constant 6.400000e+01 : f32
    %35 = vector.broadcast %cst_21 : f32 to vector<32x1xf32>
    %36 = arith.divf %34, %35 : vector<32x1xf32>
    %37 = vector.broadcast %36 : vector<32x1xf32> to vector<32x64xf32>
    %38 = arith.subf %7, %37 : vector<32x64xf32>
    %39 = arith.mulf %38, %38 : vector<32x64xf32>
    %cst_22 = arith.constant dense<0.000000e+00> : vector<32xf32>
    %40 = vector.multi_reduction <add>, %39, %cst_22 [1] : vector<32x64xf32> to vector<32xf32>
    %41 = vector.shape_cast %40 : vector<32xf32> to vector<32x1xf32>
    %cst_23 = arith.constant 6.300000e+01 : f32
    %42 = vector.broadcast %cst_23 : f32 to vector<32x1xf32>
    %43 = arith.divf %41, %42 : vector<32x1xf32>
    %cst_24 = arith.constant 9.99999974E-6 : f32
    %44 = vector.broadcast %cst_24 : f32 to vector<32x1xf32>
    %45 = arith.addf %43, %44 : vector<32x1xf32>
    %46 = vector.broadcast %36 : vector<32x1xf32> to vector<32x64xf32>
    %47 = arith.subf %7, %46 : vector<32x64xf32>
    %48 = math.rsqrt %45 : vector<32x1xf32>
    %49 = vector.broadcast %48 : vector<32x1xf32> to vector<32x64xf32>
    %50 = arith.mulf %47, %49 : vector<32x64xf32>
    %c0_25 = arith.constant 0 : index
    %c0_26 = arith.constant 0 : index
    %51 = vector.load %arg7[%c0_25, %c0_26] : memref<32x32xf32, #tpu.memory_space<vmem>>, vector<32x32xf32>
    %52 = arith.truncf %51 : vector<32x32xf32> to vector<32x32xbf16>
    %53 = arith.truncf %50 : vector<32x64xf32> to vector<32x64xbf16>
    %cst_27 = arith.constant dense<0.000000e+00> : vector<32x64xf32>
    %54 = tpu.matmul %52, %53, %cst_27 {dimension_numbers = #tpu.dot_dimension_numbers<[1], [0], [0], [1], [0, 0, 1, 1], [], []>} : vector<32x32xbf16>, vector<32x64xbf16>, vector<32x64xf32> -> vector<32x64xf32>
    %c0_28 = arith.constant 0 : index
    %c0_29 = arith.constant 0 : index
    %55 = vector.load %arg8[%c0_28, %c0_29] : memref<32x1xf32, #tpu.memory_space<vmem>>, vector<32x1xf32>
    %56 = vector.broadcast %55 : vector<32x1xf32> to vector<32x64xf32>
    %57 = arith.addf %54, %56 : vector<32x64xf32>
    %cst_30 = arith.constant dense<0.000000e+00> : vector<32xf32>
    %58 = vector.multi_reduction <add>, %3, %cst_30 [1] : vector<32x64xf32> to vector<32xf32>
    %59 = vector.shape_cast %58 : vector<32xf32> to vector<32x1xf32>
    %cst_31 = arith.constant 6.400000e+01 : f32
    %60 = vector.broadcast %cst_31 : f32 to vector<32x1xf32>
    %61 = arith.divf %59, %60 : vector<32x1xf32>
    %62 = vector.broadcast %61 : vector<32x1xf32> to vector<32x64xf32>
    %63 = arith.subf %3, %62 : vector<32x64xf32>
    %64 = arith.mulf %63, %63 : vector<32x64xf32>
    %cst_32 = arith.constant dense<0.000000e+00> : vector<32xf32>
    %65 = vector.multi_reduction <add>, %64, %cst_32 [1] : vector<32x64xf32> to vector<32xf32>
    %66 = vector.shape_cast %65 : vector<32xf32> to vector<32x1xf32>
    %cst_33 = arith.constant 6.300000e+01 : f32
    %67 = vector.broadcast %cst_33 : f32 to vector<32x1xf32>
    %68 = arith.divf %66, %67 : vector<32x1xf32>
    %cst_34 = arith.constant 9.99999974E-6 : f32
    %69 = vector.broadcast %cst_34 : f32 to vector<32x1xf32>
    %70 = arith.addf %68, %69 : vector<32x1xf32>
    %71 = vector.broadcast %61 : vector<32x1xf32> to vector<32x64xf32>
    %72 = arith.subf %3, %71 : vector<32x64xf32>
    %73 = math.rsqrt %70 : vector<32x1xf32>
    %74 = vector.broadcast %73 : vector<32x1xf32> to vector<32x64xf32>
    %75 = arith.mulf %72, %74 : vector<32x64xf32>
    %c0_35 = arith.constant 0 : index
    %c0_36 = arith.constant 0 : index
    %76 = vector.load %arg9[%c0_35, %c0_36] : memref<32x32xf32, #tpu.memory_space<vmem>>, vector<32x32xf32>
    %77 = arith.truncf %76 : vector<32x32xf32> to vector<32x32xbf16>
    %78 = arith.truncf %75 : vector<32x64xf32> to vector<32x64xbf16>
    %cst_37 = arith.constant dense<0.000000e+00> : vector<32x64xf32>
    %79 = tpu.matmul %77, %78, %cst_37 {dimension_numbers = #tpu.dot_dimension_numbers<[1], [0], [0], [1], [0, 0, 1, 1], [], []>} : vector<32x32xbf16>, vector<32x64xbf16>, vector<32x64xf32> -> vector<32x64xf32>
    %c0_38 = arith.constant 0 : index
    %c0_39 = arith.constant 0 : index
    %80 = vector.load %arg10[%c0_38, %c0_39] : memref<32x1xf32, #tpu.memory_space<vmem>>, vector<32x1xf32>
    %81 = vector.broadcast %80 : vector<32x1xf32> to vector<32x64xf32>
    %82 = arith.addf %79, %81 : vector<32x64xf32>
    %83 = arith.truncf %32 : vector<32x64xf32> to vector<32x64xbf16>
    %84 = arith.truncf %57 : vector<32x64xf32> to vector<32x64xbf16>
    %cst_40 = arith.constant dense<0.000000e+00> : vector<64x64xf32>
    %85 = tpu.matmul %83, %84, %cst_40 {dimension_numbers = #tpu.dot_dimension_numbers<[0], [0], [1], [1], [0, 1, 1, 1], [], []>} : vector<32x64xbf16>, vector<32x64xbf16>, vector<64x64xf32> -> vector<64x64xf32>
    %cst_41 = arith.constant dense<0xFF800000> : vector<64xf32>
    %86 = vector.multi_reduction <maximumf>, %85, %cst_41 [1] : vector<64x64xf32> to vector<64xf32>
    %87 = vector.shape_cast %86 : vector<64xf32> to vector<64x1xf32>
    %88 = vector.broadcast %87 : vector<64x1xf32> to vector<64x64xf32>
    %89 = arith.subf %85, %88 : vector<64x64xf32>
    %90 = math.exp %89 : vector<64x64xf32>
    %cst_42 = arith.constant dense<0.000000e+00> : vector<64xf32>
    %91 = vector.multi_reduction <add>, %90, %cst_42 [1] : vector<64x64xf32> to vector<64xf32>
    %92 = vector.shape_cast %91 : vector<64xf32> to vector<64x1xf32>
    %93 = tpu.reciprocal %92 {approx = true} : vector<64x1xf32> -> vector<64x1xf32>
    %94 = vector.broadcast %93 : vector<64x1xf32> to vector<64x64xf32>
    %95 = arith.mulf %90, %94 : vector<64x64xf32>
    %96 = arith.truncf %82 : vector<32x64xf32> to vector<32x64xbf16>
    %97 = arith.truncf %95 : vector<64x64xf32> to vector<64x64xbf16>
    %cst_43 = arith.constant dense<0.000000e+00> : vector<32x64xf32>
    %98 = tpu.matmul %96, %97, %cst_43 {dimension_numbers = #tpu.dot_dimension_numbers<[1], [1], [0], [0], [0, 0, 1, 0], [], []>} : vector<32x64xbf16>, vector<64x64xbf16>, vector<32x64xf32> -> vector<32x64xf32>
    %c0_44 = arith.constant 0 : index
    %c0_45 = arith.constant 0 : index
    %99 = vector.load %arg11[%c0_44, %c0_45] : memref<32x32xf32, #tpu.memory_space<vmem>>, vector<32x32xf32>
    %100 = arith.truncf %99 : vector<32x32xf32> to vector<32x32xbf16>
    %101 = arith.truncf %98 : vector<32x64xf32> to vector<32x64xbf16>
    %cst_46 = arith.constant dense<0.000000e+00> : vector<32x64xf32>
    %102 = tpu.matmul %100, %101, %cst_46 {dimension_numbers = #tpu.dot_dimension_numbers<[1], [0], [0], [1], [0, 0, 1, 1], [], []>} : vector<32x32xbf16>, vector<32x64xbf16>, vector<32x64xf32> -> vector<32x64xf32>
    %c0_47 = arith.constant 0 : index
    %c0_48 = arith.constant 0 : index
    %103 = vector.load %arg12[%c0_47, %c0_48] : memref<32x1xf32, #tpu.memory_space<vmem>>, vector<32x1xf32>
    %104 = vector.broadcast %103 : vector<32x1xf32> to vector<32x64xf32>
    %105 = arith.addf %102, %104 : vector<32x64xf32>
    %cst_49 = arith.constant dense<0.000000e+00> : vector<32xf32>
    %106 = vector.multi_reduction <add>, %1, %cst_49 [1] : vector<32x64xf32> to vector<32xf32>
    %107 = vector.shape_cast %106 : vector<32xf32> to vector<32x1xf32>
    %cst_50 = arith.constant 6.400000e+01 : f32
    %108 = vector.broadcast %cst_50 : f32 to vector<32x1xf32>
    %109 = arith.divf %107, %108 : vector<32x1xf32>
    %110 = vector.broadcast %109 : vector<32x1xf32> to vector<32x64xf32>
    %111 = arith.subf %1, %110 : vector<32x64xf32>
    %112 = arith.mulf %111, %111 : vector<32x64xf32>
    %cst_51 = arith.constant dense<0.000000e+00> : vector<32xf32>
    %113 = vector.multi_reduction <add>, %112, %cst_51 [1] : vector<32x64xf32> to vector<32xf32>
    %114 = vector.shape_cast %113 : vector<32xf32> to vector<32x1xf32>
    %cst_52 = arith.constant 6.300000e+01 : f32
    %115 = vector.broadcast %cst_52 : f32 to vector<32x1xf32>
    %116 = arith.divf %114, %115 : vector<32x1xf32>
    %cst_53 = arith.constant 9.99999974E-6 : f32
    %117 = vector.broadcast %cst_53 : f32 to vector<32x1xf32>
    %118 = arith.addf %116, %117 : vector<32x1xf32>
    %cst_54 = arith.constant dense<0.000000e+00> : vector<32xf32>
    %119 = vector.multi_reduction <add>, %105, %cst_54 [1] : vector<32x64xf32> to vector<32xf32>
    %120 = vector.shape_cast %119 : vector<32xf32> to vector<32x1xf32>
    %cst_55 = arith.constant 6.400000e+01 : f32
    %121 = vector.broadcast %cst_55 : f32 to vector<32x1xf32>
    %122 = arith.divf %120, %121 : vector<32x1xf32>
    %123 = vector.broadcast %122 : vector<32x1xf32> to vector<32x64xf32>
    %124 = arith.subf %105, %123 : vector<32x64xf32>
    %125 = arith.mulf %124, %124 : vector<32x64xf32>
    %cst_56 = arith.constant dense<0.000000e+00> : vector<32xf32>
    %126 = vector.multi_reduction <add>, %125, %cst_56 [1] : vector<32x64xf32> to vector<32xf32>
    %127 = vector.shape_cast %126 : vector<32xf32> to vector<32x1xf32>
    %cst_57 = arith.constant 6.300000e+01 : f32
    %128 = vector.broadcast %cst_57 : f32 to vector<32x1xf32>
    %129 = arith.divf %127, %128 : vector<32x1xf32>
    %cst_58 = arith.constant 9.99999974E-6 : f32
    %130 = vector.broadcast %cst_58 : f32 to vector<32x1xf32>
    %131 = arith.addf %129, %130 : vector<32x1xf32>
    %132 = math.sqrt %131 : vector<32x1xf32>
    %133 = vector.broadcast %109 : vector<32x1xf32> to vector<32x64xf32>
    %134 = arith.subf %1, %133 : vector<32x64xf32>
    %135 = vector.broadcast %132 : vector<32x1xf32> to vector<32x64xf32>
    %136 = arith.mulf %135, %134 : vector<32x64xf32>
    %137 = math.rsqrt %118 : vector<32x1xf32>
    %138 = vector.broadcast %137 : vector<32x1xf32> to vector<32x64xf32>
    %139 = arith.mulf %136, %138 : vector<32x64xf32>
    %140 = vector.broadcast %122 : vector<32x1xf32> to vector<32x64xf32>
    %141 = arith.addf %139, %140 : vector<32x64xf32>
    %c0_59 = arith.constant 0 : index
    %c0_60 = arith.constant 0 : index
    %c0_61 = arith.constant 0 : index
    %142 = vector.load %arg13[%c0_59, %c0_60, %c0_61] : memref<1x32x64xf32, #tpu.memory_space<vmem>>, vector<1x32x64xf32>
    %143 = vector.shape_cast %142 : vector<1x32x64xf32> to vector<32x64xf32>
    %144 = vector.shape_cast %141 : vector<32x64xf32> to vector<1x32x64xf32>
    tpu.vector_store %arg13[%c0_59, %c0_60, %c0_61], %144 {strides = array<i32>} : memref<1x32x64xf32, #tpu.memory_space<vmem>>, vector<1x32x64xf32>,
    return
  }
  func.func @transform_0(%arg0: i32) -> (i32, i32, i32) {
    %c0_i32 = arith.constant 0 : i32
    %c0_i32_0 = arith.constant 0 : i32
    %c0_i32_1 = arith.constant 0 : i32
    return %arg0, %c0_i32, %c0_i32_0 : i32, i32, i32
  }
  func.func @transform_1(%arg0: i32) -> (i32, i32, i32) {
    %c0_i32 = arith.constant 0 : i32
    %c0_i32_0 = arith.constant 0 : i32
    %c0_i32_1 = arith.constant 0 : i32
    return %arg0, %c0_i32, %c0_i32_0 : i32, i32, i32
  }
  func.func @transform_2(%arg0: i32) -> (i32, i32, i32) {
    %c0_i32 = arith.constant 0 : i32
    %c0_i32_0 = arith.constant 0 : i32
    %c0_i32_1 = arith.constant 0 : i32
    return %arg0, %c0_i32, %c0_i32_0 : i32, i32, i32
  }
  func.func @transform_3(%arg0: i32) -> (i32, i32, i32) {
    %c0_i32 = arith.constant 0 : i32
    %c0_i32_0 = arith.constant 0 : i32
    %c0_i32_1 = arith.constant 0 : i32
    return %arg0, %c0_i32, %c0_i32_0 : i32, i32, i32
  }
  func.func @transform_4(%arg0: i32) -> (i32, i32) {
    %c0_i32 = arith.constant 0 : i32
    %c0_i32_0 = arith.constant 0 : i32
    %c0_i32_1 = arith.constant 0 : i32
    return %c0_i32, %c0_i32_0 : i32, i32
  }
  func.func @transform_5(%arg0: i32) -> (i32, i32) {
    %c0_i32 = arith.constant 0 : i32
    %c0_i32_0 = arith.constant 0 : i32
    %c0_i32_1 = arith.constant 0 : i32
    return %c0_i32, %c0_i32_0 : i32, i32
  }
  func.func @transform_6(%arg0: i32) -> (i32, i32) {
    %c0_i32 = arith.constant 0 : i32
    %c0_i32_0 = arith.constant 0 : i32
    %c0_i32_1 = arith.constant 0 : i32
    return %c0_i32, %c0_i32_0 : i32, i32
  }
  func.func @transform_7(%arg0: i32) -> (i32, i32) {
    %c0_i32 = arith.constant 0 : i32
    %c0_i32_0 = arith.constant 0 : i32
    %c0_i32_1 = arith.constant 0 : i32
    return %c0_i32, %c0_i32_0 : i32, i32
  }
  func.func @transform_8(%arg0: i32) -> (i32, i32) {
    %c0_i32 = arith.constant 0 : i32
    %c0_i32_0 = arith.constant 0 : i32
    %c0_i32_1 = arith.constant 0 : i32
    return %c0_i32, %c0_i32_0 : i32, i32
  }
  func.func @transform_9(%arg0: i32) -> (i32, i32) {
    %c0_i32 = arith.constant 0 : i32
    %c0_i32_0 = arith.constant 0 : i32
    %c0_i32_1 = arith.constant 0 : i32
    return %c0_i32, %c0_i32_0 : i32, i32
  }
  func.func @transform_10(%arg0: i32) -> (i32, i32) {
    %c0_i32 = arith.constant 0 : i32
    %c0_i32_0 = arith.constant 0 : i32
    %c0_i32_1 = arith.constant 0 : i32
    return %c0_i32, %c0_i32_0 : i32, i32
  }
  func.func @transform_11(%arg0: i32) -> (i32, i32) {
    %c0_i32 = arith.constant 0 : i32
    %c0_i32_0 = arith.constant 0 : i32
    %c0_i32_1 = arith.constant 0 : i32
    return %c0_i32, %c0_i32_0 : i32, i32
  }
  func.func @transform_12(%arg0: i32) -> (i32, i32, i32) {
    %c0_i32 = arith.constant 0 : i32
    %c0_i32_0 = arith.constant 0 : i32
    %c0_i32_1 = arith.constant 0 : i32
    return %arg0, %c0_i32, %c0_i32_0 : i32, i32, i32
  }
}

module attributes {stable_mosaic.version = 11 : i64} {
  func.func @_ada_attn_kernel(%arg0: i32, %arg1: memref<1x32x256xf32, #tpu.memory_space<vmem>>, %arg2: memref<1x32x256xf32, #tpu.memory_space<vmem>>, %arg3: memref<1x32x256xf32, #tpu.memory_space<vmem>>, %arg4: memref<1x32x256xf32, #tpu.memory_space<vmem>>, %arg5: memref<32x32xf32, #tpu.memory_space<vmem>>, %arg6: memref<32x1xf32, #tpu.memory_space<vmem>>, %arg7: memref<32x32xf32, #tpu.memory_space<vmem>>, %arg8: memref<32x1xf32, #tpu.memory_space<vmem>>, %arg9: memref<32x32xf32, #tpu.memory_space<vmem>>, %arg10: memref<32x1xf32, #tpu.memory_space<vmem>>, %arg11: memref<32x32xf32, #tpu.memory_space<vmem>>, %arg12: memref<32x1xf32, #tpu.memory_space<vmem>>, %arg13: memref<1x32x256xf32, #tpu.memory_space<vmem>>) attributes {dimension_semantics = [#tpu.dimension_semantics<parallel>], iteration_bounds = array<i64: 2>, scalar_prefetch = 0 : i64, scratch_operands = 0 : i64, tpu.core_type = #tpu.core_type<tc>, window_params = [{transform_indices = @transform_0, window_bounds = array<i64: 1, 32, 256>}, {transform_indices = @transform_1, window_bounds = array<i64: 1, 32, 256>}, {transform_indices = @transform_2, window_bounds = array<i64: 1, 32, 256>}, {transform_indices = @transform_3, window_bounds = array<i64: 1, 32, 256>}, {pipeline_mode = #tpu.pipeline_mode<synchronous>, transform_indices = @transform_4, window_bounds = array<i64: 32, 32>}, {pipeline_mode = #tpu.pipeline_mode<synchronous>, transform_indices = @transform_5, window_bounds = array<i64: 32, 1>}, {pipeline_mode = #tpu.pipeline_mode<synchronous>, transform_indices = @transform_6, window_bounds = array<i64: 32, 32>}, {pipeline_mode = #tpu.pipeline_mode<synchronous>, transform_indices = @transform_7, window_bounds = array<i64: 32, 1>}, {pipeline_mode = #tpu.pipeline_mode<synchronous>, transform_indices = @transform_8, window_bounds = array<i64: 32, 32>}, {pipeline_mode = #tpu.pipeline_mode<synchronous>, transform_indices = @transform_9, window_bounds = array<i64: 32, 1>}, {pipeline_mode = #tpu.pipeline_mode<synchronous>, transform_indices = @transform_10, window_bounds = array<i64: 32, 32>}, {pipeline_mode = #tpu.pipeline_mode<synchronous>, transform_indices = @transform_11, window_bounds = array<i64: 32, 1>}, {transform_indices = @transform_12, window_bounds = array<i64: 1, 32, 256>}]} {
    %c0 = arith.constant 0 : index
    %c0_0 = arith.constant 0 : index
    %c0_1 = arith.constant 0 : index
    %0 = vector.load %arg1[%c0, %c0_0, %c0_1] : memref<1x32x256xf32, #tpu.memory_space<vmem>>, vector<1x32x256xf32>
    %1 = vector.shape_cast %0 : vector<1x32x256xf32> to vector<32x256xf32>
    %c0_2 = arith.constant 0 : index
    %c0_3 = arith.constant 0 : index
    %c0_4 = arith.constant 0 : index
    %2 = vector.load %arg2[%c0_2, %c0_3, %c0_4] : memref<1x32x256xf32, #tpu.memory_space<vmem>>, vector<1x32x256xf32>
    %3 = vector.shape_cast %2 : vector<1x32x256xf32> to vector<32x256xf32>
    %c0_5 = arith.constant 0 : index
    %c0_6 = arith.constant 0 : index
    %c0_7 = arith.constant 0 : index
    %4 = vector.load %arg3[%c0_5, %c0_6, %c0_7] : memref<1x32x256xf32, #tpu.memory_space<vmem>>, vector<1x32x256xf32>
    %5 = vector.shape_cast %4 : vector<1x32x256xf32> to vector<32x256xf32>
    %c0_8 = arith.constant 0 : index
    %c0_9 = arith.constant 0 : index
    %c0_10 = arith.constant 0 : index
    %6 = vector.load %arg4[%c0_8, %c0_9, %c0_10] : memref<1x32x256xf32, #tpu.memory_space<vmem>>, vector<1x32x256xf32>
    %7 = vector.shape_cast %6 : vector<1x32x256xf32> to vector<32x256xf32>
    %cst = arith.constant dense<0.000000e+00> : vector<32xf32>
    %8 = vector.multi_reduction <add>, %5, %cst [1] : vector<32x256xf32> to vector<32xf32>
    %9 = vector.shape_cast %8 : vector<32xf32> to vector<32x1xf32>
    %cst_11 = arith.constant 2.560000e+02 : f32
    %10 = vector.broadcast %cst_11 : f32 to vector<32x1xf32>
    %11 = arith.divf %9, %10 : vector<32x1xf32>
    %12 = vector.broadcast %11 : vector<32x1xf32> to vector<32x256xf32>
    %13 = arith.subf %5, %12 : vector<32x256xf32>
    %14 = arith.mulf %13, %13 : vector<32x256xf32>
    %cst_12 = arith.constant dense<0.000000e+00> : vector<32xf32>
    %15 = vector.multi_reduction <add>, %14, %cst_12 [1] : vector<32x256xf32> to vector<32xf32>
    %16 = vector.shape_cast %15 : vector<32xf32> to vector<32x1xf32>
    %cst_13 = arith.constant 2.550000e+02 : f32
    %17 = vector.broadcast %cst_13 : f32 to vector<32x1xf32>
    %18 = arith.divf %16, %17 : vector<32x1xf32>
    %cst_14 = arith.constant 9.99999974E-6 : f32
    %19 = vector.broadcast %cst_14 : f32 to vector<32x1xf32>
    %20 = arith.addf %18, %19 : vector<32x1xf32>
    %21 = vector.broadcast %11 : vector<32x1xf32> to vector<32x256xf32>
    %22 = arith.subf %5, %21 : vector<32x256xf32>
    %23 = math.rsqrt %20 : vector<32x1xf32>
    %24 = vector.broadcast %23 : vector<32x1xf32> to vector<32x256xf32>
    %25 = arith.mulf %22, %24 : vector<32x256xf32>
    %c0_15 = arith.constant 0 : index
    %c0_16 = arith.constant 0 : index
    %26 = vector.load %arg5[%c0_15, %c0_16] : memref<32x32xf32, #tpu.memory_space<vmem>>, vector<32x32xf32>
    %27 = arith.truncf %26 : vector<32x32xf32> to vector<32x32xbf16>
    %28 = arith.truncf %25 : vector<32x256xf32> to vector<32x256xbf16>
    %cst_17 = arith.constant dense<0.000000e+00> : vector<32x256xf32>
    %29 = tpu.matmul %27, %28, %cst_17 {dimension_numbers = #tpu.dot_dimension_numbers<[1], [0], [0], [1], [0, 0, 1, 1], [], []>} : vector<32x32xbf16>, vector<32x256xbf16>, vector<32x256xf32> -> vector<32x256xf32>
    %c0_18 = arith.constant 0 : index
    %c0_19 = arith.constant 0 : index
    %30 = vector.load %arg6[%c0_18, %c0_19] : memref<32x1xf32, #tpu.memory_space<vmem>>, vector<32x1xf32>
    %31 = vector.broadcast %30 : vector<32x1xf32> to vector<32x256xf32>
    %32 = arith.addf %29, %31 : vector<32x256xf32>
    %cst_20 = arith.constant dense<0.000000e+00> : vector<32xf32>
    %33 = vector.multi_reduction <add>, %7, %cst_20 [1] : vector<32x256xf32> to vector<32xf32>
    %34 = vector.shape_cast %33 : vector<32xf32> to vector<32x1xf32>
    %cst_21 = arith.constant 2.560000e+02 : f32
    %35 = vector.broadcast %cst_21 : f32 to vector<32x1xf32>
    %36 = arith.divf %34, %35 : vector<32x1xf32>
    %37 = vector.broadcast %36 : vector<32x1xf32> to vector<32x256xf32>
    %38 = arith.subf %7, %37 : vector<32x256xf32>
    %39 = arith.mulf %38, %38 : vector<32x256xf32>
    %cst_22 = arith.constant dense<0.000000e+00> : vector<32xf32>
    %40 = vector.multi_reduction <add>, %39, %cst_22 [1] : vector<32x256xf32> to vector<32xf32>
    %41 = vector.shape_cast %40 : vector<32xf32> to vector<32x1xf32>
    %cst_23 = arith.constant 2.550000e+02 : f32
    %42 = vector.broadcast %cst_23 : f32 to vector<32x1xf32>
    %43 = arith.divf %41, %42 : vector<32x1xf32>
    %cst_24 = arith.constant 9.99999974E-6 : f32
    %44 = vector.broadcast %cst_24 : f32 to vector<32x1xf32>
    %45 = arith.addf %43, %44 : vector<32x1xf32>
    %46 = vector.broadcast %36 : vector<32x1xf32> to vector<32x256xf32>
    %47 = arith.subf %7, %46 : vector<32x256xf32>
    %48 = math.rsqrt %45 : vector<32x1xf32>
    %49 = vector.broadcast %48 : vector<32x1xf32> to vector<32x256xf32>
    %50 = arith.mulf %47, %49 : vector<32x256xf32>
    %c0_25 = arith.constant 0 : index
    %c0_26 = arith.constant 0 : index
    %51 = vector.load %arg7[%c0_25, %c0_26] : memref<32x32xf32, #tpu.memory_space<vmem>>, vector<32x32xf32>
    %52 = arith.truncf %51 : vector<32x32xf32> to vector<32x32xbf16>
    %53 = arith.truncf %50 : vector<32x256xf32> to vector<32x256xbf16>
    %cst_27 = arith.constant dense<0.000000e+00> : vector<32x256xf32>
    %54 = tpu.matmul %52, %53, %cst_27 {dimension_numbers = #tpu.dot_dimension_numbers<[1], [0], [0], [1], [0, 0, 1, 1], [], []>} : vector<32x32xbf16>, vector<32x256xbf16>, vector<32x256xf32> -> vector<32x256xf32>
    %c0_28 = arith.constant 0 : index
    %c0_29 = arith.constant 0 : index
    %55 = vector.load %arg8[%c0_28, %c0_29] : memref<32x1xf32, #tpu.memory_space<vmem>>, vector<32x1xf32>
    %56 = vector.broadcast %55 : vector<32x1xf32> to vector<32x256xf32>
    %57 = arith.addf %54, %56 : vector<32x256xf32>
    %cst_30 = arith.constant dense<0.000000e+00> : vector<32xf32>
    %58 = vector.multi_reduction <add>, %3, %cst_30 [1] : vector<32x256xf32> to vector<32xf32>
    %59 = vector.shape_cast %58 : vector<32xf32> to vector<32x1xf32>
    %cst_31 = arith.constant 2.560000e+02 : f32
    %60 = vector.broadcast %cst_31 : f32 to vector<32x1xf32>
    %61 = arith.divf %59, %60 : vector<32x1xf32>
    %62 = vector.broadcast %61 : vector<32x1xf32> to vector<32x256xf32>
    %63 = arith.subf %3, %62 : vector<32x256xf32>
    %64 = arith.mulf %63, %63 : vector<32x256xf32>
    %cst_32 = arith.constant dense<0.000000e+00> : vector<32xf32>
    %65 = vector.multi_reduction <add>, %64, %cst_32 [1] : vector<32x256xf32> to vector<32xf32>
    %66 = vector.shape_cast %65 : vector<32xf32> to vector<32x1xf32>
    %cst_33 = arith.constant 2.550000e+02 : f32
    %67 = vector.broadcast %cst_33 : f32 to vector<32x1xf32>
    %68 = arith.divf %66, %67 : vector<32x1xf32>
    %cst_34 = arith.constant 9.99999974E-6 : f32
    %69 = vector.broadcast %cst_34 : f32 to vector<32x1xf32>
    %70 = arith.addf %68, %69 : vector<32x1xf32>
    %71 = vector.broadcast %61 : vector<32x1xf32> to vector<32x256xf32>
    %72 = arith.subf %3, %71 : vector<32x256xf32>
    %73 = math.rsqrt %70 : vector<32x1xf32>
    %74 = vector.broadcast %73 : vector<32x1xf32> to vector<32x256xf32>
    %75 = arith.mulf %72, %74 : vector<32x256xf32>
    %c0_35 = arith.constant 0 : index
    %c0_36 = arith.constant 0 : index
    %76 = vector.load %arg9[%c0_35, %c0_36] : memref<32x32xf32, #tpu.memory_space<vmem>>, vector<32x32xf32>
    %77 = arith.truncf %76 : vector<32x32xf32> to vector<32x32xbf16>
    %78 = arith.truncf %75 : vector<32x256xf32> to vector<32x256xbf16>
    %cst_37 = arith.constant dense<0.000000e+00> : vector<32x256xf32>
    %79 = tpu.matmul %77, %78, %cst_37 {dimension_numbers = #tpu.dot_dimension_numbers<[1], [0], [0], [1], [0, 0, 1, 1], [], []>} : vector<32x32xbf16>, vector<32x256xbf16>, vector<32x256xf32> -> vector<32x256xf32>
    %c0_38 = arith.constant 0 : index
    %c0_39 = arith.constant 0 : index
    %80 = vector.load %arg10[%c0_38, %c0_39] : memref<32x1xf32, #tpu.memory_space<vmem>>, vector<32x1xf32>
    %81 = vector.broadcast %80 : vector<32x1xf32> to vector<32x256xf32>
    %82 = arith.addf %79, %81 : vector<32x256xf32>
    %83 = arith.truncf %32 : vector<32x256xf32> to vector<32x256xbf16>
    %84 = arith.truncf %57 : vector<32x256xf32> to vector<32x256xbf16>
    %cst_40 = arith.constant dense<0.000000e+00> : vector<256x256xf32>
    %85 = tpu.matmul %83, %84, %cst_40 {dimension_numbers = #tpu.dot_dimension_numbers<[0], [0], [1], [1], [0, 1, 1, 1], [], []>} : vector<32x256xbf16>, vector<32x256xbf16>, vector<256x256xf32> -> vector<256x256xf32>
    %cst_41 = arith.constant dense<0xFF800000> : vector<256xf32>
    %86 = vector.multi_reduction <maximumf>, %85, %cst_41 [1] : vector<256x256xf32> to vector<256xf32>
    %87 = vector.shape_cast %86 : vector<256xf32> to vector<256x1xf32>
    %88 = vector.broadcast %87 : vector<256x1xf32> to vector<256x256xf32>
    %89 = arith.subf %85, %88 : vector<256x256xf32>
    %90 = math.exp %89 : vector<256x256xf32>
    %cst_42 = arith.constant dense<0.000000e+00> : vector<256xf32>
    %91 = vector.multi_reduction <add>, %90, %cst_42 [1] : vector<256x256xf32> to vector<256xf32>
    %92 = vector.shape_cast %91 : vector<256xf32> to vector<256x1xf32>
    %93 = tpu.reciprocal %92 {approx = true} : vector<256x1xf32> -> vector<256x1xf32>
    %94 = vector.broadcast %93 : vector<256x1xf32> to vector<256x256xf32>
    %95 = arith.mulf %90, %94 : vector<256x256xf32>
    %96 = arith.truncf %82 : vector<32x256xf32> to vector<32x256xbf16>
    %97 = arith.truncf %95 : vector<256x256xf32> to vector<256x256xbf16>
    %cst_43 = arith.constant dense<0.000000e+00> : vector<32x256xf32>
    %98 = tpu.matmul %96, %97, %cst_43 {dimension_numbers = #tpu.dot_dimension_numbers<[1], [1], [0], [0], [0, 0, 1, 0], [], []>} : vector<32x256xbf16>, vector<256x256xbf16>, vector<32x256xf32> -> vector<32x256xf32>
    %c0_44 = arith.constant 0 : index
    %c0_45 = arith.constant 0 : index
    %99 = vector.load %arg11[%c0_44, %c0_45] : memref<32x32xf32, #tpu.memory_space<vmem>>, vector<32x32xf32>
    %100 = arith.truncf %99 : vector<32x32xf32> to vector<32x32xbf16>
    %101 = arith.truncf %98 : vector<32x256xf32> to vector<32x256xbf16>
    %cst_46 = arith.constant dense<0.000000e+00> : vector<32x256xf32>
    %102 = tpu.matmul %100, %101, %cst_46 {dimension_numbers = #tpu.dot_dimension_numbers<[1], [0], [0], [1], [0, 0, 1, 1], [], []>} : vector<32x32xbf16>, vector<32x256xbf16>, vector<32x256xf32> -> vector<32x256xf32>
    %c0_47 = arith.constant 0 : index
    %c0_48 = arith.constant 0 : index
    %103 = vector.load %arg12[%c0_47, %c0_48] : memref<32x1xf32, #tpu.memory_space<vmem>>, vector<32x1xf32>
    %104 = vector.broadcast %103 : vector<32x1xf32> to vector<32x256xf32>
    %105 = arith.addf %102, %104 : vector<32x256xf32>
    %cst_49 = arith.constant dense<0.000000e+00> : vector<32xf32>
    %106 = vector.multi_reduction <add>, %1, %cst_49 [1] : vector<32x256xf32> to vector<32xf32>
    %107 = vector.shape_cast %106 : vector<32xf32> to vector<32x1xf32>
    %cst_50 = arith.constant 2.560000e+02 : f32
    %108 = vector.broadcast %cst_50 : f32 to vector<32x1xf32>
    %109 = arith.divf %107, %108 : vector<32x1xf32>
    %110 = vector.broadcast %109 : vector<32x1xf32> to vector<32x256xf32>
    %111 = arith.subf %1, %110 : vector<32x256xf32>
    %112 = arith.mulf %111, %111 : vector<32x256xf32>
    %cst_51 = arith.constant dense<0.000000e+00> : vector<32xf32>
    %113 = vector.multi_reduction <add>, %112, %cst_51 [1] : vector<32x256xf32> to vector<32xf32>
    %114 = vector.shape_cast %113 : vector<32xf32> to vector<32x1xf32>
    %cst_52 = arith.constant 2.550000e+02 : f32
    %115 = vector.broadcast %cst_52 : f32 to vector<32x1xf32>
    %116 = arith.divf %114, %115 : vector<32x1xf32>
    %cst_53 = arith.constant 9.99999974E-6 : f32
    %117 = vector.broadcast %cst_53 : f32 to vector<32x1xf32>
    %118 = arith.addf %116, %117 : vector<32x1xf32>
    %cst_54 = arith.constant dense<0.000000e+00> : vector<32xf32>
    %119 = vector.multi_reduction <add>, %105, %cst_54 [1] : vector<32x256xf32> to vector<32xf32>
    %120 = vector.shape_cast %119 : vector<32xf32> to vector<32x1xf32>
    %cst_55 = arith.constant 2.560000e+02 : f32
    %121 = vector.broadcast %cst_55 : f32 to vector<32x1xf32>
    %122 = arith.divf %120, %121 : vector<32x1xf32>
    %123 = vector.broadcast %122 : vector<32x1xf32> to vector<32x256xf32>
    %124 = arith.subf %105, %123 : vector<32x256xf32>
    %125 = arith.mulf %124, %124 : vector<32x256xf32>
    %cst_56 = arith.constant dense<0.000000e+00> : vector<32xf32>
    %126 = vector.multi_reduction <add>, %125, %cst_56 [1] : vector<32x256xf32> to vector<32xf32>
    %127 = vector.shape_cast %126 : vector<32xf32> to vector<32x1xf32>
    %cst_57 = arith.constant 2.550000e+02 : f32
    %128 = vector.broadcast %cst_57 : f32 to vector<32x1xf32>
    %129 = arith.divf %127, %128 : vector<32x1xf32>
    %cst_58 = arith.constant 9.99999974E-6 : f32
    %130 = vector.broadcast %cst_58 : f32 to vector<32x1xf32>
    %131 = arith.addf %129, %130 : vector<32x1xf32>
    %132 = math.sqrt %131 : vector<32x1xf32>
    %133 = vector.broadcast %109 : vector<32x1xf32> to vector<32x256xf32>
    %134 = arith.subf %1, %133 : vector<32x256xf32>
    %135 = vector.broadcast %132 : vector<32x1xf32> to vector<32x256xf32>
    %136 = arith.mulf %135, %134 : vector<32x256xf32>
    %137 = math.rsqrt %118 : vector<32x1xf32>
    %138 = vector.broadcast %137 : vector<32x1xf32> to vector<32x256xf32>
    %139 = arith.mulf %136, %138 : vector<32x256xf32>
    %140 = vector.broadcast %122 : vector<32x1xf32> to vector<32x256xf32>
    %141 = arith.addf %139, %140 : vector<32x256xf32>
    %c0_59 = arith.constant 0 : index
    %c0_60 = arith.constant 0 : index
    %c0_61 = arith.constant 0 : index
    %142 = vector.load %arg13[%c0_59, %c0_60, %c0_61] : memref<1x32x256xf32, #tpu.memory_space<vmem>>, vector<1x32x256xf32>
    %143 = vector.shape_cast %142 : vector<1x32x256xf32> to vector<32x256xf32>
    %144 = vector.shape_cast %141 : vector<32x256xf32> to vector<1x32x256xf32>
    tpu.vector_store %arg13[%c0_59, %c0_60, %c0_61], %144 {strides = array<i32>} : memref<1x32x256xf32, #tpu.memory_space<vmem>>, vector<1x32x256xf32>,
    return
  }
  func.func @transform_0(%arg0: i32) -> (i32, i32, i32) {
    %c0_i32 = arith.constant 0 : i32
    %c0_i32_0 = arith.constant 0 : i32
    %c0_i32_1 = arith.constant 0 : i32
    return %arg0, %c0_i32, %c0_i32_0 : i32, i32, i32
  }
  func.func @transform_1(%arg0: i32) -> (i32, i32, i32) {
    %c0_i32 = arith.constant 0 : i32
    %c0_i32_0 = arith.constant 0 : i32
    %c0_i32_1 = arith.constant 0 : i32
    return %arg0, %c0_i32, %c0_i32_0 : i32, i32, i32
  }
  func.func @transform_2(%arg0: i32) -> (i32, i32, i32) {
    %c0_i32 = arith.constant 0 : i32
    %c0_i32_0 = arith.constant 0 : i32
    %c0_i32_1 = arith.constant 0 : i32
    return %arg0, %c0_i32, %c0_i32_0 : i32, i32, i32
  }
  func.func @transform_3(%arg0: i32) -> (i32, i32, i32) {
    %c0_i32 = arith.constant 0 : i32
    %c0_i32_0 = arith.constant 0 : i32
    %c0_i32_1 = arith.constant 0 : i32
    return %arg0, %c0_i32, %c0_i32_0 : i32, i32, i32
  }
  func.func @transform_4(%arg0: i32) -> (i32, i32) {
    %c0_i32 = arith.constant 0 : i32
    %c0_i32_0 = arith.constant 0 : i32
    %c0_i32_1 = arith.constant 0 : i32
    return %c0_i32, %c0_i32_0 : i32, i32
  }
  func.func @transform_5(%arg0: i32) -> (i32, i32) {
    %c0_i32 = arith.constant 0 : i32
    %c0_i32_0 = arith.constant 0 : i32
    %c0_i32_1 = arith.constant 0 : i32
    return %c0_i32, %c0_i32_0 : i32, i32
  }
  func.func @transform_6(%arg0: i32) -> (i32, i32) {
    %c0_i32 = arith.constant 0 : i32
    %c0_i32_0 = arith.constant 0 : i32
    %c0_i32_1 = arith.constant 0 : i32
    return %c0_i32, %c0_i32_0 : i32, i32
  }
  func.func @transform_7(%arg0: i32) -> (i32, i32) {
    %c0_i32 = arith.constant 0 : i32
    %c0_i32_0 = arith.constant 0 : i32
    %c0_i32_1 = arith.constant 0 : i32
    return %c0_i32, %c0_i32_0 : i32, i32
  }
  func.func @transform_8(%arg0: i32) -> (i32, i32) {
    %c0_i32 = arith.constant 0 : i32
    %c0_i32_0 = arith.constant 0 : i32
    %c0_i32_1 = arith.constant 0 : i32
    return %c0_i32, %c0_i32_0 : i32, i32
  }
  func.func @transform_9(%arg0: i32) -> (i32, i32) {
    %c0_i32 = arith.constant 0 : i32
    %c0_i32_0 = arith.constant 0 : i32
    %c0_i32_1 = arith.constant 0 : i32
    return %c0_i32, %c0_i32_0 : i32, i32
  }
  func.func @transform_10(%arg0: i32) -> (i32, i32) {
    %c0_i32 = arith.constant 0 : i32
    %c0_i32_0 = arith.constant 0 : i32
    %c0_i32_1 = arith.constant 0 : i32
    return %c0_i32, %c0_i32_0 : i32, i32
  }
  func.func @transform_11(%arg0: i32) -> (i32, i32) {
    %c0_i32 = arith.constant 0 : i32
    %c0_i32_0 = arith.constant 0 : i32
    %c0_i32_1 = arith.constant 0 : i32
    return %c0_i32, %c0_i32_0 : i32, i32
  }
  func.func @transform_12(%arg0: i32) -> (i32, i32, i32) {
    %c0_i32 = arith.constant 0 : i32
    %c0_i32_0 = arith.constant 0 : i32
    %c0_i32_1 = arith.constant 0 : i32
    return %arg0, %c0_i32, %c0_i32_0 : i32, i32, i32
  }
}

module attributes {stable_mosaic.version = 11 : i64} {
  func.func @_merge_conv_kernel(%arg0: i32, %arg1: memref<1x288x256xf32, #tpu.memory_space<vmem>>, %arg2: memref<32x288xf32, #tpu.memory_space<vmem>>, %arg3: memref<32x1xf32, #tpu.memory_space<vmem>>, %arg4: memref<1x32x256xf32, #tpu.memory_space<vmem>>) attributes {dimension_semantics = [#tpu.dimension_semantics<parallel>], iteration_bounds = array<i64: 2>, scalar_prefetch = 0 : i64, scratch_operands = 0 : i64, tpu.core_type = #tpu.core_type<tc>, window_params = [{transform_indices = @transform_0, window_bounds = array<i64: 1, 288, 256>}, {pipeline_mode = #tpu.pipeline_mode<synchronous>, transform_indices = @transform_1, window_bounds = array<i64: 32, 288>}, {pipeline_mode = #tpu.pipeline_mode<synchronous>, transform_indices = @transform_2, window_bounds = array<i64: 32, 1>}, {transform_indices = @transform_3, window_bounds = array<i64: 1, 32, 256>}]} {
    %c0 = arith.constant 0 : index
    %c0_0 = arith.constant 0 : index
    %0 = vector.load %arg2[%c0, %c0_0] : memref<32x288xf32, #tpu.memory_space<vmem>>, vector<32x288xf32>
    %1 = arith.truncf %0 : vector<32x288xf32> to vector<32x288xbf16>
    %c0_1 = arith.constant 0 : index
    %c0_2 = arith.constant 0 : index
    %c0_3 = arith.constant 0 : index
    %2 = vector.load %arg1[%c0_1, %c0_2, %c0_3] : memref<1x288x256xf32, #tpu.memory_space<vmem>>, vector<1x288x256xf32>
    %3 = vector.shape_cast %2 : vector<1x288x256xf32> to vector<288x256xf32>
    %4 = arith.truncf %3 : vector<288x256xf32> to vector<288x256xbf16>
    %cst = arith.constant dense<0.000000e+00> : vector<32x256xf32>
    %5 = tpu.matmul %1, %4, %cst {dimension_numbers = #tpu.dot_dimension_numbers<[1], [0], [0], [1], [0, 0, 1, 1], [], []>} : vector<32x288xbf16>, vector<288x256xbf16>, vector<32x256xf32> -> vector<32x256xf32>
    %c0_4 = arith.constant 0 : index
    %c0_5 = arith.constant 0 : index
    %6 = vector.load %arg3[%c0_4, %c0_5] : memref<32x1xf32, #tpu.memory_space<vmem>>, vector<32x1xf32>
    %7 = vector.broadcast %6 : vector<32x1xf32> to vector<32x256xf32>
    %8 = arith.addf %5, %7 : vector<32x256xf32>
    %c0_6 = arith.constant 0 : index
    %c0_7 = arith.constant 0 : index
    %c0_8 = arith.constant 0 : index
    %9 = vector.load %arg4[%c0_6, %c0_7, %c0_8] : memref<1x32x256xf32, #tpu.memory_space<vmem>>, vector<1x32x256xf32>
    %10 = vector.shape_cast %9 : vector<1x32x256xf32> to vector<32x256xf32>
    %11 = vector.shape_cast %8 : vector<32x256xf32> to vector<1x32x256xf32>
    tpu.vector_store %arg4[%c0_6, %c0_7, %c0_8], %11 {strides = array<i32>} : memref<1x32x256xf32, #tpu.memory_space<vmem>>, vector<1x32x256xf32>,
    return
  }
  func.func @transform_0(%arg0: i32) -> (i32, i32, i32) {
    %c0_i32 = arith.constant 0 : i32
    %c0_i32_0 = arith.constant 0 : i32
    %c0_i32_1 = arith.constant 0 : i32
    return %arg0, %c0_i32, %c0_i32_0 : i32, i32, i32
  }
  func.func @transform_1(%arg0: i32) -> (i32, i32) {
    %c0_i32 = arith.constant 0 : i32
    %c0_i32_0 = arith.constant 0 : i32
    %c0_i32_1 = arith.constant 0 : i32
    return %c0_i32, %c0_i32_0 : i32, i32
  }
  func.func @transform_2(%arg0: i32) -> (i32, i32) {
    %c0_i32 = arith.constant 0 : i32
    %c0_i32_0 = arith.constant 0 : i32
    %c0_i32_1 = arith.constant 0 : i32
    return %c0_i32, %c0_i32_0 : i32, i32
  }
  func.func @transform_3(%arg0: i32) -> (i32, i32, i32) {
    %c0_i32 = arith.constant 0 : i32
    %c0_i32_0 = arith.constant 0 : i32
    %c0_i32_1 = arith.constant 0 : i32
    return %arg0, %c0_i32, %c0_i32_0 : i32, i32, i32
  }
}

</mosaic_0001>

<bundles_post_ra>
// kernel: transformer_forward.4
= control target key start
LH: loop header
LB: loop body
LE: loop exit
PB: predicated region body
PF: predicated region fallthrough
CT: control target
= control target key end

     0   :  { %s2473_s0 = inlined_call_operand.vmem [shape: f32[2,32,64], index: 0, kind: input, shape index: {}]   ;;  %s2474_s1 = inlined_call_operand.vmem [shape: f32[2,32,64], index: 1, kind: input, shape index: {}]   ;;  %s2475_s2 = inlined_call_operand.vmem [shape: f32[2,32,64], index: 2, kind: input, shape index: {}]   ;;  %s2476_s3 = inlined_call_operand.vmem [shape: f32[2,32,64], index: 3, kind: input, shape index: {}]   ;;  %s2477_s4 = inlined_call_operand.hbm [shape: f32[32,32], index: 4, kind: input, shape index: {}]   ;;  %s2478_s5 = inlined_call_operand.vmem [shape: f32[32,1], index: 5, kind: input, shape index: {}]   ;;  %s2479_s6 = inlined_call_operand.hbm [shape: f32[32,32], index: 6, kind: input, shape index: {}]   ;;  %s2480_s7 = inlined_call_operand.vmem [shape: f32[32,1], index: 7, kind: input, shape index: {}]   ;;  %s2481_s8 = inlined_call_operand.hbm [shape: f32[32,32], index: 8, kind: input, shape index: {}]   ;;  %s2482_s9 = inlined_call_operand.vmem [shape: f32[32,1], index: 9, kind: input, shape index: {}]   ;;  %s2483_s10 = inlined_call_operand.hbm [shape: f32[32,32], index: 10, kind: input, shape index: {}]   ;;  %s2484_s11 = inlined_call_operand.vmem [shape: f32[32,1], index: 11, kind: input, shape index: {}]   ;;  %s2485_s12 = inlined_call_operand.vmem [shape: f32[2,32,64], index: 12, kind: output, shape index: {}]  }
   0x1   :  { %2489 = sst [smem:[#allocation13_spill]] %s2485_s12 }
   0x2   :  { %17 = vsyncpa [#allocation3], 0 }
   0x3   :  { %18 = vsyncpa [#allocation5], 0 }
   0x4   :  { %19 = vsyncpa [#allocation8], 0  ;;  %s2046_s21 = smov 0  }
   0x5 LB: > { %2490 = sst [smem:[#allocation12_spill]] %s1972_s21  ;;  %s2052_s22 = sadd.s32 4294967295, %s1972_s21   ;;  %s1972_s21 = sphi %s2046_s21, %s25_s21  }
   0x6   : > { %p1586_p0 = scmp.ge.s32.totalorder %s1972_s21, 1  ;;  %p328_p1 = scmp.lt.s32.totalorder %s1972_s21, 3 }
   0x7   : > { %p2487_p2 = scmp.eq.s32.totalorder %s2052_s22, 0  ;;  %s1974_s24 = smov [#allocation4]  }
   0x8   : > { %p2057_p3 = pnand %p1586_p0, %p328_p1  ;;  %s356_s25 = sshll.u32 %s1974_s24, 4  ;;  %s2061_s25 = int_to_ptr.vmem [resolvable:$true] %s356_s25 }
   0x9   : > { %s1975_s26 = smov [#allocation2]   ;;  %s1976_s29 = smov [#allocation6]  }
   0xa   : > { %s2491_s23 = scalar_select %p2057_p3, 1, 0 }
   0xb   : > { %p1732_p4 = pneg %p2057_p3  ;;  %s340_s27 = sshll.u32 %s1975_s26, 4  ;;  %s2065_s27 = int_to_ptr.vmem [resolvable:$true] %s340_s27 }
   0xc   : > { %s372_s30 = sshll.u32 %s1976_s29, 4  ;;  %s1977_s13 = smov [#allocation7]   ;;  %s2073_s30 = int_to_ptr.vmem [resolvable:$true] %s372_s30 }
   0xd   : > { %p2069_p5 = pnand %p2487_p2, %p1732_p4  ;;  %s2075_s14 = sshll.u32 %s1977_s13, 4  ;;  %s389_s14 = int_to_ptr.vmem [resolvable:$true] %s2075_s14 }
   0xe   : > { %s1842_s17 = scalar_lea.hbm %s2479_s6, 512 }
   0xf   : > { %p1843_p6 = scmp.ne.s32.totalorder %s2479_s6, %s1842_s17  ;;  %p2085_p7 = pneg %p2069_p5 }
  0x10   : > { %p1849_p10 = scmp.lt.u32.totalorder %s1842_s17, %s2479_s6 }
  0x11   : > { %p1845_p8 = pnand %p2085_p7, %p1843_p6 }
  0x13   : > { %p1846_p9 = pneg %p1845_p8 }
  0x15   : > { %p1851_p11 = pnand %p1849_p10, %p1846_p9 }
  0x17   : > { %1854 = shalt.err (!%p1851_p11)
}
  0x18   : > { %s1855_s29 = scalar_lea.vmem %s2061_s25, 512  ;;  %p1863_p1 = scmp.lt.s32.totalorder %s2061_s25, %s2061_s25 }
  0x19   : > { %p1856_p12 = scmp.ne.s32.totalorder %s2061_s25, %s1855_s29  ;;  %p1864_p4 = scmp.lt.s32.totalorder %s1855_s29, %s1855_s29 }
  0x1b   : > { %p1858_p13 = pnand %p1856_p12, %p2085_p7  ;;  %p1865_p6 = por %p1864_p4, %p1863_p1 }
  0x1d   : > { %p1859_p0 = pneg %p1858_p13 }
  0x1f   : > { %p1866_p8 = pnand %p1865_p6, %p1859_p0 }
  0x21   : > { %1869 = shalt.err (!%p1866_p8)
}
  0x22   : > { %s1978_s13 = smov 128   ;;  %s1979_s15 = smov 8  }
  0x23   : > { %1738 = dma.hbm_to_vmem [thread:$0]  (!%p2069_p5), %s2479_s6, 512, %s2061_s25, [#allocation5], %s1978_s13, %s1978_s13, %s1979_s15  }
  0x24   : > { %s1870_s24 = scalar_lea.hbm %s2477_s4, 512 }
  0x25   : > { %p1871_p9 = scmp.ne.s32.totalorder %s2477_s4, %s1870_s24  ;;  %p1877_p12 = scmp.lt.u32.totalorder %s1870_s24, %s2477_s4 }
  0x27   : > { %p1873_p10 = pnand %p1871_p9, %p2085_p7 }
  0x29   : > { %p1874_p11 = pneg %p1873_p10 }
  0x2b   : > { %p1879_p13 = pnand %p1877_p12, %p1874_p11 }
  0x2d   : > { %1882 = shalt.err (!%p1879_p13)
}
  0x2e   : > { %s1883_s25 = scalar_lea.vmem %s2065_s27, 512  ;;  %p1891_p6 = scmp.lt.s32.totalorder %s2065_s27, %s2065_s27 }
  0x2f   : > { %p1884_p0 = scmp.ne.s32.totalorder %s2065_s27, %s1883_s25  ;;  %p1892_p8 = scmp.lt.s32.totalorder %s1883_s25, %s1883_s25 }
  0x31   : > { %p1886_p1 = pnand %p1884_p0, %p2085_p7  ;;  %p1893_p9 = por %p1892_p8, %p1891_p6 }
  0x33   : > { %p1887_p4 = pneg %p1886_p1 }
  0x35   : > { %p1894_p10 = pnand %p1893_p9, %p1887_p4 }
  0x37   : > { %1897 = shalt.err (!%p1894_p10)
}
  0x38   : > { %1735 = dma.hbm_to_vmem [thread:$0]  (!%p2069_p5), %s2477_s4, 512, %s2065_s27, [#allocation3], %s1978_s13, %s1978_s13, %s1979_s15  }
  0x39   : > { %s1898_s18 = scalar_lea.hbm %s2481_s8, 512 }
  0x3a   : > { %p1899_p11 = scmp.ne.s32.totalorder %s2481_s8, %s1898_s18  ;;  %p1905_p0 = scmp.lt.u32.totalorder %s1898_s18, %s2481_s8 }
  0x3c   : > { %p1901_p12 = pnand %p1899_p11, %p2085_p7 }
  0x3e   : > { %p1902_p13 = pneg %p1901_p12 }
  0x40   : > { %p1907_p1 = pnand %p1905_p0, %p1902_p13 }
  0x42   : > { %1910 = shalt.err (!%p1907_p1)
}
  0x43   : > { %s1911_s27 = scalar_lea.vmem %s2073_s30, 512  ;;  %p1919_p9 = scmp.lt.s32.totalorder %s2073_s30, %s2073_s30 }
  0x44   : > { %p1912_p4 = scmp.ne.s32.totalorder %s2073_s30, %s1911_s27  ;;  %p1920_p10 = scmp.lt.s32.totalorder %s1911_s27, %s1911_s27 }
  0x46   : > { %p1914_p6 = pnand %p1912_p4, %p2085_p7  ;;  %p1921_p11 = por %p1920_p10, %p1919_p9 }
  0x48   : > { %p1915_p8 = pneg %p1914_p6 }
  0x4a   : > { %p1922_p12 = pnand %p1921_p11, %p1915_p8 }
  0x4c   : > { %1925 = shalt.err (!%p1922_p12)
}
  0x4d   : > { %1741 = dma.hbm_to_vmem [thread:$0]  (!%p2069_p5), %s2481_s8, 512, %s2073_s30, [#allocation5], %s1978_s13, %s1978_s13, %s1979_s15  }
  0x4e   : > { %s1926_s17 = scalar_lea.hbm %s2483_s10, 512 }
  0x4f   : > { %p1927_p13 = scmp.ne.s32.totalorder %s2483_s10, %s1926_s17  ;;  %p1933_p4 = scmp.lt.u32.totalorder %s1926_s17, %s2483_s10 }
  0x51   : > { %p1929_p0 = pnand %p1927_p13, %p2085_p7 }
  0x53   : > { %p1930_p1 = pneg %p1929_p0 }
  0x55   : > { %p1935_p6 = pnand %p1933_p4, %p1930_p1 }
  0x57   : > { %1938 = shalt.err (!%p1935_p6)
}
  0x58   : > { %s1939_s29 = scalar_lea.vmem %s389_s14, 512  ;;  %p1947_p11 = scmp.lt.s32.totalorder %s389_s14, %s389_s14 }
  0x59   : > { %p1940_p8 = scmp.ne.s32.totalorder %s389_s14, %s1939_s29  ;;  %p1948_p12 = scmp.lt.s32.totalorder %s1939_s29, %s1939_s29 }
  0x5b   : > { %p1942_p9 = pnand %p1940_p8, %p2085_p7  ;;  %p1949_p2 = por %p1948_p12, %p1947_p11 }
  0x5d   : > { %p1943_p10 = pneg %p1942_p9 }
  0x5f   : > { %p1950_p3 = pnand %p1949_p2, %p1943_p10 }
  0x61   : > { %1953 = shalt.err (!%p1950_p3)
}
  0x62   : > { %1744 = dma.hbm_to_vmem [thread:$0]  (!%p2069_p5), %s2483_s10, 512, %s389_s14, [#allocation8], %s1978_s13, %s1978_s13, %s1979_s15  }
  0x63   : > { %p2494_p13 = scmp.ne.s32.totalorder %s2491_s23, 0 }
  0x64   : > { %p2495_p7 = scmp.eq.s32.totalorder (!%p2494_p13), %s2052_s22, 0 }
  0x65   : > { %439 = sbr.rel (%p2494_p13) target bundleno = 2151 (0x867), region = 68 }
  0x6c   : > { %1959 = dma.done.wait (%p2495_p7), [#allocation3], 512   ;;  %p2496_p0 = pmov %p2495_p7 }
  0x6e   : > { %1961 = vsyncadd (%p2496_p0), [#allocation3], 4294966784  ;;  %p2497_p2 = pmov %p2496_p0 }
  0x6f   : > { %p2498_p3 = pmov %p2496_p0 }
  0x70   : > { %1963 = dma.done.wait (%p2497_p2), [#allocation5], 1024  }
  0x71   : > { %1965 = vsyncadd (%p2498_p3), [#allocation5], 4294966272  ;;  %p2499_p1 = pmov %p2496_p0 }
  0x72   : > { %p2500_p5 = pmov %p2496_p0 }
  0x73   : > { %1967 = dma.done.wait (%p2499_p1), [#allocation8], 512  }
  0x74   : > { %1969 = vsyncadd (%p2500_p5), [#allocation8], 4294966784  ;;  %p508_p4 = scmp.lt.s32.totalorder %s2052_s22, 1  ;;  %vm550_vm0 = vcmask 523264   ;;  %v605_v56 = vld [vmem:[#allocation2] sm:$0xff]  ;;  %v606_v57 = vld [vmem:[#allocation2 + $0x8] sm:$0xff] }
  0x75   : > { %vm637_vm1 = vcmask 261120   ;;  %v609_v58 = vpack.c.bf16 %v606_v57, %v605_v56  ;;  %v614_v59 = vld [vmem:[%s2478_s5 + $0x8] sm:$0xff]  ;;  %v1980_v60 = vmov 0   ;;  %v613_v61 = vld [vmem:[%s2478_s5] sm:$0xff]  ;;  %v615_v62 = vld [vmem:[%s2478_s5 + $0x10] sm:$0xff]  ;;  %s2501_s17 = sld [smem:[#allocation13_spill]] }
  0x76   : > { %s2504_s22 = smov (!%p508_p4, %s2052_s22), 1  ;;  %1769 = vset.pattern.permute.xlu1 %v1980_v60  ;;  %1768 = vset.pattern.permute.xlu0 %v1980_v60  ;;  %v616_v63 = vld [vmem:[%s2478_s5 + $0x18] sm:$0xff]  ;;  %v747_v57 = vld [vmem:[#allocation4 + $0x10] sm:$0xff] }
  0x77   : > { %s2199_s23 = sshll.u32 %s2504_s22, 5  ;;  %1660 = vmatprep.mubr.msk.bf16.mxu1 %vm637_vm1, %v609_v58 }
  0x78   : > { %s522_s20 = scalar_lea.vmem %s2475_s2, %s2199_s23  ;;  %s527_s22 = scalar_lea.vmem %s2476_s3, %s2199_s23 }
  0x79   : > { %v542_v0 = vld [vmem:[%s522_s20] sm:$0xff]  ;;  %v544_v1 = vld [vmem:[%s522_s20 + $0x10] sm:$0xff]  ;;  %v543_v2 = vld [vmem:[%s522_s20 + $0x8] sm:$0xff]  ;;  %s2297_s25 = scalar_lea.vmem %s2474_s1, %s2199_s23  ;;  %s512_s12 = scalar_lea.vmem %s2473_s0, %s2199_s23 }
  0x7a   : > { %v551_v3 = vsel %vm550_vm0, %v542_v0, 0.0  ;;  %v557_v4 = vsel %vm550_vm0, %v544_v1, 0.0  ;;  %v545_v5 = vld [vmem:[%s522_s20 + $0x18] sm:$0xff]  ;;  %v554_v6 = vsel %vm550_vm0, %v543_v2, 0.0  ;;  %v546_v8 = vld [vmem:[%s527_s22] sm:$0xff]  ;;  %v547_v9 = vld [vmem:[%s527_s22 + $0x8] sm:$0xff] }
  0x7b   : > { %552 = vadd.xlane.f32.xlu0 %v551_v3  ;;  %558 = vadd.xlane.f32.xlu1 %v557_v4  ;;  %v560_v7 = vsel %vm550_vm0, %v545_v5, 0.0  ;;  %v693_v10 = vsel %vm550_vm0, %v546_v8, 0.0  ;;  %v696_v11 = vsel %vm550_vm0, %v547_v9, 0.0  ;;  %v548_v12 = vld [vmem:[%s527_s22 + $0x10] sm:$0xff]  ;;  %v549_v13 = vld [vmem:[%s527_s22 + $0x18] sm:$0xff]  ;;  %s532_s18 = scalar_lea.vmem %s2501_s17, %s2199_s23 }
  0x7c   : > { %v699_v14 = vsel %vm550_vm0, %v548_v12, 0.0  ;;  %v702_v15 = vsel %vm550_vm0, %v549_v13, 0.0  ;;  %v756_v3 = vld [vmem:[%s2480_s7 + $0x18] sm:$0xff] }
  0x7f   : > { %555 = vadd.xlane.f32.xlu0 %v554_v6  ;;  %561 = vadd.xlane.f32.xlu1 %v560_v7 }
  0x83   : > { %694 = vadd.xlane.f32.xlu0 %v693_v10  ;;  %697 = vadd.xlane.f32.xlu1 %v696_v11 }
  0x87   : > { %700 = vadd.xlane.f32.xlu0 %v699_v14  ;;  %703 = vadd.xlane.f32.xlu1 %v702_v15 }
 0x108   : > { %v553_v16 = vpop.xlane.xlu0 %552  ;;  %v559_v17 = vpop.xlane.xlu1 %558 }
 0x109   : > { %v564_v18 = vmul.f32 0.015625, %v553_v16  ;;  %v566_v19 = vmul.f32 0.015625, %v559_v17 }
 0x10b   : > { %v2217_v20 = vsub.f32 %v542_v0, %v564_v18  ;;  %v2219_v21 = vsub.f32 %v544_v1, %v566_v19  ;;  %v753_v0 = vld [vmem:[%s2480_s7] sm:$0xff]  ;;  %v754_v1 = vld [vmem:[%s2480_s7 + $0x8] sm:$0xff] }
 0x10c   : > { %v556_v22 = vpop.xlane.xlu0 %555  ;;  %v562_v23 = vpop.xlane.xlu1 %561 }
 0x10d   : > { %v565_v24 = vmul.f32 0.015625, %v556_v22  ;;  %v567_v25 = vmul.f32 0.015625, %v562_v23  ;;  %v572_v26 = vmul.f32 %v2217_v20, %v2217_v20  ;;  %v574_v27 = vmul.f32 %v2219_v21, %v2219_v21 }
 0x10f   : > { %v2225_v28 = vsub.f32 %v543_v2, %v565_v24  ;;  %v2227_v29 = vsub.f32 %v545_v5, %v567_v25  ;;  %v576_v30 = vsel %vm550_vm0, %v572_v26, 0.0  ;;  %v582_v33 = vsel %vm550_vm0, %v574_v27, 0.0  ;;  %v755_v2 = vld [vmem:[%s2480_s7 + $0x10] sm:$0xff] }
 0x110   : > { %577 = vadd.xlane.f32.xlu0 %v576_v30  ;;  %v695_v31 = vpop.xlane.xlu0 %694  ;;  %v698_v32 = vpop.xlane.xlu1 %697 }
 0x111   : > { %v705_v34 = vmul.f32 0.015625, %v695_v31  ;;  %v706_v35 = vmul.f32 0.015625, %v698_v32  ;;  %v573_v36 = vmul.f32 %v2225_v28, %v2225_v28  ;;  %v575_v37 = vmul.f32 %v2227_v29, %v2227_v29 }
 0x113   : > { %v2235_v38 = vsub.f32 %v546_v8, %v705_v34  ;;  %v2237_v39 = vsub.f32 %v547_v9, %v706_v35  ;;  %v579_v40 = vsel %vm550_vm0, %v573_v36, 0.0  ;;  %v585_v43 = vsel %vm550_vm0, %v575_v37, 0.0 }
 0x114   : > { %583 = vadd.xlane.f32.xlu0 %v582_v33  ;;  %580 = vadd.xlane.f32.xlu1 %v579_v40  ;;  %v701_v41 = vpop.xlane.xlu0 %700  ;;  %v704_v42 = vpop.xlane.xlu1 %703 }
 0x115   : > { %v707_v44 = vmul.f32 0.015625, %v701_v41  ;;  %v708_v45 = vmul.f32 0.015625, %v704_v42  ;;  %v713_v46 = vmul.f32 %v2235_v38, %v2235_v38  ;;  %v714_v47 = vmul.f32 %v2237_v39, %v2237_v39 }
 0x117   : > { %v2245_v48 = vsub.f32 %v548_v12, %v707_v44  ;;  %v2247_v49 = vsub.f32 %v549_v13, %v708_v45  ;;  %v717_v50 = vsel %vm550_vm0, %v713_v46, 0.0  ;;  %v720_v51 = vsel %vm550_vm0, %v714_v47, 0.0  ;;  %v607_v44 = vld [vmem:[#allocation2 + $0x10] sm:$0xff]  ;;  %v608_v45 = vld [vmem:[#allocation2 + $0x18] sm:$0xff]  ;;  %v745_v47 = vld [vmem:[#allocation4] sm:$0xff] }
 0x118   : > { %586 = vadd.xlane.f32.xlu1 %v585_v43  ;;  %718 = vadd.xlane.f32.xlu0 %v717_v50  ;;  %v746_v50 = vld [vmem:[#allocation4 + $0x8] sm:$0xff] }
 0x119   : > { %v715_v52 = vmul.f32 %v2245_v48, %v2245_v48  ;;  %v716_v53 = vmul.f32 %v2247_v49, %v2247_v49 }
 0x11b   : > { %v723_v54 = vsel %vm550_vm0, %v715_v52, 0.0  ;;  %v726_v55 = vsel %vm550_vm0, %v716_v53, 0.0 }
 0x11c   : > { %721 = vadd.xlane.f32.xlu1 %v720_v51  ;;  %724 = vadd.xlane.f32.xlu0 %v723_v54  ;;  %v749_v54 = vpack.c.bf16 %v746_v50, %v745_v47 }
 0x120   : > { %727 = vadd.xlane.f32.xlu1 %v726_v55 }
 0x131   : > { %624 = vperm.xlu1 %1769, %v614_v59   ;;  %v539_v59 = vld [vmem:[%s2297_s25 + $0x8] sm:$0xff] }
 0x132   : > { %619 = vperm.xlu0 %1768, %v613_v61   ;;  %v835_v60 = vsel %vm550_vm0, %v539_v59, 0.0  ;;  %v540_v61 = vld [vmem:[%s2297_s25 + $0x10] sm:$0xff] }
 0x135   : > { %629 = vperm.xlu1 %1769, %v615_v62   ;;  %v838_v62 = vsel %vm550_vm0, %v540_v61, 0.0 }
 0x139   : > { %634 = vperm.xlu1 %1769, %v616_v63  }
 0x13d   : > { %759 = vperm.xlu1 %1769, %v753_v0  }
 0x141   : > { %764 = vperm.xlu1 %1769, %v754_v1  }
 0x145   : > { %769 = vperm.xlu1 %1769, %v755_v2  }
 0x149   : > { %774 = vperm.xlu1 %1769, %v756_v3  }
 0x19d   : > { %v578_v4 = vpop.xlane.xlu0 %577 }
 0x19e   : > { %v589_v5 = vmul.f32 0.015873017, %v578_v4 }
 0x1a0   : > { %v593_v6 = vadd.f32 1e-05, %v589_v5 }
 0x1a1   : > { %v581_v7 = vpop.xlane.xlu1 %580  ;;  %v584_v8 = vpop.xlane.xlu0 %583 }
 0x1a2   : > { %v590_v9 = vmul.f32 0.015873017, %v581_v7  ;;  %v591_v10 = vmul.f32 0.015873017, %v584_v8  ;;  %1770 = vrsqrt.f32 %v593_v6 }
 0x1a4   : > { %v594_v11 = vadd.f32 1e-05, %v590_v9  ;;  %v595_v12 = vadd.f32 1e-05, %v591_v10 }
 0x1a5   : > { %v587_v13 = vpop.xlane.xlu1 %586  ;;  %v719_v14 = vpop.xlane.xlu0 %718 }
 0x1a6   : > { %1772 = vrsqrt.f32 %v594_v11  ;;  %v592_v15 = vmul.f32 0.015873017, %v587_v13  ;;  %v729_v16 = vmul.f32 0.015873017, %v719_v14 }
 0x1a7   : > { %1774 = vrsqrt.f32 %v595_v12 }
 0x1a8   : > { %v596_v17 = vadd.f32 1e-05, %v592_v15  ;;  %v733_v18 = vadd.f32 1e-05, %v729_v16 }
 0x1a9   : > { %v722_v19 = vpop.xlane.xlu1 %721  ;;  %v725_v22 = vpop.xlane.xlu0 %724 }
 0x1aa   : > { %1776 = vrsqrt.f32 %v596_v17  ;;  %v730_v23 = vmul.f32 0.015873017, %v722_v19  ;;  %v731_v24 = vmul.f32 0.015873017, %v725_v22 }
 0x1ab   : > { %1778 = vrsqrt.f32 %v733_v18 }
 0x1ac   : > { %v734_v25 = vadd.f32 1e-05, %v730_v23  ;;  %v735_v26 = vadd.f32 1e-05, %v731_v24  ;;  %v1771_v30 = vpop.eup %1770 }
 0x1ad   : > { %v728_v27 = vpop.xlane.xlu1 %727  ;;  %v601_v34 = vmul.f32 %v1771_v30, %v2217_v20  ;;  %v610_v20 = vpack.c.bf16 %v608_v45, %v607_v44 }
 0x1ae   : > { %1780 = vrsqrt.f32 %v734_v25  ;;  %v732_v31 = vmul.f32 0.015873017, %v728_v27 }
 0x1af   : > { %1782 = vrsqrt.f32 %v735_v26 }
 0x1b0   : > { %v1773_v32 = vpop.eup %1772  ;;  %v736_v33 = vadd.f32 1e-05, %v732_v31  ;;  %v541_v31 = vld [vmem:[%s2297_s25 + $0x18] sm:$0xff] }
 0x1b1   : > { %v602_v35 = vmul.f32 %v1773_v32, %v2225_v28  ;;  %v1775_v36 = vpop.eup %1774  ;;  %v625_v63 = vpop.permute.xlu1 %624  ;;  %v841_v32 = vsel %vm550_vm0, %v541_v31, 0.0 }
 0x1b2   : > { %1784 = vrsqrt.f32 %v736_v33  ;;  %v603_v41 = vmul.f32 %v1775_v36, %v2219_v21  ;;  %v620_v6 = vpop.permute.xlu0 %619 }
 0x1b3   : > { %v611_v37 = vpack.c.bf16 %v602_v35, %v601_v34 }
 0x1b4   : > { %v1777_v40 = vpop.eup %1776 }
 0x1b5   : > { %1656 = vmatprep.subr.bf16.mxu1 %v611_v37  ;;  %v604_v42 = vmul.f32 %v1777_v40, %v2227_v29  ;;  %v1779_v43 = vpop.eup %1778  ;;  %v630_v0 = vpop.permute.xlu1 %629 }
 0x1b6   : > { %1657 = vmatpush3.bf16.msra.mxu1 %v611_v37  ;;  %v741_v28 = vmul.f32 %v1779_v43, %v2235_v38  ;;  %v748_v38 = vld [vmem:[#allocation4 + $0x18] sm:$0xff] }
 0x1b7   : > { %v612_v46 = vpack.c.bf16 %v604_v42, %v603_v41 }
 0x1b8   : > { %v1781_v51 = vpop.eup %1780 }
 0x1b9   : > { %1658 = vmatprep.subr.bf16.mxu1 %v612_v46  ;;  %v742_v52 = vmul.f32 %v1781_v51, %v2237_v39  ;;  %v1783_v53 = vpop.eup %1782  ;;  %v750_v39 = vpack.c.bf16 %v748_v38, %v747_v57  ;;  %v635_v1 = vpop.permute.xlu1 %634 }
 0x1ba   : > { %1659 = vmatpush3.bf16.msra.mxu1 %v612_v46  ;;  %v743_v55 = vmul.f32 %v1783_v53, %v2245_v48  ;;  %v538_v48 = vld [vmem:[%s2297_s25] sm:$0xff] }
 0x1bb   : > { %v751_v21 = vpack.c.bf16 %v742_v52, %v741_v28 }
 0x1bc   : > { %v1785_v29 = vpop.eup %1784 }
 0x1bd   : > { %1661 = vmatmul.mubr.msk.bf16.vlgmr.msra.gmra.mrb[0].mxu1 %vm637_vm1, %v610_v20  ;;  %1664 = vmatprep.subr.bf16.mxu1 %v751_v21  ;;  %v744_v56 = vmul.f32 %v1785_v29, %v2247_v49  ;;  %v832_v49 = vsel %vm550_vm0, %v538_v48, 0.0  ;;  %v760_v2 = vpop.permute.xlu1 %759 }
 0x1be   : > { %1665 = vmatpush3.bf16.msra.mxu1 %v751_v21  ;;  %1668 = vmatprep.mubr.msk.bf16.mxu1 %vm637_vm1, %v749_v54 }
 0x1bf   : > { %v752_v58 = vpack.c.bf16 %v744_v56, %v743_v55  ;;  %833 = vadd.xlane.f32.xlu0 %v832_v49 }
 0x1c1   : > { %1666 = vmatprep.subr.bf16.mxu1 %v752_v58  ;;  %v765_v3 = vpop.permute.xlu1 %764 }
 0x1c2   : > { %1667 = vmatpush3.bf16.msra.mxu1 %v752_v58 }
 0x1c3   : > { %836 = vadd.xlane.f32.xlu0 %v835_v60 }
 0x1c5   : > { %1669 = vmatmul.mubr.msk.bf16.vlgmr.msra.gmra.mrb[4].mxu1 %vm637_vm1, %v750_v39  ;;  %v770_v11 = vpop.permute.xlu1 %769 }
 0x1c7   : > { %839 = vadd.xlane.f32.xlu0 %v838_v62 }
 0x1c9   : > { %v775_v18 = vpop.permute.xlu1 %774 }
 0x24c   : > { %v834_v33 = vpop.xlane.xlu0 %833 }
 0x24d   : > { %v844_v34 = vmul.f32 0.015625, %v834_v33  ;;  %v886_v33 = vld [vmem:[#allocation6 + $0x10] sm:$0xff] }
 0x24f   : > { %v848_v35 = vsub.f32 %v538_v48, %v844_v34  ;;  %v887_v34 = vld [vmem:[#allocation6 + $0x18] sm:$0xff] }
 0x250   : > { %v837_v36 = vpop.xlane.xlu0 %836 }
 0x251   : > { %v845_v37 = vmul.f32 0.015625, %v837_v36  ;;  %v852_v40 = vmul.f32 %v848_v35, %v848_v35  ;;  %v889_v36 = vpack.c.bf16 %v887_v34, %v886_v33 }
 0x253   : > { %v849_v41 = vsub.f32 %v539_v59, %v845_v37  ;;  %v856_v42 = vsel %vm550_vm0, %v852_v40, 0.0 }
 0x254   : > { %857 = vadd.xlane.f32.xlu0 %v856_v42  ;;  %v840_v43 = vpop.xlane.xlu0 %839 }
 0x255   : > { %v853_v44 = vmul.f32 %v849_v41, %v849_v41  ;;  %v846_v45 = vmul.f32 0.015625, %v840_v43 }
 0x257   : > { %v859_v46 = vsel %vm550_vm0, %v853_v44, 0.0  ;;  %v2309_v47 = vsub.f32 %v540_v61, %v846_v45 }
 0x258   : > { %860 = vadd.xlane.f32.xlu0 %v859_v46 }
 0x259   : > { %v854_v50 = vmul.f32 %v2309_v47, %v2309_v47 }
 0x25b   : > { %v862_v51 = vsel %vm550_vm0, %v854_v50, 0.0 }
 0x25c   : > { %863 = vadd.xlane.f32.xlu0 %v862_v51 }
 0x290   : > { %v1662_v4 = vpop.f32.mrb[0].mxu1 }
 0x291   : > { %v678_v5 = vpop.f32.mrb[1].mxu1  ;;  %v687_v8 = vadd.f32 %v1662_v4, %v630_v0  ;;  %v884_v0 = vld [vmem:[#allocation6] sm:$0xff] }
 0x292   : > { %v1663_v7 = vpop.f32.mrb[2].mxu1  ;;  %v679_v12 = vadd.f32 %v678_v5, %v620_v6 }
 0x293   : > { %v690_v9 = vadd.f32 %v1663_v7, %v635_v1  ;;  %v681_v10 = vpop.f32.mrb[3].mxu1  ;;  %v885_v1 = vld [vmem:[#allocation6 + $0x8] sm:$0xff] }
 0x294   : > { %v682_v13 = vadd.f32 %v681_v10, %v625_v63 }
 0x295   : > { %v972_v14 = vpack.c.bf16 %v690_v9, %v687_v8 }
 0x296   : > { %v971_v15 = vpack.c.bf16 %v682_v13, %v679_v12 }
 0x298   : > { %v1670_v16 = vpop.f32.mrb[4].mxu1  ;;  %975 = vxpose.xlu1.c.b16.start [1/2] (short) (narrow) %v971_v15, 64 }
 0x299   : > { %v817_v17 = vpop.f32.mrb[5].mxu1  ;;  %v826_v22 = vadd.f32 %v1670_v16, %v770_v11 }
 0x29a   : > { %v1671_v19 = vpop.f32.mrb[6].mxu1  ;;  %v818_v25 = vadd.f32 %v817_v17, %v760_v2  ;;  %v888_v2 = vpack.c.bf16 %v885_v1, %v884_v0  ;;  %v892_v1 = vld [vmem:[%s2482_s9] sm:$0xff] }
 0x29b   : > { %v829_v23 = vadd.f32 %v1671_v19, %v775_v18  ;;  %v820_v24 = vpop.f32.mrb[7].mxu1 }
 0x29c   : > { %v821_v26 = vadd.f32 %v820_v24, %v765_v3  ;;  %976 = vxpose.xlu1.c.b16.end [2/2] (short) (narrow) %v972_v14, 64  ;;  %1676 = vmatprep.mubr.msk.bf16.mxu0 %vm637_vm1, %v888_v2 }
 0x29d   : > { %v974_v27 = vpack.c.bf16 %v829_v23, %v826_v22 }
 0x29e   : > { %v973_v30 = vpack.c.bf16 %v821_v26, %v818_v25 }
 0x2a0   : > { %1680 = vmatprep.subr.bf16.mxu1 %v973_v30 }
 0x2a1   : > { %1681 = vmatpush3.bf16.msra.mxu1 %v973_v30 }
 0x2a2   : > { %1682 = vmatprep.subr.bf16.mxu1 %v974_v27 }
 0x2a5   : > { %1683 = vmatpush3.bf16.msra.mxu1 %v974_v27 }
 0x2b1   : > { %842 = vadd.xlane.f32.xlu1 %v841_v32 }
 0x2e1   : > { %v858_v56 = vpop.xlane.xlu0 %857 }
 0x2e2   : > { %v868_v57 = vmul.f32 0.015873017, %v858_v56 }
 0x2e4   : > { %v872_v58 = vadd.f32 1e-05, %v868_v57 }
 0x2e5   : > { %v861_v39 = vpop.xlane.xlu0 %860 }
 0x2e6   : > { %v869_v48 = vmul.f32 0.015873017, %v861_v39  ;;  %1786 = vrsqrt.f32 %v872_v58 }
 0x2e8   : > { %v873_v49 = vadd.f32 1e-05, %v869_v48 }
 0x2e9   : > { %v864_v3 = vpop.xlane.xlu0 %863 }
 0x2ea   : > { %1788 = vrsqrt.f32 %v873_v49  ;;  %v870_v4 = vmul.f32 0.015873017, %v864_v3  ;;  %v895_v3 = vld [vmem:[%s2482_s9 + $0x18] sm:$0xff] }
 0x2ec   : > { %v874_v5 = vadd.f32 1e-05, %v870_v4 }
 0x2ee   : > { %1790 = vrsqrt.f32 %v874_v5  ;;  %v1238_v5 = vld [vmem:[%s2484_s11 + $0x8] sm:$0xff] }
 0x2f0   : > { %v1787_v59 = vpop.eup %1786 }
 0x2f1   : > { %v880_v61 = vmul.f32 %v1787_v59, %v848_v35 }
 0x2f4   : > { %v1789_v60 = vpop.eup %1788 }
 0x2f5   : > { %v881_v62 = vmul.f32 %v1789_v60, %v849_v41 }
 0x2f7   : > { %v890_v63 = vpack.c.bf16 %v881_v62, %v880_v61 }
 0x2f8   : > { %v1791_v19 = vpop.eup %1790 }
 0x2f9   : > { %1672 = vmatprep.subr.bf16.mxu0 %v890_v63  ;;  %v882_v30 = vmul.f32 %v1791_v19, %v2309_v47  ;;  %v1237_v19 = vld [vmem:[%s2484_s11] sm:$0xff] }
 0x2fa   : > { %1673 = vmatpush3.bf16.msra.mxu0 %v890_v63  ;;  %v893_v63 = vld [vmem:[%s2482_s9 + $0x8] sm:$0xff] }
 0x2fe   : > { %v983_v20 = vpop.trf.xlu1 }
 0x2ff   : > { %1684 = vmatprep.mubr.msk.bf16.mxu1 %vm637_vm1, %v983_v20 }
 0x302   : > { %v984_v28 = vpop.trf.xlu1 }
 0x303   : > { %1685 = vmatmul.mubr.msk.bf16.vlgmr.msra.gmra.mrb[8].mxu1 %vm637_vm1, %v984_v28 }
 0x306   : > { %v985_v52 = vpop.trf.xlu1 }
 0x307   : > { %1688 = vmatprep.mubr.msk.bf16.mxu1 %vm637_vm1, %v985_v52 }
 0x30a   : > { %v986_v53 = vpop.trf.xlu1 }
 0x30b   : > { %1689 = vmatmul.mubr.msk.bf16.gmra.mrb[12].mxu1 %vm637_vm1, %v986_v53 }
 0x33e   : > { %v843_v54 = vpop.xlane.xlu1 %842 }
 0x33f   : > { %v847_v21 = vmul.f32 0.015625, %v843_v54 }
 0x341   : > { %v851_v29 = vsub.f32 %v541_v31, %v847_v21 }
 0x343   : > { %v855_v55 = vmul.f32 %v851_v29, %v851_v29 }
 0x345   : > { %v865_v38 = vsel %vm550_vm0, %v855_v55, 0.0 }
 0x346   : > { %866 = vadd.xlane.f32.xlu0 %v865_v38 }
 0x3d3   : > { %v867_v6 = vpop.xlane.xlu0 %866 }
 0x3d4   : > { %v871_v7 = vmul.f32 0.015873017, %v867_v6 }
 0x3d6   : > { %v875_v8 = vadd.f32 1e-05, %v871_v7  ;;  %v1686_v9 = vpop.f32.mrb[8].mxu1 }
 0x3d7   : > { %v1037_v10 = vpop.f32.mrb[9].mxu1  ;;  %v1074_v15 = vsel %vm550_vm0, %v1686_v9, -inf }
 0x3d8   : > { %1792 = vrsqrt.f32 %v875_v8  ;;  %v1687_v11 = vpop.f32.mrb[10].mxu1  ;;  %v1068_v12 = vsel %vm550_vm0, %v1037_v10, -inf  ;;  %v1240_v8 = vld [vmem:[%s2484_s11 + $0x18] sm:$0xff] }
 0x3d9   : > { %v1040_v13 = vpop.f32.mrb[11].mxu1  ;;  %1069 = vmax.xlane.f32.xlu0 %v1068_v12  ;;  %v1077_v17 = vsel %vm550_vm0, %v1687_v11, -inf }
 0x3da   : > { %v1071_v14 = vsel %vm550_vm0, %v1040_v13, -inf }
 0x3db   : > { %1072 = vmax.xlane.f32.xlu1 %v1071_v14 }
 0x3dd   : > { %1075 = vmax.xlane.f32.xlu0 %v1074_v15 }
 0x3de   : > { %v1690_v16 = vpop.f32.mrb[12].mxu1 }
 0x3df   : > { %v1053_v18 = vpop.f32.mrb[13].mxu1  ;;  %1078 = vmax.xlane.f32.xlu1 %v1077_v17  ;;  %v1086_v27 = vsel %vm550_vm0, %v1690_v16, -inf }
 0x3e0   : > { %v2324_v22 = vpop.f32.mrb[14].mxu1  ;;  %v1080_v23 = vsel %vm550_vm0, %v1053_v18, -inf }
 0x3e1   : > { %v2327_v24 = vpop.f32.mrb[15].mxu1  ;;  %1081 = vmax.xlane.f32.xlu0 %v1080_v23  ;;  %v1089_v32 = vsel %vm550_vm0, %v2324_v22, -inf }
 0x3e2   : > { %v1793_v25 = vpop.eup %1792  ;;  %v1083_v26 = vsel %vm550_vm0, %v2327_v24, -inf }
 0x3e3   : > { %1084 = vmax.xlane.f32.xlu1 %v1083_v26  ;;  %v883_v31 = vmul.f32 %v1793_v25, %v851_v29 }
 0x3e5   : > { %1087 = vmax.xlane.f32.xlu0 %v1086_v27  ;;  %v891_v35 = vpack.c.bf16 %v883_v31, %v882_v30 }
 0x3e7   : > { %1090 = vmax.xlane.f32.xlu1 %v1089_v32  ;;  %1674 = vmatprep.subr.bf16.mxu0 %v891_v35 }
 0x3e8   : > { %1675 = vmatpush3.bf16.msra.mxu0 %v891_v35 }
 0x3eb   : > { %1677 = vmatmul.mubr.msk.bf16.vlgmr.msra.gmra.mrb[0].mxu0 %vm637_vm1, %v889_v36 }
 0x466   : > { %v1070_v37 = vpop.xlane.xlu0 %1069 }
 0x467   : > { %v1092_v40 = vsub.f32 %v1037_v10, %v1070_v37 }
 0x468   : > { %v1073_v41 = vpop.xlane.xlu1 %1072 }
 0x469   : > { %v1100_v42 = vmul.f32 1.442695, %v1092_v40  ;;  %v1093_v44 = vsub.f32 %v1040_v13, %v1073_v41 }
 0x46a   : > { %v1076_v43 = vpop.xlane.xlu0 %1075 }
 0x46b   : > { %1794 = vpow2.f32 %v1100_v42  ;;  %v1094_v45 = vsub.f32 %v1686_v9, %v1076_v43  ;;  %v1102_v20 = vmul.f32 1.442695, %v1093_v44 }
 0x46c   : > { %v1079_v46 = vpop.xlane.xlu1 %1078 }
 0x46d   : > { %v1104_v47 = vmul.f32 1.442695, %v1094_v45  ;;  %v1095_v50 = vsub.f32 %v1687_v11, %v1079_v46 }
 0x46e   : > { %v1082_v51 = vpop.xlane.xlu0 %1081 }
 0x46f   : > { %1796 = vpow2.f32 %v1104_v47  ;;  %v1106_v28 = vmul.f32 1.442695, %v1095_v50  ;;  %v1096_v52 = vsub.f32 %v1053_v18, %v1082_v51  ;;  %v894_v18 = vld [vmem:[%s2482_s9 + $0x10] sm:$0xff] }
 0x470   : > { %v1085_v0 = vpop.xlane.xlu1 %1084 }
 0x471   : > { %1798 = vpow2.f32 %v1106_v28  ;;  %v1108_v29 = vmul.f32 1.442695, %v1096_v52  ;;  %v1097_v6 = vsub.f32 %v2327_v24, %v1085_v0 }
 0x472   : > { %v1088_v53 = vpop.xlane.xlu0 %1087  ;;  %1800 = vpow2.f32 %v1102_v20 }
 0x473   : > { %v1098_v54 = vsub.f32 %v1690_v16, %v1088_v53  ;;  %v1110_v9 = vmul.f32 1.442695, %v1097_v6 }
 0x474   : > { %v1091_v2 = vpop.xlane.xlu1 %1090 }
 0x475   : > { %v2336_v21 = vpop.eup %1794  ;;  %v1112_v55 = vmul.f32 1.442695, %v1098_v54  ;;  %v1099_v4 = vsub.f32 %v2324_v22, %v1091_v2  ;;  %v1239_v22 = vld [vmem:[%s2484_s11 + $0x10] sm:$0xff] }
 0x476   : > { %v1116_v56 = vsel %vm550_vm0, %v2336_v21, 0.0 }
 0x477   : > { %1802 = vpow2.f32 %v1112_v55  ;;  %1117 = vadd.xlane.f32.xlu0 %v1116_v56  ;;  %v1114_v7 = vmul.f32 1.442695, %v1099_v4 }
 0x478   : > { %1804 = vpow2.f32 %v1108_v29 }
 0x479   : > { %v2340_v57 = vpop.eup %1796  ;;  %1806 = vpow2.f32 %v1114_v7 }
 0x47a   : > { %v1122_v38 = vsel %vm550_vm0, %v2340_v57, 0.0  ;;  %1808 = vpow2.f32 %v1110_v9  ;;  %v1232_v9 = vld [vmem:[#allocation7 + $0x18] sm:$0xff] }
 0x47b   : > { %v2344_v58 = vpop.eup %1798  ;;  %1123 = vadd.xlane.f32.xlu0 %v1122_v38 }
 0x47c   : > { %v1125_v39 = vsel %vm550_vm0, %v2344_v58, 0.0  ;;  %v1801_v48 = vpop.eup %1800 }
 0x47d   : > { %1126 = vadd.xlane.f32.xlu1 %v1125_v39  ;;  %v1119_v49 = vsel %vm550_vm0, %v1801_v48, 0.0 }
 0x481   : > { %v2349_v59 = vpop.eup %1802  ;;  %1120 = vadd.xlane.f32.xlu1 %v1119_v49 }
 0x482   : > { %v1134_v60 = vsel %vm550_vm0, %v2349_v59, 0.0  ;;  %v2353_v61 = vpop.eup %1804 }
 0x483   : > { %1135 = vadd.xlane.f32.xlu0 %v1134_v60  ;;  %v1128_v62 = vsel %vm550_vm0, %v2353_v61, 0.0  ;;  %v2374_v10 = vpop.eup %1806 }
 0x484   : > { %v1137_v11 = vsel %vm550_vm0, %v2374_v10, 0.0  ;;  %v1809_v12 = vpop.eup %1808 }
 0x485   : > { %v1131_v13 = vsel %vm550_vm0, %v1809_v12, 0.0 }
 0x487   : > { %1129 = vadd.xlane.f32.xlu0 %v1128_v62 }
 0x492   : > { %903 = vperm.xlu1 %1769, %v893_v63  }
 0x49d   : > { %898 = vperm.xlu0 %1768, %v892_v1   ;;  %v1230_v1 = vld [vmem:[#allocation7 + $0x8] sm:$0xff] }
 0x4a1   : > { %913 = vperm.xlu0 %1768, %v895_v3  }
 0x4a5   : > { %1248 = vperm.xlu0 %1768, %v1238_v5  }
 0x4a9   : > { %1258 = vperm.xlu0 %1768, %v1240_v8   ;;  %v1231_v8 = vld [vmem:[#allocation7 + $0x10] sm:$0xff] }
 0x4b6   : > { %1138 = vadd.xlane.f32.xlu1 %v1137_v11 }
 0x4ba   : > { %1132 = vadd.xlane.f32.xlu1 %v1131_v13 }
 0x4be   : > { %v1678_v14 = vpop.f32.mrb[0].mxu0 }
 0x4bf   : > { %v956_v15 = vpop.f32.mrb[1].mxu0 }
 0x4c0   : > { %v1679_v16 = vpop.f32.mrb[2].mxu0 }
 0x4c1   : > { %v959_v17 = vpop.f32.mrb[3].mxu0 }
 0x4cb   : > { %908 = vperm.xlu1 %1769, %v894_v18  }
 0x4cf   : > { %1243 = vperm.xlu1 %1769, %v1237_v19  }
 0x4d3   : > { %1253 = vperm.xlu1 %1769, %v1239_v22  }
 0x504   : > { %v1118_v23 = vpop.xlane.xlu0 %1117 }
 0x505   : > { %1810 = vrcp.f32 %v1118_v23 }
 0x508   : > { %v1124_v25 = vpop.xlane.xlu0 %1123 }
 0x50a   : > { %v1127_v24 = vpop.xlane.xlu1 %1126 }
 0x50b   : > { %1812 = vrcp.f32 %v1127_v24 }
 0x50c   : > { %1814 = vrcp.f32 %v1124_v25 }
 0x50e   : > { %v1121_v26 = vpop.xlane.xlu1 %1120 }
 0x50f   : > { %1816 = vrcp.f32 %v1121_v26  ;;  %v1811_v30 = vpop.eup %1810 }
 0x510   : > { %v1136_v27 = vpop.xlane.xlu0 %1135  ;;  %v1148_v36 = vmul.f32 %v1811_v30, %v2336_v21  ;;  %v534_v30 = vld [vmem:[%s512_s12] sm:$0xff] }
 0x512   : > { %v904_v35 = vpop.permute.xlu1 %903 }
 0x513   : > { %v960_v44 = vadd.f32 %v959_v17, %v904_v35 }
 0x514   : > { %v1130_v33 = vpop.xlane.xlu0 %1129 }
 0x515   : > { %v1813_v31 = vpop.eup %1812  ;;  %1818 = vrcp.f32 %v1130_v33  ;;  %v1316_v33 = vsel %vm550_vm0, %v534_v30, 0.0 }
 0x516   : > { %v1815_v32 = vpop.eup %1814  ;;  %v1151_v40 = vmul.f32 %v1813_v31, %v2344_v58  ;;  %v535_v31 = vld [vmem:[%s512_s12 + $0x8] sm:$0xff] }
 0x517   : > { %v1150_v43 = vmul.f32 %v1815_v32, %v2340_v57  ;;  %v1319_v35 = vsel %vm550_vm0, %v535_v31, 0.0 }
 0x519   : > { %v1817_v34 = vpop.eup %1816  ;;  %v1159_v47 = vpack.c.bf16 %v1151_v40, %v1150_v43 }
 0x51a   : > { %v1149_v37 = vmul.f32 %v1817_v34, %v1801_v48  ;;  %v536_v34 = vld [vmem:[%s512_s12 + $0x10] sm:$0xff] }
 0x51b   : > { %v1172_v51 = vsel %vm550_vm0, %v1159_v47, 0 }
 0x51c   : > { %v899_v41 = vpop.permute.xlu0 %898  ;;  %v1158_v42 = vpack.c.bf16 %v1149_v37, %v1148_v36  ;;  %v537_v36 = vld [vmem:[%s512_s12 + $0x18] sm:$0xff]  ;;  %v1322_v37 = vsel %vm550_vm0, %v536_v34, 0.0 }
 0x51d   : > { %v957_v45 = vadd.f32 %v956_v15, %v899_v41  ;;  %v1325_v40 = vsel %vm550_vm0, %v537_v36, 0.0 }
 0x51e   : > { %1712 = vmatprep.subr.msk.bf16.mxu0 %vm550_vm0, %v1158_v42  ;;  %v1169_v46 = vsel %vm550_vm0, %v1158_v42, 0 }
 0x51f   : > { %v1156_v50 = vpack.c.bf16 %v960_v44, %v957_v45  ;;  %1693 = vmatpush3.bf16.xpose.msra.mxu0 %v1169_v46  ;;  %v1819_v55 = vpop.eup %1818 }
 0x520   : > { %1713 = vmatprep.subr.msk.bf16.mxu0 %vm550_vm0, %v1159_v47  ;;  %v914_v52 = vpop.permute.xlu0 %913  ;;  %v1152_v58 = vmul.f32 %v1819_v55, %v2353_v61  ;;  %v1229_v61 = vld [vmem:[#allocation7] sm:$0xff] }
 0x521   : > { %1700 = vmatprep.mubr.msk.bf16.mxu0 %vm550_vm0, %v1156_v50  ;;  %v968_v54 = vadd.f32 %v1679_v16, %v914_v52  ;;  %v1233_v2 = vpack.c.bf16 %v1230_v1, %v1229_v61 }
 0x523   : > { %1708 = vmatprep.mubr.msk.bf16.mxu1 %vm637_vm1, %v1233_v2 }
 0x527   : > { %1695 = vmatpush3.bf16.xpose.msra.mxu0 %v1172_v51 }
 0x543   : > { %v1139_v20 = vpop.xlane.xlu1 %1138 }
 0x544   : > { %1820 = vrcp.f32 %v1139_v20 }
 0x545   : > { %1822 = vrcp.f32 %v1136_v27 }
 0x547   : > { %v1133_v28 = vpop.xlane.xlu1 %1132 }
 0x548   : > { %1824 = vrcp.f32 %v1133_v28 }
 0x54b   : > { %v909_v53 = vpop.permute.xlu1 %908 }
 0x54c   : > { %v965_v21 = vadd.f32 %v1678_v14, %v909_v53 }
 0x54e   : > { %v1157_v29 = vpack.c.bf16 %v968_v54, %v965_v21  ;;  %v1821_v56 = vpop.eup %1820 }
 0x54f   : > { %v1823_v57 = vpop.eup %1822  ;;  %v1155_v48 = vmul.f32 %v1821_v56, %v2374_v10  ;;  %v1234_v10 = vpack.c.bf16 %v1232_v9, %v1231_v8  ;;  %v1244_v11 = vpop.permute.xlu1 %1243 }
 0x550   : > { %v1154_v60 = vmul.f32 %v1823_v57, %v2349_v59 }
 0x552   : > { %v1825_v38 = vpop.eup %1824  ;;  %v1161_v63 = vpack.c.bf16 %v1155_v48, %v1154_v60 }
 0x553   : > { %v1153_v39 = vmul.f32 %v1825_v38, %v1809_v12  ;;  %v1249_v12 = vpop.permute.xlu0 %1248  ;;  %v1254_v13 = vpop.permute.xlu1 %1253 }
 0x554   : > { %v1178_v0 = vsel %vm550_vm0, %v1161_v63, 0 }
 0x555   : > { %v1160_v49 = vpack.c.bf16 %v1153_v39, %v1152_v58 }
 0x557   : > { %1714 = vmatprep.subr.msk.bf16.mxu0 %vm550_vm0, %v1160_v49  ;;  %v1175_v62 = vsel %vm550_vm0, %v1160_v49, 0  ;;  %v1259_v19 = vpop.permute.xlu0 %1258 }
 0x558   : > { %1697 = vmatpush3.bf16.xpose.msra.mxu0 %v1175_v62 }
 0x559   : > { %1715 = vmatprep.subr.msk.bf16.mxu0 %vm550_vm0, %v1161_v63 }
 0x560   : > { %1699 = vmatpush3.bf16.xpose.msra.mxu0 %v1178_v0 }
 0x567   : > { %1701 = vmatmul.mubr.msk.bf16.vlgmr.msra.gmra.mrb[4].mxu0 %vm550_vm0, %v1157_v29 }
 0x63a   : > { %v1702_v3 = vpop.f32.mrb[4].mxu0 }
 0x63b   : > { %v1214_v59 = vpop.f32.mrb[5].mxu0 }
 0x63c   : > { %v1703_v4 = vpop.f32.mrb[6].mxu0 }
 0x63d   : > { %v1236_v5 = vpack.c.bf16 %v1703_v4, %v1702_v3  ;;  %v1217_v6 = vpop.f32.mrb[7].mxu0 }
 0x63e   : > { %v1235_v7 = vpack.c.bf16 %v1217_v6, %v1214_v59 }
 0x640   : > { %1704 = vmatprep.subr.bf16.mxu1 %v1235_v7 }
 0x641   : > { %1705 = vmatpush3.bf16.msra.mxu1 %v1235_v7 }
 0x642   : > { %1706 = vmatprep.subr.bf16.mxu1 %v1236_v5 }
 0x645   : > { %1707 = vmatpush3.bf16.msra.mxu1 %v1236_v5 }
 0x648   : > { %1709 = vmatmul.mubr.msk.bf16.vlgmr.msra.gmra.mrb[16].mxu1 %vm637_vm1, %v1234_v10 }
 0x71b   : > { %v1710_v14 = vpop.f32.mrb[16].mxu1 }
 0x71c   : > { %v1310_v15 = vadd.f32 %v1710_v14, %v1254_v13  ;;  %v1301_v16 = vpop.f32.mrb[17].mxu1 }
 0x71d   : > { %v1302_v17 = vadd.f32 %v1301_v16, %v1244_v11  ;;  %v1711_v18 = vpop.f32.mrb[18].mxu1 }
 0x71e   : > { %v1304_v22 = vpop.f32.mrb[19].mxu1  ;;  %v1366_v23 = vsel %vm550_vm0, %v1310_v15, 0.0  ;;  %v1313_v24 = vadd.f32 %v1711_v18, %v1259_v19 }
 0x71f   : > { %v1305_v25 = vadd.f32 %v1304_v22, %v1249_v12  ;;  %1367 = vadd.xlane.f32.xlu0 %v1366_v23  ;;  %v1360_v26 = vsel %vm550_vm0, %v1302_v17, 0.0 }
 0x720   : > { %1361 = vadd.xlane.f32.xlu1 %v1360_v26  ;;  %v1369_v32 = vsel %vm550_vm0, %v1313_v24, 0.0 }
 0x721   : > { %v1363_v27 = vsel %vm550_vm0, %v1305_v25, 0.0 }
 0x723   : > { %1364 = vadd.xlane.f32.xlu0 %v1363_v27 }
 0x724   : > { %1370 = vadd.xlane.f32.xlu1 %v1369_v32 }
 0x727   : > { %1317 = vadd.xlane.f32.xlu0 %v1316_v33 }
 0x728   : > { %1320 = vadd.xlane.f32.xlu1 %v1319_v35 }
 0x72b   : > { %1323 = vadd.xlane.f32.xlu0 %v1322_v37 }
 0x72c   : > { %1326 = vadd.xlane.f32.xlu1 %v1325_v40 }
 0x7ac   : > { %v1368_v41 = vpop.xlane.xlu0 %1367 }
 0x7ad   : > { %v2418_v42 = vmul.f32 0.015625, %v1368_v41  ;;  %v1362_v43 = vpop.xlane.xlu1 %1361 }
 0x7ae   : > { %v2420_v44 = vmul.f32 0.015625, %v1362_v43 }
 0x7af   : > { %v1378_v45 = vsub.f32 %v1310_v15, %v2418_v42 }
 0x7b0   : > { %v1376_v46 = vsub.f32 %v1302_v17, %v2420_v44  ;;  %v1365_v47 = vpop.xlane.xlu0 %1364 }
 0x7b1   : > { %v2424_v50 = vmul.f32 0.015625, %v1365_v47  ;;  %v1371_v51 = vpop.xlane.xlu1 %1370  ;;  %v1382_v20 = vmul.f32 %v1378_v45, %v1378_v45 }
 0x7b2   : > { %v2426_v28 = vmul.f32 0.015625, %v1371_v51  ;;  %v1380_v53 = vmul.f32 %v1376_v46, %v1376_v46 }
 0x7b3   : > { %v1390_v52 = vsel %vm550_vm0, %v1382_v20, 0.0  ;;  %v1377_v54 = vsub.f32 %v1305_v25, %v2424_v50 }
 0x7b4   : > { %v1379_v21 = vsub.f32 %v1313_v24, %v2426_v28  ;;  %1391 = vadd.xlane.f32.xlu0 %v1390_v52  ;;  %v1318_v29 = vpop.xlane.xlu0 %1317  ;;  %v1384_v39 = vsel %vm550_vm0, %v1380_v53, 0.0 }
 0x7b5   : > { %v1328_v55 = vmul.f32 0.015625, %v1318_v29  ;;  %v1321_v56 = vpop.xlane.xlu1 %1320  ;;  %v1381_v62 = vmul.f32 %v1377_v54, %v1377_v54 }
 0x7b6   : > { %v1383_v57 = vmul.f32 %v1379_v21, %v1379_v21  ;;  %v1329_v38 = vmul.f32 0.015625, %v1321_v56 }
 0x7b7   : > { %v2431_v58 = vsub.f32 %v534_v30, %v1328_v55  ;;  %v1387_v4 = vsel %vm550_vm0, %v1381_v62, 0.0 }
 0x7b8   : > { %1385 = vadd.xlane.f32.xlu0 %v1384_v39  ;;  %v1324_v48 = vpop.xlane.xlu0 %1323  ;;  %v1393_v49 = vsel %vm550_vm0, %v1383_v57, 0.0  ;;  %v2435_v60 = vsub.f32 %v535_v31, %v1329_v38 }
 0x7b9   : > { %v1330_v63 = vmul.f32 0.015625, %v1324_v48  ;;  %1394 = vadd.xlane.f32.xlu1 %v1393_v49  ;;  %v1336_v0 = vmul.f32 %v2431_v58, %v2431_v58  ;;  %v1327_v61 = vpop.xlane.xlu1 %1326 }
 0x7ba   : > { %v1331_v1 = vmul.f32 0.015625, %v1327_v61  ;;  %v1337_v2 = vmul.f32 %v2435_v60, %v2435_v60 }
 0x7bb   : > { %v2441_v3 = vsub.f32 %v536_v34, %v1330_v63  ;;  %v1340_v59 = vsel %vm550_vm0, %v1336_v0, 0.0 }
 0x7bc   : > { %1341 = vadd.xlane.f32.xlu0 %v1340_v59  ;;  %v2445_v5 = vsub.f32 %v537_v36, %v1331_v1  ;;  %v1343_v7 = vsel %vm550_vm0, %v1337_v2, 0.0 }
 0x7bd   : > { %1388 = vadd.xlane.f32.xlu1 %v1387_v4  ;;  %v1338_v6 = vmul.f32 %v2441_v3, %v2441_v3 }
 0x7be   : > { %v1339_v8 = vmul.f32 %v2445_v5, %v2445_v5 }
 0x7bf   : > { %v1346_v9 = vsel %vm550_vm0, %v1338_v6, 0.0 }
 0x7c0   : > { %1347 = vadd.xlane.f32.xlu0 %v1346_v9  ;;  %v1349_v10 = vsel %vm550_vm0, %v1339_v8, 0.0 }
 0x7c1   : > { %1344 = vadd.xlane.f32.xlu1 %v1343_v7 }
 0x7c5   : > { %1350 = vadd.xlane.f32.xlu1 %v1349_v10 }
 0x841   : > { %v1392_v11 = vpop.xlane.xlu0 %1391 }
 0x842   : > { %v1398_v12 = vmul.f32 0.015873017, %v1392_v11 }
 0x844   : > { %v1402_v13 = vadd.f32 1e-05, %v1398_v12 }
 0x845   : > { %v1386_v14 = vpop.xlane.xlu0 %1385 }
 0x846   : > { %1826 = vrsqrt.f32 %v1402_v13  ;;  %v1396_v15 = vmul.f32 0.015873017, %v1386_v14  ;;  %v1395_v16 = vpop.xlane.xlu1 %1394  ;;  %vm1420_vm2 = vcmp.eq.f32.partialorder %v1402_v13, inf  ;;  %v1423_v46 = vand.u32 2147483648, %v1402_v13 }
 0x847   : > { %v1399_v17 = vmul.f32 0.015873017, %v1395_v16  ;;  %vm1422_vm5 = vcmp.eq.f32.partialorder %v1402_v13, 0.0 }
 0x848   : > { %v1400_v18 = vadd.f32 1e-05, %v1396_v15 }
 0x849   : > { %v1403_v19 = vadd.f32 1e-05, %v1399_v17  ;;  %v1342_v22 = vpop.xlane.xlu0 %1341 }
 0x84a   : > { %1828 = vrsqrt.f32 %v1400_v18  ;;  %v1389_v23 = vpop.xlane.xlu1 %1388  ;;  %v1352_v24 = vmul.f32 0.015873017, %v1342_v22  ;;  %vm1406_vm3 = vcmp.eq.f32.partialorder %v1400_v18, inf  ;;  %v1409_v52 = vand.u32 2147483648, %v1400_v18 }
 0x84b   : > { %1830 = vrsqrt.f32 %v1403_v19  ;;  %v1397_v25 = vmul.f32 0.015873017, %v1389_v23  ;;  %vm1408_vm4 = vcmp.eq.f32.partialorder %v1400_v18, 0.0  ;;  %vm1427_vm6 = vcmp.eq.f32.partialorder %v1403_v19, inf }
 0x84c   : > { %v1356_v26 = vadd.f32 1e-05, %v1352_v24  ;;  %v1430_v39 = vand.u32 2147483648, %v1403_v19  ;;  %vm1429_vm9 = vcmp.eq.f32.partialorder %v1403_v19, 0.0 }
 0x84d   : > { %v1348_v27 = vpop.xlane.xlu0 %1347  ;;  %v1401_v30 = vadd.f32 1e-05, %v1397_v25 }
 0x84e   : > { %v1354_v31 = vmul.f32 0.015873017, %v1348_v27  ;;  %v1345_v32 = vpop.xlane.xlu1 %1344  ;;  %1832 = vrsqrt.f32 %v1356_v26 }
 0x84f   : > { %v1353_v33 = vmul.f32 0.015873017, %v1345_v32  ;;  %1834 = vrsqrt.f32 %v1401_v30  ;;  %vm1413_vm7 = vcmp.eq.f32.partialorder %v1401_v30, inf  ;;  %v1416_v0 = vand.u32 2147483648, %v1401_v30 }
 0x850   : > { %v1827_v34 = vpop.eup %1826  ;;  %v1358_v35 = vadd.f32 1e-05, %v1354_v31  ;;  %vm1415_vm8 = vcmp.eq.f32.partialorder %v1401_v30, 0.0 }
 0x851   : > { %v1419_v36 = vmul.f32 %v1827_v34, %v1402_v13  ;;  %v1357_v37 = vadd.f32 1e-05, %v1353_v33 }
 0x852   : > { %1836 = vrsqrt.f32 %v1358_v35  ;;  %v1351_v40 = vpop.xlane.xlu1 %1350 }
 0x853   : > { %v1355_v41 = vmul.f32 0.015873017, %v1351_v40  ;;  %v1421_v51 = vsel %vm1420_vm2, %v1402_v13, %v1419_v36  ;;  %1838 = vrsqrt.f32 %v1357_v37 }
 0x854   : > { %v1829_v43 = vpop.eup %1828  ;;  %v1424_v29 = vsel %vm1422_vm5, %v1423_v46, %v1421_v51 }
 0x855   : > { %v1831_v45 = vpop.eup %1830  ;;  %v1405_v47 = vmul.f32 %v1829_v43, %v1400_v18  ;;  %v1359_v20 = vadd.f32 1e-05, %v1355_v41  ;;  %v1434_v62 = vmul.f32 %v1424_v29, %v2441_v3 }
 0x856   : > { %v1426_v53 = vmul.f32 %v1831_v45, %v1403_v19 }
 0x857   : > { %v1407_v54 = vsel %vm1406_vm3, %v1400_v18, %v1405_v47  ;;  %1840 = vrsqrt.f32 %v1359_v20 }
 0x858   : > { %v1410_v21 = vsel %vm1408_vm4, %v1409_v52, %v1407_v54  ;;  %v1833_v55 = vpop.eup %1832  ;;  %v1428_v38 = vsel %vm1427_vm6, %v1403_v19, %v1426_v53 }
 0x859   : > { %v1432_v56 = vmul.f32 %v1410_v21, %v2431_v58  ;;  %v1835_v57 = vpop.eup %1834  ;;  %v1431_v2 = vsel %vm1429_vm9, %v1430_v39, %v1428_v38 }
 0x85a   : > { %v1412_v49 = vmul.f32 %v1835_v57, %v1401_v30  ;;  %v1435_v7 = vmul.f32 %v1431_v2, %v2445_v5 }
 0x85b   : > { %v1440_v48 = vmul.f32 %v1833_v55, %v1432_v56 }
 0x85c   : > { %v1837_v63 = vpop.eup %1836  ;;  %v1414_v58 = vsel %vm1413_vm7, %v1401_v30, %v1412_v49 }
 0x85d   : > { %v1444_v61 = vadd.f32 %v1440_v48, %v2420_v44  ;;  %v1442_v1 = vmul.f32 %v1837_v63, %v1434_v62  ;;  %v1417_v59 = vsel %vm1415_vm8, %v1416_v0, %v1414_v58  ;;  %v1839_v6 = vpop.eup %1838 }
 0x85e   : > { %v1433_v3 = vmul.f32 %v1417_v59, %v2435_v60 }
 0x85f   : > { %1448 = vst.msk [vmem:[%s532_s18] sm:$0xff] %vm550_vm0, %v1444_v61  ;;  %v1446_v4 = vadd.f32 %v1442_v1, %v2418_v42 }
 0x860   : > { %v1441_v9 = vmul.f32 %v1839_v6, %v1433_v3 }
 0x861   : > { %v1841_v8 = vpop.eup %1840  ;;  %1450 = vst.msk [vmem:[%s532_s18 + $0x10] sm:$0xff] %vm550_vm0, %v1446_v4 }
 0x862   : > { %v1443_v10 = vmul.f32 %v1841_v8, %v1435_v7  ;;  %v1445_v44 = vadd.f32 %v1441_v9, %v2424_v50 }
 0x864   : > { %v1447_v11 = vadd.f32 %v1443_v10, %v2426_v28  ;;  %1449 = vst.msk [vmem:[%s532_s18 + $0x8] sm:$0xff] %vm550_vm0, %v1445_v44 }
 0x866   : > { %1451 = vst.msk [vmem:[%s532_s18 + $0x18] sm:$0xff] %vm550_vm0, %v1447_v11 }
 0x867 PF: > { %s2502_s23 = sld [smem:[#allocation12_spill]] }
 0x86d   : > { %s25_s21 = sadd.s32 1, %s2502_s23  }
 0x86e   : > { %p22_p6 = scmp.ge.s32.totalorder %s25_s21, 4  }
 0x870   :  { %24 = sbr.rel (!%p22_p6) target bundleno = 5 (0x5), region = 124 }
 0x877   :  { %1473 = vsyncpa [#allocation3], 1 }
 0x878   :  { %1475 = vsyncpa [#allocation3 + $0x1], 1 }
 0x879   :  { %1476 = vsyncpa [#allocation5], 1 }
 0x87a   :  { %1477 = vsyncpa [#allocation8], 1 }

// kernel: transformer_forward.3
= control target key start
LH: loop header
LB: loop body
LE: loop exit
PB: predicated region body
PF: predicated region fallthrough
CT: control target
= control target key end

     0   :  { %s2546_s21 = smov 0   ;;  %s3496_s0 = inlined_call_operand.vmem [shape: f32[2,32,256], index: 0, kind: input, shape index: {}]   ;;  %s3497_s1 = inlined_call_operand.vmem [shape: f32[2,32,256], index: 1, kind: input, shape index: {}]   ;;  %s3498_s2 = inlined_call_operand.vmem [shape: f32[2,32,256], index: 2, kind: input, shape index: {}]   ;;  %s3499_s3 = inlined_call_operand.vmem [shape: f32[2,32,256], index: 3, kind: input, shape index: {}]   ;;  %s3500_s4 = inlined_call_operand.vmem [shape: f32[32,32], index: 4, kind: input, shape index: {}]   ;;  %s3501_s5 = inlined_call_operand.vmem [shape: f32[32,1], index: 5, kind: input, shape index: {}]   ;;  %s3502_s6 = inlined_call_operand.vmem [shape: f32[32,32], index: 6, kind: input, shape index: {}]   ;;  %s3503_s7 = inlined_call_operand.vmem [shape: f32[32,1], index: 7, kind: input, shape index: {}]   ;;  %s3504_s8 = inlined_call_operand.vmem [shape: f32[32,32], index: 8, kind: input, shape index: {}]   ;;  %s3505_s9 = inlined_call_operand.vmem [shape: f32[32,1], index: 9, kind: input, shape index: {}]   ;;  %s3506_s10 = inlined_call_operand.vmem [shape: f32[32,32], index: 10, kind: input, shape index: {}]   ;;  %s3507_s11 = inlined_call_operand.vmem [shape: f32[32,1], index: 11, kind: input, shape index: {}]   ;;  %s3508_s12 = inlined_call_operand.vmem [shape: f32[2,32,256], index: 12, kind: output, shape index: {}]  }
   0x1 LB: > { %s2183_s22 = sadd.s32 4294967295, %s2478_s21   ;;  %p2187_p0 = scmp.ge.s32.totalorder %s2478_s21, 1  ;;  %s2478_s21 = sphi %s2546_s21, %s22_s21  }
   0x2   : > { %p392_p1 = scmp.lt.s32.totalorder %s2478_s21, 3 }
   0x4   : > { %p393_p2 = pnand %p2187_p0, %p392_p1 }
   0x6   : > { %396 = sbr.rel (%p393_p2) target bundleno = 2215 (0x8a7), region = 68 }
   0xd   : > { %p449_p3 = scmp.lt.s32.totalorder %s2183_s22, 1  ;;  %vm607_vm0 = vcmask 261120  }
   0xf   : > { %s3602_s22 = smov (!%p449_p3, %s2183_s22), 1 }
  0x10   : > { %s2554_s23 = sshll.u32 %s3602_s22, 6 }
  0x11   : > { %s463_s26 = scalar_lea.vmem %s3498_s2, %s2554_s23  ;;  %s468_s29 = scalar_lea.vmem %s3499_s3, %s2554_s23 }
  0x12   : > { %v491_v0 = vld [vmem:[%s463_s26] sm:$0xff]  ;;  %v492_v1 = vld [vmem:[%s463_s26 + $0x8] sm:$0xff]  ;;  %v493_v5 = vld [vmem:[%s463_s26 + $0x10] sm:$0xff]  ;;  %s458_s14 = scalar_lea.vmem %s3497_s1, %s2554_s23  ;;  %s453_s17 = scalar_lea.vmem %s3496_s0, %s2554_s23 }
  0x13   : > { %v495_v2 = vld [vmem:[%s463_s26 + $0x20] sm:$0xff]  ;;  %v507_v3 = vadd.f32 %v492_v1, %v491_v0  ;;  %v496_v4 = vld [vmem:[%s463_s26 + $0x28] sm:$0xff]  ;;  %v494_v6 = vld [vmem:[%s463_s26 + $0x18] sm:$0xff]  ;;  %s3469_s20 = scalar_lea.vmem %s3508_s12, %s2554_s23 }
  0x14   : > { %v513_v7 = vadd.f32 %v496_v4, %v495_v2  ;;  %v497_v8 = vld [vmem:[%s463_s26 + $0x30] sm:$0xff]  ;;  %v498_v9 = vld [vmem:[%s463_s26 + $0x38] sm:$0xff]  ;;  %v510_v10 = vadd.f32 %v494_v6, %v493_v5  ;;  %v499_v12 = vld [vmem:[%s468_s29] sm:$0xff] }
  0x15   : > { %508 = vadd.xlane.f32.xlu0 %v507_v3  ;;  %v516_v11 = vadd.f32 %v498_v9, %v497_v8  ;;  %v500_v13 = vld [vmem:[%s468_s29 + $0x8] sm:$0xff]  ;;  %v501_v14 = vld [vmem:[%s468_s29 + $0x10] sm:$0xff]  ;;  %v502_v15 = vld [vmem:[%s468_s29 + $0x18] sm:$0xff] }
  0x16   : > { %514 = vadd.xlane.f32.xlu1 %v513_v7  ;;  %v667_v16 = vadd.f32 %v500_v13, %v499_v12  ;;  %v670_v17 = vadd.f32 %v502_v15, %v501_v14  ;;  %v503_v18 = vld [vmem:[%s468_s29 + $0x20] sm:$0xff]  ;;  %v504_v19 = vld [vmem:[%s468_s29 + $0x28] sm:$0xff]  ;;  %v505_v20 = vld [vmem:[%s468_s29 + $0x30] sm:$0xff] }
  0x17   : > { %v506_v21 = vld [vmem:[%s468_s29 + $0x38] sm:$0xff]  ;;  %v673_v22 = vadd.f32 %v504_v19, %v503_v18 }
  0x18   : > { %v676_v23 = vadd.f32 %v506_v21, %v505_v20 }
  0x19   : > { %511 = vadd.xlane.f32.xlu0 %v510_v10 }
  0x1a   : > { %517 = vadd.xlane.f32.xlu1 %v516_v11 }
  0x1d   : > { %668 = vadd.xlane.f32.xlu0 %v667_v16  ;;  %v3509_v16 = vmov 0  }
  0x1e   : > { %671 = vadd.xlane.f32.xlu1 %v670_v17  ;;  %646 = vmatprep.mubr.bf16.mxu0 %v3509_v16  ;;  %v584_v17 = vld [vmem:[%s3501_s5 + $0x8] sm:$0xff] }
  0x1f   : > { %803 = vmatprep.mubr.bf16.mxu1 %v3509_v16  ;;  %2239 = vset.pattern.permute.xlu1 %v3509_v16 }
  0x20   : > { %2238 = vset.pattern.permute.xlu0 %v3509_v16 }
  0x21   : > { %674 = vadd.xlane.f32.xlu0 %v673_v22  ;;  %v742_v22 = vld [vmem:[%s3503_s7 + $0x8] sm:$0xff] }
  0x22   : > { %677 = vadd.xlane.f32.xlu1 %v676_v23  ;;  %v743_v23 = vld [vmem:[%s3503_s7 + $0x10] sm:$0xff] }
  0xa2   : > { %v509_v24 = vpop.xlane.xlu0 %508 }
  0xa3   : > { %v520_v25 = vmul.f32 0.00390625, %v509_v24  ;;  %v515_v26 = vpop.xlane.xlu1 %514  ;;  %v744_v24 = vld [vmem:[%s3503_s7 + $0x18] sm:$0xff] }
  0xa4   : > { %v522_v27 = vmul.f32 0.00390625, %v515_v26 }
  0xa5   : > { %v2564_v28 = vsub.f32 %v491_v0, %v520_v25  ;;  %v2566_v29 = vsub.f32 %v492_v1, %v520_v25 }
  0xa6   : > { %v2568_v30 = vsub.f32 %v495_v2, %v522_v27  ;;  %v2570_v31 = vsub.f32 %v496_v4, %v522_v27  ;;  %v512_v32 = vpop.xlane.xlu0 %511 }
  0xa7   : > { %v521_v33 = vmul.f32 0.00390625, %v512_v32  ;;  %v518_v34 = vpop.xlane.xlu1 %517  ;;  %v532_v35 = vmul.f32 %v2564_v28, %v2564_v28  ;;  %v533_v36 = vmul.f32 %v2566_v29, %v2566_v29 }
  0xa8   : > { %v523_v37 = vmul.f32 0.00390625, %v518_v34  ;;  %v536_v38 = vmul.f32 %v2568_v30, %v2568_v30  ;;  %v537_v39 = vmul.f32 %v2570_v31, %v2570_v31 }
  0xa9   : > { %v2580_v40 = vsub.f32 %v493_v5, %v521_v33  ;;  %v2582_v41 = vsub.f32 %v494_v6, %v521_v33  ;;  %v540_v42 = vadd.f32 %v533_v36, %v532_v35 }
  0xaa   : > { %v2584_v43 = vsub.f32 %v497_v8, %v523_v37  ;;  %v2586_v44 = vsub.f32 %v498_v9, %v523_v37  ;;  %v669_v45 = vpop.xlane.xlu0 %668  ;;  %v546_v48 = vadd.f32 %v537_v39, %v536_v38 }
  0xab   : > { %v679_v46 = vmul.f32 0.00390625, %v669_v45  ;;  %541 = vadd.xlane.f32.xlu0 %v540_v42  ;;  %v672_v47 = vpop.xlane.xlu1 %671  ;;  %v534_v49 = vmul.f32 %v2580_v40, %v2580_v40  ;;  %v535_v50 = vmul.f32 %v2582_v41, %v2582_v41 }
  0xac   : > { %v680_v51 = vmul.f32 0.00390625, %v672_v47  ;;  %v538_v52 = vmul.f32 %v2584_v43, %v2584_v43  ;;  %v539_v53 = vmul.f32 %v2586_v44, %v2586_v44 }
  0xad   : > { %v2596_v54 = vsub.f32 %v499_v12, %v679_v46  ;;  %v2598_v55 = vsub.f32 %v500_v13, %v679_v46  ;;  %v543_v56 = vadd.f32 %v535_v50, %v534_v49 }
  0xae   : > { %v2600_v57 = vsub.f32 %v501_v14, %v680_v51  ;;  %v2602_v58 = vsub.f32 %v502_v15, %v680_v51  ;;  %v675_v59 = vpop.xlane.xlu0 %674  ;;  %v549_v62 = vadd.f32 %v539_v53, %v538_v52 }
  0xaf   : > { %v681_v60 = vmul.f32 0.00390625, %v675_v59  ;;  %547 = vadd.xlane.f32.xlu0 %v546_v48  ;;  %544 = vadd.xlane.f32.xlu1 %v543_v56  ;;  %v678_v61 = vpop.xlane.xlu1 %677  ;;  %v691_v63 = vmul.f32 %v2596_v54, %v2596_v54  ;;  %v692_v0 = vmul.f32 %v2598_v55, %v2598_v55 }
  0xb0   : > { %v682_v1 = vmul.f32 0.00390625, %v678_v61  ;;  %v693_v2 = vmul.f32 %v2600_v57, %v2600_v57  ;;  %v694_v3 = vmul.f32 %v2602_v58, %v2602_v58 }
  0xb1   : > { %v2612_v4 = vsub.f32 %v503_v18, %v681_v60  ;;  %v2614_v5 = vsub.f32 %v504_v19, %v681_v60  ;;  %v699_v6 = vadd.f32 %v692_v0, %v691_v63  ;;  %v585_v18 = vld [vmem:[%s3501_s5 + $0x10] sm:$0xff]  ;;  %v583_v19 = vld [vmem:[%s3501_s5] sm:$0xff] }
  0xb2   : > { %v2616_v7 = vsub.f32 %v505_v20, %v682_v1  ;;  %v2618_v8 = vsub.f32 %v506_v21, %v682_v1  ;;  %v702_v9 = vadd.f32 %v694_v3, %v693_v2  ;;  %v586_v20 = vld [vmem:[%s3501_s5 + $0x18] sm:$0xff]  ;;  %v741_v21 = vld [vmem:[%s3503_s7] sm:$0xff] }
  0xb3   : > { %550 = vadd.xlane.f32.xlu1 %v549_v62  ;;  %700 = vadd.xlane.f32.xlu0 %v699_v6  ;;  %v695_v10 = vmul.f32 %v2612_v4, %v2612_v4  ;;  %v696_v11 = vmul.f32 %v2614_v5, %v2614_v5 }
  0xb4   : > { %v697_v12 = vmul.f32 %v2616_v7, %v2616_v7  ;;  %v698_v13 = vmul.f32 %v2618_v8, %v2618_v8 }
  0xb5   : > { %v705_v14 = vadd.f32 %v696_v11, %v695_v10 }
  0xb6   : > { %v708_v15 = vadd.f32 %v698_v13, %v697_v12 }
  0xb7   : > { %703 = vadd.xlane.f32.xlu1 %v702_v9  ;;  %706 = vadd.xlane.f32.xlu0 %v705_v14 }
  0xbb   : > { %709 = vadd.xlane.f32.xlu1 %v708_v15 }
  0xcc   : > { %594 = vperm.xlu1 %2239, %v584_v17  }
  0xcd   : > { %589 = vperm.xlu0 %2238, %v583_v19  }
  0xd0   : > { %599 = vperm.xlu1 %2239, %v585_v18  }
  0xd4   : > { %604 = vperm.xlu1 %2239, %v586_v20  }
  0xd8   : > { %747 = vperm.xlu1 %2239, %v741_v21  }
  0xdc   : > { %752 = vperm.xlu1 %2239, %v742_v22  }
  0xe0   : > { %757 = vperm.xlu1 %2239, %v743_v23  }
  0xe4   : > { %762 = vperm.xlu1 %2239, %v744_v24  }
 0x138   : > { %v542_v25 = vpop.xlane.xlu0 %541 }
 0x139   : > { %v553_v26 = vmul.f32 0.003921569, %v542_v25 }
 0x13b   : > { %v557_v27 = vadd.f32 1e-05, %v553_v26 }
 0x13c   : > { %v545_v32 = vpop.xlane.xlu1 %544  ;;  %v548_v33 = vpop.xlane.xlu0 %547 }
 0x13d   : > { %v554_v34 = vmul.f32 0.003921569, %v545_v32  ;;  %v555_v35 = vmul.f32 0.003921569, %v548_v33  ;;  %2240 = vrsqrt.f32 %v557_v27  ;;  %v733_v27 = vld [vmem:[%s3502_s6 + $0x10] sm:$0xff]  ;;  %v734_v32 = vld [vmem:[%s3502_s6 + $0x18] sm:$0xff] }
 0x13e   : > { %v736_v33 = vpack.c.bf16 %v734_v32, %v733_v27 }
 0x13f   : > { %v558_v36 = vadd.f32 1e-05, %v554_v34  ;;  %v559_v37 = vadd.f32 1e-05, %v555_v35 }
 0x140   : > { %v551_v38 = vpop.xlane.xlu1 %550  ;;  %v701_v39 = vpop.xlane.xlu0 %700 }
 0x141   : > { %2242 = vrsqrt.f32 %v558_v36  ;;  %v556_v42 = vmul.f32 0.003921569, %v551_v38  ;;  %v711_v45 = vmul.f32 0.003921569, %v701_v39 }
 0x142   : > { %2244 = vrsqrt.f32 %v559_v37 }
 0x143   : > { %v560_v46 = vadd.f32 1e-05, %v556_v42  ;;  %v715_v47 = vadd.f32 1e-05, %v711_v45 }
 0x144   : > { %v704_v48 = vpop.xlane.xlu1 %703  ;;  %v707_v49 = vpop.xlane.xlu0 %706 }
 0x145   : > { %2246 = vrsqrt.f32 %v560_v46  ;;  %v712_v50 = vmul.f32 0.003921569, %v704_v48  ;;  %v713_v51 = vmul.f32 0.003921569, %v707_v49 }
 0x146   : > { %2248 = vrsqrt.f32 %v715_v47 }
 0x147   : > { %v716_v52 = vadd.f32 1e-05, %v712_v50  ;;  %v717_v53 = vadd.f32 1e-05, %v713_v51  ;;  %v2241_v59 = vpop.eup %2240 }
 0x148   : > { %v710_v56 = vpop.xlane.xlu1 %709  ;;  %v566_v63 = vmul.f32 %v2241_v59, %v2566_v29  ;;  %v565_v1 = vmul.f32 %v2241_v59, %v2564_v28  ;;  %v573_v28 = vld [vmem:[%s3500_s4] sm:$0xff] }
 0x149   : > { %2250 = vrsqrt.f32 %v716_v52  ;;  %v714_v60 = vmul.f32 0.003921569, %v710_v56 }
 0x14a   : > { %2252 = vrsqrt.f32 %v717_v53 }
 0x14b   : > { %v2243_v61 = vpop.eup %2242  ;;  %v718_v62 = vadd.f32 1e-05, %v714_v60 }
 0x14c   : > { %v568_v0 = vmul.f32 %v2243_v61, %v2582_v41  ;;  %v567_v2 = vmul.f32 %v2243_v61, %v2580_v40  ;;  %v2245_v3 = vpop.eup %2244  ;;  %v574_v40 = vld [vmem:[%s3500_s4 + $0x8] sm:$0xff]  ;;  %v595_v34 = vpop.permute.xlu1 %594 }
 0x14d   : > { %2254 = vrsqrt.f32 %v718_v62  ;;  %v570_v11 = vmul.f32 %v2245_v3, %v2570_v31  ;;  %v569_v13 = vmul.f32 %v2245_v3, %v2568_v30  ;;  %v577_v31 = vpack.c.bf16 %v574_v40, %v573_v28  ;;  %v590_v39 = vpop.permute.xlu0 %589 }
 0x14e   : > { %v580_v6 = vpack.c.bf16 %v568_v0, %v566_v63  ;;  %v579_v9 = vpack.c.bf16 %v567_v2, %v565_v1 }
 0x14f   : > { %v2247_v10 = vpop.eup %2246 }
 0x150   : > { %614 = vmatprep.subr.bf16.mxu0 %v580_v6  ;;  %v572_v12 = vmul.f32 %v2247_v10, %v2586_v44  ;;  %v571_v29 = vmul.f32 %v2247_v10, %v2584_v43  ;;  %v2249_v41 = vpop.eup %2248  ;;  %v600_v35 = vpop.permute.xlu1 %599 }
 0x151   : > { %615 = vmatpush1.bf16.msra.mxu0 %v579_v9  ;;  %v724_v30 = vmul.f32 %v2249_v41, %v2598_v55  ;;  %v723_v44 = vmul.f32 %v2249_v41, %v2596_v54  ;;  %v575_v54 = vld [vmem:[%s3500_s4 + $0x10] sm:$0xff] }
 0x152   : > { %v582_v14 = vpack.c.bf16 %v572_v12, %v570_v11  ;;  %v581_v15 = vpack.c.bf16 %v571_v29, %v569_v13 }
 0x153   : > { %v2251_v17 = vpop.eup %2250 }
 0x154   : > { %v2253_v18 = vpop.eup %2252  ;;  %616 = vmatprep.subr.bf16.mxu0 %v582_v14  ;;  %v726_v43 = vmul.f32 %v2251_v17, %v2602_v58  ;;  %v725_v19 = vmul.f32 %v2251_v17, %v2600_v57  ;;  %v576_v57 = vld [vmem:[%s3500_s4 + $0x18] sm:$0xff]  ;;  %v605_v36 = vpop.permute.xlu1 %604 }
 0x155   : > { %617 = vmatpush1.bf16.msra.mxu0 %v581_v15  ;;  %v728_v23 = vmul.f32 %v2253_v18, %v2614_v5  ;;  %v727_v55 = vmul.f32 %v2253_v18, %v2612_v4  ;;  %v731_v5 = vld [vmem:[%s3502_s6] sm:$0xff]  ;;  %v732_v4 = vld [vmem:[%s3502_s6 + $0x8] sm:$0xff]  ;;  %v578_v25 = vpack.c.bf16 %v576_v57, %v575_v54 }
 0x156   : > { %v738_v20 = vpack.c.bf16 %v726_v43, %v724_v30  ;;  %v737_v21 = vpack.c.bf16 %v725_v19, %v723_v44  ;;  %v735_v26 = vpack.c.bf16 %v732_v4, %v731_v5  ;;  %v2708_v5 = vld [vmem:[%s458_s14 + $0x30] sm:$0xff]  ;;  %v2710_v4 = vld [vmem:[%s458_s14 + $0x38] sm:$0xff] }
 0x157   : > { %v2255_v22 = vpop.eup %2254 }
 0x158   : > { %2198 = vmatmul.mubr.msk.bf16.vlgmr.msra.gmra.mrb[0].mxu0 %vm607_vm0, %v577_v31  ;;  %771 = vmatprep.subr.bf16.mxu1 %v738_v20  ;;  %v730_v24 = vmul.f32 %v2255_v22, %v2618_v8  ;;  %v729_v58 = vmul.f32 %v2255_v22, %v2616_v7  ;;  %v748_v37 = vpop.permute.xlu1 %747 }
 0x159   : > { %772 = vmatpush1.bf16.msra.mxu1 %v737_v21  ;;  %656 = vmatprep.mubr.bf16.mxu0 %v3509_v16 }
 0x15a   : > { %v740_v7 = vpack.c.bf16 %v730_v24, %v728_v23  ;;  %v739_v8 = vpack.c.bf16 %v729_v58, %v727_v55  ;;  %v485_v23 = vld [vmem:[%s458_s14 + $0x10] sm:$0xff]  ;;  %v486_v24 = vld [vmem:[%s458_s14 + $0x18] sm:$0xff]  ;;  %v483_v55 = vld [vmem:[%s458_s14] sm:$0xff] }
 0x15b   : > { %v484_v58 = vld [vmem:[%s458_s14 + $0x8] sm:$0xff]  ;;  %v827_v54 = vadd.f32 %v486_v24, %v485_v23 }
 0x15c   : > { %773 = vmatprep.subr.bf16.mxu1 %v740_v7  ;;  %v753_v52 = vpop.permute.xlu1 %752  ;;  %v824_v57 = vadd.f32 %v484_v58, %v483_v55  ;;  %v2712_v7 = vld [vmem:[%s458_s14 + $0x20] sm:$0xff] }
 0x15d   : > { %774 = vmatpush1.bf16.msra.mxu1 %v739_v8  ;;  %v2714_v8 = vld [vmem:[%s458_s14 + $0x28] sm:$0xff] }
 0x160   : > { %2199 = vmatmul.mubr.msk.bf16.gmra.mrb[4].mxu0 %vm607_vm0, %v578_v25  ;;  %2200 = vmatmul.mubr.msk.bf16.vlgmr.msra.gmra.mrb[0].mxu1 %vm607_vm0, %v735_v26  ;;  %v758_v10 = vpop.permute.xlu1 %757  ;;  %v833_v25 = vadd.f32 %v2710_v4, %v2708_v5  ;;  %v830_v26 = vadd.f32 %v2714_v8, %v2712_v7 }
 0x161   : > { %813 = vmatprep.mubr.bf16.mxu1 %v3509_v16  ;;  %960 = vmatprep.mubr.bf16.mxu0 %v3509_v16 }
 0x164   : > { %v763_v31 = vpop.permute.xlu1 %762 }
 0x168   : > { %2201 = vmatmul.mubr.msk.bf16.gmra.mrb[4].mxu1 %vm607_vm0, %v736_v33 }
 0x169   : > { %1101 = vmatprep.mubr.bf16.mxu1 %v3509_v16 }
 0x22b   : > { %v648_v38 = vpop.f32.mrb[0].mxu0 }
 0x22c   : > { %v650_v42 = vpop.f32.mrb[1].mxu0  ;;  %v649_v46 = vadd.f32 %v648_v38, %v590_v39 }
 0x22d   : > { %v652_v45 = vpop.f32.mrb[2].mxu0  ;;  %v651_v49 = vadd.f32 %v650_v42, %v590_v39 }
 0x22e   : > { %v653_v47 = vadd.f32 %v652_v45, %v595_v34  ;;  %v654_v48 = vpop.f32.mrb[3].mxu0 }
 0x22f   : > { %v655_v50 = vadd.f32 %v654_v48, %v595_v34 }
 0x230   : > { %v981_v51 = vpack.c.bf16 %v653_v47, %v649_v46 }
 0x231   : > { %v982_v53 = vpack.c.bf16 %v655_v50, %v651_v49 }
 0x232   : > { %989 = vxpose.xlu1.c.b16.start [1/2] (short) %v981_v51, 128 }
 0x233   : > { %v658_v56 = vpop.f32.mrb[4].mxu0  ;;  %v805_v59 = vpop.f32.mrb[0].mxu1  ;;  %1005 = vxpose.xlu0.c.b16.start [1/2] (short) %v982_v53, 128 }
 0x234   : > { %v660_v60 = vpop.f32.mrb[5].mxu0  ;;  %v807_v61 = vpop.f32.mrb[1].mxu1  ;;  %v659_v0 = vadd.f32 %v658_v56, %v600_v35  ;;  %v806_v1 = vadd.f32 %v805_v59, %v748_v37 }
 0x235   : > { %v662_v62 = vpop.f32.mrb[6].mxu0  ;;  %v809_v63 = vpop.f32.mrb[2].mxu1  ;;  %v661_v11 = vadd.f32 %v660_v60, %v600_v35  ;;  %v808_v12 = vadd.f32 %v807_v61, %v748_v37 }
 0x236   : > { %v663_v2 = vadd.f32 %v662_v62, %v605_v36  ;;  %v810_v3 = vadd.f32 %v809_v63, %v753_v52  ;;  %v664_v6 = vpop.f32.mrb[7].mxu0  ;;  %v811_v9 = vpop.f32.mrb[3].mxu1 }
 0x237   : > { %v665_v13 = vadd.f32 %v664_v6, %v605_v36  ;;  %v812_v29 = vadd.f32 %v811_v9, %v753_v52 }
 0x238   : > { %v983_v28 = vpack.c.bf16 %v663_v2, %v659_v0  ;;  %v985_v40 = vpack.c.bf16 %v810_v3, %v806_v1 }
 0x239   : > { %v984_v41 = vpack.c.bf16 %v665_v13, %v661_v11  ;;  %v986_v14 = vpack.c.bf16 %v812_v29, %v808_v12 }
 0x23a   : > { %990 = vxpose.xlu1.c.b16.end [2/2] (short) %v983_v28, 128 }
 0x23b   : > { %v815_v15 = vpop.f32.mrb[4].mxu1  ;;  %1069 = vmatprep.subr.bf16.mxu1 %v986_v14  ;;  %1006 = vxpose.xlu0.c.b16.end [2/2] (short) %v984_v41, 128 }
 0x23c   : > { %v817_v17 = vpop.f32.mrb[5].mxu1  ;;  %1070 = vmatpush1.bf16.msra.mxu1 %v985_v40  ;;  %v816_v30 = vadd.f32 %v815_v15, %v758_v10 }
 0x23d   : > { %v819_v18 = vpop.f32.mrb[6].mxu1  ;;  %v818_v19 = vadd.f32 %v817_v17, %v758_v10 }
 0x23e   : > { %v820_v43 = vadd.f32 %v819_v18, %v763_v31  ;;  %v821_v44 = vpop.f32.mrb[7].mxu1 }
 0x23f   : > { %v822_v20 = vadd.f32 %v821_v44, %v763_v31 }
 0x240   : > { %v987_v21 = vpack.c.bf16 %v820_v43, %v816_v30 }
 0x241   : > { %v988_v22 = vpack.c.bf16 %v822_v20, %v818_v19 }
 0x243   : > { %1071 = vmatprep.subr.bf16.mxu1 %v988_v22 }
 0x244   : > { %1072 = vmatpush1.bf16.msra.mxu1 %v987_v21 }
 0x25f   : > { %828 = vadd.xlane.f32.xlu1 %v827_v54 }
 0x260   : > { %825 = vadd.xlane.f32.xlu0 %v824_v57 }
 0x263   : > { %834 = vadd.xlane.f32.xlu1 %v833_v25 }
 0x264   : > { %831 = vadd.xlane.f32.xlu0 %v830_v26 }
 0x29c   : > { %v997_v27 = vpop.trf.xlu1 }
 0x29d   : > { %2204 = vmatmul.mubr.msk.bf16.vlgmr.msra.gmra.mrb[8].mxu1 %vm607_vm0, %v997_v27  ;;  %v1013_v36 = vpop.trf.xlu0 }
 0x29e   : > { %1111 = vmatprep.mubr.bf16.mxu1 %v3509_v16 }
 0x2a0   : > { %v998_v32 = vpop.trf.xlu1 }
 0x2a1   : > { %v1014_v38 = vpop.trf.xlu0 }
 0x2a4   : > { %v999_v33 = vpop.trf.xlu1 }
 0x2a5   : > { %2205 = vmatmul.mubr.msk.bf16.gmra.mrb[12].mxu1 %vm607_vm0, %v998_v32  ;;  %v1015_v39 = vpop.trf.xlu0 }
 0x2a6   : > { %1121 = vmatprep.mubr.bf16.mxu1 %v3509_v16 }
 0x2a8   : > { %v1000_v34 = vpop.trf.xlu1 }
 0x2a9   : > { %v1016_v45 = vpop.trf.xlu0 }
 0x2ac   : > { %v1001_v35 = vpop.trf.xlu1 }
 0x2ad   : > { %2206 = vmatmul.mubr.msk.bf16.gmra.mrb[16].mxu1 %vm607_vm0, %v999_v33  ;;  %v1017_v47 = vpop.trf.xlu0 }
 0x2ae   : > { %1131 = vmatprep.mubr.bf16.mxu1 %v3509_v16 }
 0x2b0   : > { %v1002_v37 = vpop.trf.xlu1 }
 0x2b1   : > { %v1018_v48 = vpop.trf.xlu0 }
 0x2b4   : > { %v1003_v42 = vpop.trf.xlu1 }
 0x2b5   : > { %2207 = vmatmul.mubr.msk.bf16.gmra.mrb[20].mxu1 %vm607_vm0, %v1000_v34  ;;  %v1019_v49 = vpop.trf.xlu0 }
 0x2b6   : > { %1141 = vmatprep.mubr.bf16.mxu1 %v3509_v16 }
 0x2b8   : > { %v1004_v46 = vpop.trf.xlu1 }
 0x2b9   : > { %v1020_v50 = vpop.trf.xlu0 }
 0x2bd   : > { %2208 = vmatmul.mubr.msk.bf16.gmra.mrb[24].mxu1 %vm607_vm0, %v1001_v35 }
 0x2be   : > { %1151 = vmatprep.mubr.bf16.mxu1 %v3509_v16 }
 0x2c5   : > { %2209 = vmatmul.mubr.msk.bf16.gmra.mrb[28].mxu1 %vm607_vm0, %v1002_v37 }
 0x2c6   : > { %1161 = vmatprep.mubr.bf16.mxu1 %v3509_v16 }
 0x2cd   : > { %2210 = vmatmul.mubr.msk.bf16.gmra.mrb[32].mxu1 %vm607_vm0, %v1003_v42 }
 0x2ce   : > { %1171 = vmatprep.mubr.bf16.mxu1 %v3509_v16 }
 0x2d5   : > { %2211 = vmatmul.mubr.msk.bf16.gmra.mrb[36].mxu1 %vm607_vm0, %v1004_v46 }
 0x2d6   : > { %1181 = vmatprep.mubr.bf16.mxu1 %v3509_v16 }
 0x2dd   : > { %2212 = vmatmul.mubr.msk.bf16.gmra.mrb[40].mxu1 %vm607_vm0, %v1013_v36 }
 0x2de   : > { %1191 = vmatprep.mubr.bf16.mxu1 %v3509_v16 }
 0x2e5   : > { %2213 = vmatmul.mubr.msk.bf16.gmra.mrb[44].mxu1 %vm607_vm0, %v1014_v38 }
 0x2e6   : > { %1201 = vmatprep.mubr.bf16.mxu1 %v3509_v16 }
 0x2ec   : > { %v829_v51 = vpop.xlane.xlu1 %828 }
 0x2ed   : > { %v837_v52 = vmul.f32 0.00390625, %v829_v51  ;;  %2214 = vmatmul.mubr.msk.bf16.gmra.mrb[48].mxu1 %vm607_vm0, %v1015_v39  ;;  %v826_v53 = vpop.xlane.xlu0 %825 }
 0x2ee   : > { %v836_v56 = vmul.f32 0.00390625, %v826_v53  ;;  %1211 = vmatprep.mubr.bf16.mxu1 %v3509_v16 }
 0x2ef   : > { %v2742_v59 = vsub.f32 %v485_v23, %v837_v52  ;;  %v2744_v60 = vsub.f32 %v486_v24, %v837_v52 }
 0x2f0   : > { %v2746_v61 = vsub.f32 %v483_v55, %v836_v56  ;;  %v2748_v62 = vsub.f32 %v484_v58, %v836_v56  ;;  %v835_v63 = vpop.xlane.xlu1 %834 }
 0x2f1   : > { %v839_v0 = vmul.f32 0.00390625, %v835_v63  ;;  %v832_v1 = vpop.xlane.xlu0 %831  ;;  %v850_v2 = vmul.f32 %v2742_v59, %v2742_v59  ;;  %v851_v3 = vmul.f32 %v2744_v60, %v2744_v60 }
 0x2f2   : > { %v838_v6 = vmul.f32 0.00390625, %v832_v1  ;;  %v848_v9 = vmul.f32 %v2746_v61, %v2746_v61  ;;  %v849_v10 = vmul.f32 %v2748_v62, %v2748_v62 }
 0x2f3   : > { %v2759_v11 = vsub.f32 %v2708_v5, %v839_v0  ;;  %v2762_v12 = vsub.f32 %v2710_v4, %v839_v0  ;;  %v859_v13 = vadd.f32 %v851_v3, %v850_v2 }
 0x2f4   : > { %v2765_v29 = vsub.f32 %v2712_v7, %v838_v6  ;;  %v2768_v28 = vsub.f32 %v2714_v8, %v838_v6  ;;  %v856_v40 = vadd.f32 %v849_v10, %v848_v9 }
 0x2f5   : > { %2215 = vmatmul.mubr.msk.bf16.gmra.mrb[52].mxu1 %vm607_vm0, %v1016_v45  ;;  %860 = vadd.xlane.f32.xlu1 %v859_v13  ;;  %v854_v41 = vmul.f32 %v2759_v11, %v2759_v11  ;;  %v855_v14 = vmul.f32 %v2762_v12, %v2762_v12 }
 0x2f6   : > { %857 = vadd.xlane.f32.xlu0 %v856_v40  ;;  %v852_v15 = vmul.f32 %v2765_v29, %v2765_v29  ;;  %v853_v17 = vmul.f32 %v2768_v28, %v2768_v28  ;;  %1221 = vmatprep.mubr.bf16.mxu1 %v3509_v16 }
 0x2f7   : > { %v865_v31 = vadd.f32 %v855_v14, %v854_v41 }
 0x2f8   : > { %v862_v18 = vadd.f32 %v853_v17, %v852_v15 }
 0x2f9   : > { %866 = vadd.xlane.f32.xlu1 %v865_v31 }
 0x2fa   : > { %863 = vadd.xlane.f32.xlu0 %v862_v18 }
 0x2fd   : > { %2216 = vmatmul.mubr.msk.bf16.gmra.mrb[56].mxu1 %vm607_vm0, %v1017_v47 }
 0x2fe   : > { %1231 = vmatprep.mubr.bf16.mxu1 %v3509_v16 }
 0x305   : > { %2217 = vmatmul.mubr.msk.bf16.gmra.mrb[60].mxu1 %vm607_vm0, %v1018_v48 }
 0x306   : > { %1241 = vmatprep.mubr.bf16.mxu1 %v3509_v16 }
 0x30d   : > { %2218 = vmatmul.mubr.msk.bf16.gmra.mrb[64].mxu1 %vm607_vm0, %v1019_v49 }
 0x30e   : > { %1251 = vmatprep.mubr.bf16.mxu1 %v3509_v16 }
 0x315   : > { %2219 = vmatmul.mubr.msk.bf16.gmra.mrb[68].mxu1 %vm607_vm0, %v1020_v50 }
 0x316   : > { %1903 = vmatprep.mubr.bf16.mxu1 %v3509_v16  ;;  %v889_v16 = vld [vmem:[%s3504_s8 + $0x8] sm:$0xff] }
 0x370   : > { %v2788_v30 = vpop.f32.mrb[8].mxu1 }
 0x371   : > { %v2790_v43 = vpop.f32.mrb[9].mxu1 }
 0x372   : > { %v2792_v44 = vpop.f32.mrb[10].mxu1  ;;  %v1262_v19 = vmax.f32 %v2788_v30, %v2790_v43 }
 0x373   : > { %v2796_v20 = vpop.f32.mrb[11].mxu1 }
 0x374   : > { %1263 = vmax.xlane.f32.xlu0 %v1262_v19  ;;  %v1265_v21 = vmax.f32 %v2792_v44, %v2796_v20 }
 0x376   : > { %1266 = vmax.xlane.f32.xlu1 %v1265_v21 }
 0x378   : > { %v2800_v22 = vpop.f32.mrb[12].mxu1 }
 0x379   : > { %v2802_v23 = vpop.f32.mrb[13].mxu1 }
 0x37a   : > { %v2804_v24 = vpop.f32.mrb[14].mxu1  ;;  %v1268_v55 = vmax.f32 %v2800_v22, %v2802_v23 }
 0x37b   : > { %v2808_v58 = vpop.f32.mrb[15].mxu1 }
 0x37c   : > { %1269 = vmax.xlane.f32.xlu0 %v1268_v55  ;;  %v1271_v54 = vmax.f32 %v2804_v24, %v2808_v58 }
 0x37e   : > { %1272 = vmax.xlane.f32.xlu1 %v1271_v54 }
 0x380   : > { %v2812_v57 = vpop.f32.mrb[16].mxu1 }
 0x381   : > { %v2814_v5 = vpop.f32.mrb[17].mxu1 }
 0x382   : > { %v2816_v4 = vpop.f32.mrb[18].mxu1  ;;  %v861_v7 = vpop.xlane.xlu1 %860  ;;  %v1274_v8 = vmax.f32 %v2812_v57, %v2814_v5 }
 0x383   : > { %v869_v25 = vmul.f32 0.003921569, %v861_v7  ;;  %v2820_v26 = vpop.f32.mrb[19].mxu1  ;;  %v858_v27 = vpop.xlane.xlu0 %857 }
 0x384   : > { %v868_v32 = vmul.f32 0.003921569, %v858_v27  ;;  %1275 = vmax.xlane.f32.xlu0 %v1274_v8  ;;  %v1277_v33 = vmax.f32 %v2816_v4, %v2820_v26 }
 0x385   : > { %v873_v34 = vadd.f32 1e-05, %v869_v25 }
 0x386   : > { %v872_v35 = vadd.f32 1e-05, %v868_v32  ;;  %1278 = vmax.xlane.f32.xlu1 %v1277_v33  ;;  %v867_v36 = vpop.xlane.xlu1 %866 }
 0x387   : > { %2256 = vrsqrt.f32 %v873_v34  ;;  %v871_v37 = vmul.f32 0.003921569, %v867_v36  ;;  %v864_v38 = vpop.xlane.xlu0 %863 }
 0x388   : > { %2258 = vrsqrt.f32 %v872_v35  ;;  %v870_v39 = vmul.f32 0.003921569, %v864_v38  ;;  %v2824_v42 = vpop.f32.mrb[20].mxu1 }
 0x389   : > { %v875_v45 = vadd.f32 1e-05, %v871_v37  ;;  %v2826_v46 = vpop.f32.mrb[21].mxu1 }
 0x38a   : > { %v874_v47 = vadd.f32 1e-05, %v870_v39  ;;  %v2828_v48 = vpop.f32.mrb[22].mxu1  ;;  %v1280_v49 = vmax.f32 %v2824_v42, %v2826_v46 }
 0x38b   : > { %2260 = vrsqrt.f32 %v875_v45  ;;  %v2832_v50 = vpop.f32.mrb[23].mxu1 }
 0x38c   : > { %2262 = vrsqrt.f32 %v874_v47  ;;  %1281 = vmax.xlane.f32.xlu0 %v1280_v49  ;;  %v1283_v51 = vmax.f32 %v2828_v48, %v2832_v50 }
 0x38e   : > { %1284 = vmax.xlane.f32.xlu1 %v1283_v51 }
 0x390   : > { %v2836_v52 = vpop.f32.mrb[24].mxu1 }
 0x391   : > { %v2257_v53 = vpop.eup %2256  ;;  %v2838_v56 = vpop.f32.mrb[25].mxu1 }
 0x392   : > { %v2259_v63 = vpop.eup %2258  ;;  %v2840_v0 = vpop.f32.mrb[26].mxu1  ;;  %v1286_v1 = vmax.f32 %v2836_v52, %v2838_v56  ;;  %v883_v2 = vmul.f32 %v2257_v53, %v2744_v60  ;;  %v882_v3 = vmul.f32 %v2257_v53, %v2742_v59 }
 0x393   : > { %v2846_v6 = vpop.f32.mrb[27].mxu1  ;;  %v881_v9 = vmul.f32 %v2259_v63, %v2748_v62  ;;  %v880_v10 = vmul.f32 %v2259_v63, %v2746_v61 }
 0x394   : > { %1287 = vmax.xlane.f32.xlu0 %v1286_v1  ;;  %v1289_v13 = vmax.f32 %v2840_v0, %v2846_v6 }
 0x395   : > { %v2261_v40 = vpop.eup %2260  ;;  %v895_v41 = vpack.c.bf16 %v883_v2, %v881_v9  ;;  %v894_v14 = vpack.c.bf16 %v882_v3, %v880_v10 }
 0x396   : > { %v2263_v15 = vpop.eup %2262  ;;  %1290 = vmax.xlane.f32.xlu1 %v1289_v13  ;;  %v887_v17 = vmul.f32 %v2261_v40, %v2762_v12  ;;  %v886_v60 = vmul.f32 %v2261_v40, %v2759_v11 }
 0x397   : > { %928 = vmatprep.subr.bf16.mxu0 %v895_v41  ;;  %v885_v59 = vmul.f32 %v2263_v15, %v2768_v28  ;;  %v884_v62 = vmul.f32 %v2263_v15, %v2765_v29 }
 0x398   : > { %929 = vmatpush1.bf16.msra.mxu0 %v894_v14  ;;  %v2856_v61 = vpop.f32.mrb[28].mxu1 }
 0x399   : > { %v2858_v31 = vpop.f32.mrb[29].mxu1  ;;  %v897_v18 = vpack.c.bf16 %v887_v17, %v885_v59  ;;  %v896_v19 = vpack.c.bf16 %v886_v60, %v884_v62 }
 0x39a   : > { %v2860_v21 = vpop.f32.mrb[30].mxu1  ;;  %v1292_v55 = vmax.f32 %v2856_v61, %v2858_v31 }
 0x39b   : > { %930 = vmatprep.subr.bf16.mxu0 %v897_v18  ;;  %v2864_v12 = vpop.f32.mrb[31].mxu1 }
 0x39c   : > { %1293 = vmax.xlane.f32.xlu0 %v1292_v55  ;;  %931 = vmatpush1.bf16.msra.mxu0 %v896_v19  ;;  %v1295_v11 = vmax.f32 %v2860_v21, %v2864_v12 }
 0x39e   : > { %1296 = vmax.xlane.f32.xlu1 %v1295_v11 }
 0x3a0   : > { %v2868_v29 = vpop.f32.mrb[32].mxu1 }
 0x3a1   : > { %v2870_v28 = vpop.f32.mrb[33].mxu1 }
 0x3a2   : > { %v2872_v54 = vpop.f32.mrb[34].mxu1  ;;  %v1298_v7 = vmax.f32 %v2868_v29, %v2870_v28 }
 0x3a3   : > { %v2876_v8 = vpop.f32.mrb[35].mxu1 }
 0x3a4   : > { %1299 = vmax.xlane.f32.xlu0 %v1298_v7  ;;  %v1301_v25 = vmax.f32 %v2872_v54, %v2876_v8 }
 0x3a6   : > { %1302 = vmax.xlane.f32.xlu1 %v1301_v25 }
 0x3a8   : > { %v2880_v27 = vpop.f32.mrb[36].mxu1 }
 0x3a9   : > { %v2882_v32 = vpop.f32.mrb[37].mxu1 }
 0x3aa   : > { %v2884_v33 = vpop.f32.mrb[38].mxu1  ;;  %v1304_v34 = vmax.f32 %v2880_v27, %v2882_v32 }
 0x3ab   : > { %v2888_v35 = vpop.f32.mrb[39].mxu1 }
 0x3ac   : > { %1305 = vmax.xlane.f32.xlu0 %v1304_v34  ;;  %v1307_v36 = vmax.f32 %v2884_v33, %v2888_v35 }
 0x3ae   : > { %1308 = vmax.xlane.f32.xlu1 %v1307_v36 }
 0x3b0   : > { %v2892_v37 = vpop.f32.mrb[40].mxu1 }
 0x3b1   : > { %v2894_v38 = vpop.f32.mrb[41].mxu1 }
 0x3b2   : > { %v2896_v39 = vpop.f32.mrb[42].mxu1  ;;  %v1310_v45 = vmax.f32 %v2892_v37, %v2894_v38 }
 0x3b3   : > { %v2900_v47 = vpop.f32.mrb[43].mxu1 }
 0x3b4   : > { %1311 = vmax.xlane.f32.xlu0 %v1310_v45  ;;  %v1313_v49 = vmax.f32 %v2896_v39, %v2900_v47 }
 0x3b6   : > { %1314 = vmax.xlane.f32.xlu1 %v1313_v49 }
 0x3b8   : > { %v2904_v51 = vpop.f32.mrb[44].mxu1 }
 0x3b9   : > { %v2906_v53 = vpop.f32.mrb[45].mxu1 }
 0x3ba   : > { %3538 = vst [vmem:[#allocation2_spill] sm:$0xff] %v2906_v53  ;;  %v2908_v63 = vpop.f32.mrb[46].mxu1  ;;  %v1316_v1 = vmax.f32 %v2904_v51, %v2906_v53 }
 0x3bb   : > { %3539 = vst [vmem:[#allocation3_spill] sm:$0xff] %v2908_v63  ;;  %v2912_v2 = vpop.f32.mrb[47].mxu1 }
 0x3bc   : > { %3540 = vst [vmem:[#allocation4_spill] sm:$0xff] %v2912_v2  ;;  %1317 = vmax.xlane.f32.xlu0 %v1316_v1  ;;  %v1319_v3 = vmax.f32 %v2908_v63, %v2912_v2 }
 0x3be   : > { %1320 = vmax.xlane.f32.xlu1 %v1319_v3 }
 0x3c0   : > { %v2916_v9 = vpop.f32.mrb[48].mxu1 }
 0x3c1   : > { %3541 = vst [vmem:[#allocation5_spill] sm:$0xff] %v2916_v9  ;;  %v2918_v10 = vpop.f32.mrb[49].mxu1 }
 0x3c2   : > { %3542 = vst [vmem:[#allocation6_spill] sm:$0xff] %v2918_v10  ;;  %v2920_v13 = vpop.f32.mrb[50].mxu1  ;;  %v1322_v40 = vmax.f32 %v2916_v9, %v2918_v10 }
 0x3c3   : > { %3543 = vst [vmem:[#allocation7_spill] sm:$0xff] %v2920_v13  ;;  %v2924_v41 = vpop.f32.mrb[51].mxu1 }
 0x3c4   : > { %3544 = vst [vmem:[#allocation8_spill] sm:$0xff] %v2924_v41  ;;  %1323 = vmax.xlane.f32.xlu0 %v1322_v40  ;;  %v1325_v14 = vmax.f32 %v2920_v13, %v2924_v41  ;;  %v890_v40 = vld [vmem:[%s3504_s8 + $0x10] sm:$0xff] }
 0x3c6   : > { %1326 = vmax.xlane.f32.xlu1 %v1325_v14 }
 0x3c8   : > { %v2928_v15 = vpop.f32.mrb[52].mxu1 }
 0x3c9   : > { %3545 = vst [vmem:[#allocation9_spill] sm:$0xff] %v2928_v15  ;;  %v2930_v17 = vpop.f32.mrb[53].mxu1 }
 0x3ca   : > { %3546 = vst [vmem:[#allocation10_spill] sm:$0xff] %v2930_v17  ;;  %v2932_v60 = vpop.f32.mrb[54].mxu1  ;;  %v1328_v59 = vmax.f32 %v2928_v15, %v2930_v17  ;;  %v3551_v15 = vmov 0  }
 0x3cb   : > { %3547 = vst [vmem:[#allocation11_spill] sm:$0xff] %v2932_v60  ;;  %v2936_v62 = vpop.f32.mrb[55].mxu1 }
 0x3cc   : > { %3548 = vst [vmem:[#allocation12_spill] sm:$0xff] %v2936_v62  ;;  %1329 = vmax.xlane.f32.xlu0 %v1328_v59  ;;  %v1331_v18 = vmax.f32 %v2932_v60, %v2936_v62  ;;  %v891_v60 = vld [vmem:[%s3504_s8 + $0x18] sm:$0xff] }
 0x3cd   : > { %v893_v41 = vpack.c.bf16 %v891_v60, %v890_v40 }
 0x3ce   : > { %1332 = vmax.xlane.f32.xlu1 %v1331_v18 }
 0x3d0   : > { %v2940_v19 = vpop.f32.mrb[56].mxu1 }
 0x3d1   : > { %v2942_v55 = vpop.f32.mrb[57].mxu1 }
 0x3d2   : > { %v2944_v11 = vpop.f32.mrb[58].mxu1 }
 0x3d3   : > { %3549 = vst [vmem:[#allocation13_spill] sm:$0xff] %v2944_v11  ;;  %v2948_v25 = vpop.f32.mrb[59].mxu1 }
 0x3d4   : > { %3550 = vst [vmem:[#allocation14_spill] sm:$0xff] %v2948_v25  ;;  %v1337_v34 = vmax.f32 %v2944_v11, %v2948_v25 }
 0x3d6   : > { %1338 = vmax.xlane.f32.xlu1 %v1337_v34  ;;  %v888_v34 = vld [vmem:[%s3504_s8] sm:$0xff] }
 0x3d7   : > { %v892_v17 = vpack.c.bf16 %v889_v16, %v888_v34 }
 0x3d8   : > { %v2952_v36 = vpop.f32.mrb[60].mxu1 }
 0x3d9   : > { %v2954_v45 = vpop.f32.mrb[61].mxu1  ;;  %2202 = vmatmul.mubr.msk.bf16.vlgmr.msra.gmra.mrb[8].mxu0 %vm607_vm0, %v892_v17 }
 0x3da   : > { %v2956_v49 = vpop.f32.mrb[62].mxu1  ;;  %970 = vmatprep.mubr.bf16.mxu0 %v3551_v15 }
 0x3db   : > { %v2960_v3 = vpop.f32.mrb[63].mxu1 }
 0x3e0   : > { %v2964_v14 = vpop.f32.mrb[64].mxu1 }
 0x3e1   : > { %v2966_v59 = vpop.f32.mrb[65].mxu1  ;;  %2203 = vmatmul.mubr.msk.bf16.gmra.mrb[12].mxu0 %vm607_vm0, %v893_v41 }
 0x3e2   : > { %v2968_v18 = vpop.f32.mrb[66].mxu1 }
 0x3e3   : > { %v2972_v7 = vpop.f32.mrb[67].mxu1 }
 0x3e8   : > { %v2976_v1 = vpop.f32.mrb[68].mxu1 }
 0x3e9   : > { %v2978_v25 = vpop.f32.mrb[69].mxu1 }
 0x3ea   : > { %v2980_v11 = vpop.f32.mrb[70].mxu1 }
 0x3eb   : > { %v2984_v62 = vpop.f32.mrb[71].mxu1 }
 0x401   : > { %v1264_v13 = vpop.xlane.xlu0 %1263 }
 0x402   : > { %v1358_v10 = vsub.f32 %v2788_v30, %v1264_v13  ;;  %v1359_v16 = vsub.f32 %v2790_v43, %v1264_v13 }
 0x403   : > { %v1267_v34 = vpop.xlane.xlu1 %1266 }
 0x404   : > { %v1422_v17 = vmul.f32 1.442695, %v1358_v10  ;;  %v1424_v9 = vmul.f32 1.442695, %v1359_v16  ;;  %v1360_v15 = vsub.f32 %v2792_v44, %v1267_v34  ;;  %v1361_v2 = vsub.f32 %v2796_v20, %v1267_v34 }
 0x406   : > { %2264 = vpow2.f32 %v1422_v17  ;;  %v1426_v63 = vmul.f32 1.442695, %v1360_v15  ;;  %v1428_v53 = vmul.f32 1.442695, %v1361_v2 }
 0x407   : > { %2266 = vpow2.f32 %v1424_v9 }
 0x408   : > { %2268 = vpow2.f32 %v1426_v63 }
 0x409   : > { %2270 = vpow2.f32 %v1428_v53  ;;  %v1270_v60 = vpop.xlane.xlu0 %1269 }
 0x40a   : > { %v1362_v41 = vsub.f32 %v2800_v22, %v1270_v60  ;;  %v1363_v30 = vsub.f32 %v2802_v23, %v1270_v60 }
 0x40b   : > { %v1273_v40 = vpop.xlane.xlu1 %1272 }
 0x40c   : > { %v1430_v43 = vmul.f32 1.442695, %v1362_v41  ;;  %v1432_v13 = vmul.f32 1.442695, %v1363_v30  ;;  %v1364_v10 = vsub.f32 %v2804_v24, %v1273_v40  ;;  %v1365_v44 = vsub.f32 %v2808_v58, %v1273_v40 }
 0x40e   : > { %2272 = vpow2.f32 %v1430_v43  ;;  %v1434_v20 = vmul.f32 1.442695, %v1364_v10  ;;  %v1436_v16 = vmul.f32 1.442695, %v1365_v44  ;;  %v3552_v43 = vmax.f32 %v2940_v19, %v2942_v55 }
 0x40f   : > { %2274 = vpow2.f32 %v1432_v13 }
 0x410   : > { %v3011_v2 = vpop.eup %2264  ;;  %2276 = vpow2.f32 %v1434_v20 }
 0x411   : > { %v3013_v53 = vpop.eup %2266  ;;  %2278 = vpow2.f32 %v1436_v16  ;;  %v1276_v22 = vpop.xlane.xlu0 %1275 }
 0x412   : > { %v3015_v63 = vpop.eup %2268  ;;  %v1366_v23 = vsub.f32 %v2812_v57, %v1276_v22  ;;  %v1367_v9 = vsub.f32 %v2814_v5, %v1276_v22  ;;  %v1550_v24 = vadd.f32 %v3013_v53, %v3011_v2  ;;  %v3553_v22 = vmax.f32 %v2956_v49, %v2960_v3 }
 0x413   : > { %v3021_v58 = vpop.eup %2270  ;;  %v1279_v15 = vpop.xlane.xlu1 %1278 }
 0x414   : > { %v1438_v34 = vmul.f32 1.442695, %v1366_v23  ;;  %v1440_v17 = vmul.f32 1.442695, %v1367_v9  ;;  %v1368_v60 = vsub.f32 %v2816_v4, %v1279_v15  ;;  %v1369_v41 = vsub.f32 %v2820_v26, %v1279_v15  ;;  %1551 = vadd.xlane.f32.xlu0 %v1550_v24 }
 0x415   : > { %v1553_v30 = vadd.f32 %v3021_v58, %v3015_v63 }
 0x416   : > { %2280 = vpow2.f32 %v1438_v34  ;;  %v1442_v57 = vmul.f32 1.442695, %v1368_v60  ;;  %v1444_v40 = vmul.f32 1.442695, %v1369_v41  ;;  %v3554_v41 = vmax.f32 %v2952_v36, %v2954_v45 }
 0x417   : > { %2282 = vpow2.f32 %v1440_v17  ;;  %1554 = vadd.xlane.f32.xlu1 %v1553_v30 }
 0x418   : > { %v3027_v5 = vpop.eup %2272  ;;  %2284 = vpow2.f32 %v1442_v57  ;;  %1335 = vmax.xlane.f32.xlu0 %v3552_v43 }
 0x419   : > { %v3032_v13 = vpop.eup %2274  ;;  %2286 = vpow2.f32 %v1444_v40  ;;  %v1282_v4 = vpop.xlane.xlu0 %1281 }
 0x41a   : > { %v3034_v26 = vpop.eup %2276  ;;  %v1370_v10 = vsub.f32 %v2824_v42, %v1282_v4  ;;  %v1371_v44 = vsub.f32 %v2826_v46, %v1282_v4  ;;  %v1556_v20 = vadd.f32 %v3032_v13, %v3027_v5 }
 0x41b   : > { %v3040_v16 = vpop.eup %2278  ;;  %1344 = vmax.xlane.f32.xlu1 %v3553_v22  ;;  %v1285_v23 = vpop.xlane.xlu1 %1284 }
 0x41c   : > { %v1446_v9 = vmul.f32 1.442695, %v1370_v10  ;;  %v1448_v24 = vmul.f32 1.442695, %v1371_v44  ;;  %v1372_v15 = vsub.f32 %v2828_v48, %v1285_v23  ;;  %v1373_v34 = vsub.f32 %v2832_v50, %v1285_v23  ;;  %1557 = vadd.xlane.f32.xlu0 %v1556_v20 }
 0x41d   : > { %v1559_v42 = vadd.f32 %v3040_v16, %v3034_v26  ;;  %v3555_v10 = vmax.f32 %v2968_v18, %v2972_v7 }
 0x41e   : > { %2288 = vpow2.f32 %v1446_v9  ;;  %v1450_v46 = vmul.f32 1.442695, %v1372_v15  ;;  %v1452_v17 = vmul.f32 1.442695, %v1373_v34  ;;  %v3556_v34 = vmax.f32 %v2964_v14, %v2966_v59 }
 0x41f   : > { %2290 = vpow2.f32 %v1448_v24  ;;  %1560 = vadd.xlane.f32.xlu1 %v1559_v42 }
 0x420   : > { %v3049_v60 = vpop.eup %2280  ;;  %2292 = vpow2.f32 %v1450_v46  ;;  %1341 = vmax.xlane.f32.xlu0 %v3554_v41 }
 0x421   : > { %v3054_v30 = vpop.eup %2282  ;;  %2294 = vpow2.f32 %v1452_v17  ;;  %v1288_v48 = vpop.xlane.xlu0 %1287 }
 0x422   : > { %v3056_v50 = vpop.eup %2284  ;;  %v1374_v57 = vsub.f32 %v2836_v52, %v1288_v48  ;;  %v1375_v40 = vsub.f32 %v2838_v56, %v1288_v48  ;;  %v1562_v43 = vadd.f32 %v3054_v30, %v3049_v60 }
 0x423   : > { %v3062_v4 = vpop.eup %2286  ;;  %1350 = vmax.xlane.f32.xlu1 %v3555_v10  ;;  %v1291_v44 = vpop.xlane.xlu1 %1290 }
 0x424   : > { %v1454_v20 = vmul.f32 1.442695, %v1374_v57  ;;  %v1456_v22 = vmul.f32 1.442695, %v1375_v40  ;;  %v1376_v23 = vsub.f32 %v2840_v0, %v1291_v44  ;;  %v1377_v9 = vsub.f32 %v2846_v6, %v1291_v44  ;;  %1563 = vadd.xlane.f32.xlu0 %v1562_v43 }
 0x425   : > { %v1565_v52 = vadd.f32 %v3062_v4, %v3056_v50  ;;  %v3557_v57 = vmax.f32 %v2980_v11, %v2984_v62 }
 0x426   : > { %2296 = vpow2.f32 %v1454_v20  ;;  %v1458_v56 = vmul.f32 1.442695, %v1376_v23  ;;  %v1460_v24 = vmul.f32 1.442695, %v1377_v9  ;;  %v3558_v9 = vmax.f32 %v2976_v1, %v2978_v25 }
 0x427   : > { %2298 = vpow2.f32 %v1456_v22  ;;  %1566 = vadd.xlane.f32.xlu1 %v1565_v52 }
 0x428   : > { %v3071_v15 = vpop.eup %2288  ;;  %2300 = vpow2.f32 %v1458_v56  ;;  %1347 = vmax.xlane.f32.xlu0 %v3556_v34 }
 0x429   : > { %v3076_v42 = vpop.eup %2290  ;;  %2302 = vpow2.f32 %v1460_v24  ;;  %v1294_v0 = vpop.xlane.xlu0 %1293 }
 0x42a   : > { %v3078_v6 = vpop.eup %2292  ;;  %v1378_v46 = vsub.f32 %v2856_v61, %v1294_v0  ;;  %v1379_v17 = vsub.f32 %v2858_v31, %v1294_v0  ;;  %v1568_v41 = vadd.f32 %v3076_v42, %v3071_v15 }
 0x42b   : > { %v3084_v48 = vpop.eup %2294  ;;  %1356 = vmax.xlane.f32.xlu1 %v3557_v57  ;;  %v1297_v40 = vpop.xlane.xlu1 %1296 }
 0x42c   : > { %v1462_v43 = vmul.f32 1.442695, %v1378_v46  ;;  %v1464_v10 = vmul.f32 1.442695, %v1379_v17  ;;  %v1380_v44 = vsub.f32 %v2860_v21, %v1297_v40  ;;  %v1381_v20 = vsub.f32 %v2864_v12, %v1297_v40  ;;  %1569 = vadd.xlane.f32.xlu0 %v1568_v41 }
 0x42d   : > { %v1571_v61 = vadd.f32 %v3084_v48, %v3078_v6 }
 0x42e   : > { %2304 = vpow2.f32 %v1462_v43  ;;  %v1466_v31 = vmul.f32 1.442695, %v1380_v44  ;;  %v1468_v22 = vmul.f32 1.442695, %v1381_v20 }
 0x42f   : > { %2306 = vpow2.f32 %v1464_v10  ;;  %1572 = vadd.xlane.f32.xlu1 %v1571_v61 }
 0x430   : > { %v3093_v23 = vpop.eup %2296  ;;  %2308 = vpow2.f32 %v1466_v31  ;;  %1353 = vmax.xlane.f32.xlu0 %v3558_v9 }
 0x431   : > { %v3098_v52 = vpop.eup %2298  ;;  %2310 = vpow2.f32 %v1468_v22  ;;  %v1300_v21 = vpop.xlane.xlu0 %1299 }
 0x432   : > { %v3100_v12 = vpop.eup %2300  ;;  %v1382_v56 = vsub.f32 %v2868_v29, %v1300_v21  ;;  %v1383_v24 = vsub.f32 %v2870_v28, %v1300_v21  ;;  %v1574_v34 = vadd.f32 %v3098_v52, %v3093_v23 }
 0x433   : > { %v3106_v0 = vpop.eup %2302  ;;  %v1303_v46 = vpop.xlane.xlu1 %1302 }
 0x434   : > { %v1470_v17 = vmul.f32 1.442695, %v1382_v56  ;;  %v1472_v41 = vmul.f32 1.442695, %v1383_v24  ;;  %v1384_v57 = vsub.f32 %v2872_v54, %v1303_v46  ;;  %v1385_v40 = vsub.f32 %v2876_v8, %v1303_v46  ;;  %1575 = vadd.xlane.f32.xlu0 %v1574_v34 }
 0x435   : > { %v1577_v43 = vadd.f32 %v3106_v0, %v3100_v12 }
 0x436   : > { %2312 = vpow2.f32 %v1470_v17  ;;  %v1474_v29 = vmul.f32 1.442695, %v1384_v57  ;;  %v1476_v10 = vmul.f32 1.442695, %v1385_v40 }
 0x437   : > { %2314 = vpow2.f32 %v1472_v41  ;;  %1578 = vadd.xlane.f32.xlu1 %v1577_v43 }
 0x438   : > { %v3112_v28 = vpop.eup %2304  ;;  %2316 = vpow2.f32 %v1474_v29 }
 0x439   : > { %v3114_v44 = vpop.eup %2306  ;;  %2318 = vpow2.f32 %v1476_v10  ;;  %v1306_v20 = vpop.xlane.xlu0 %1305 }
 0x43a   : > { %v3116_v61 = vpop.eup %2308  ;;  %v1386_v54 = vsub.f32 %v2880_v27, %v1306_v20  ;;  %v1387_v8 = vsub.f32 %v2882_v32, %v1306_v20  ;;  %v1580_v31 = vadd.f32 %v3114_v44, %v3112_v28 }
 0x43b   : > { %v3122_v22 = vpop.eup %2310  ;;  %v1309_v9 = vpop.xlane.xlu1 %1308 }
 0x43c   : > { %v1478_v21 = vmul.f32 1.442695, %v1386_v54  ;;  %v1480_v56 = vmul.f32 1.442695, %v1387_v8  ;;  %v1388_v24 = vsub.f32 %v2884_v33, %v1309_v9  ;;  %v1389_v34 = vsub.f32 %v2888_v35, %v1309_v9  ;;  %1581 = vadd.xlane.f32.xlu0 %v1580_v31 }
 0x43d   : > { %v1583_v46 = vadd.f32 %v3122_v22, %v3116_v61 }
 0x43e   : > { %2320 = vpow2.f32 %v1478_v21  ;;  %v1482_v27 = vmul.f32 1.442695, %v1388_v24  ;;  %v1484_v17 = vmul.f32 1.442695, %v1389_v34 }
 0x43f   : > { %2322 = vpow2.f32 %v1480_v56  ;;  %1584 = vadd.xlane.f32.xlu1 %v1583_v46 }
 0x440   : > { %v3128_v32 = vpop.eup %2312  ;;  %2324 = vpow2.f32 %v1482_v27 }
 0x441   : > { %v3130_v41 = vpop.eup %2314  ;;  %2326 = vpow2.f32 %v1484_v17  ;;  %v1312_v57 = vpop.xlane.xlu0 %1311 }
 0x442   : > { %v3132_v40 = vpop.eup %2316  ;;  %v1390_v33 = vsub.f32 %v2892_v37, %v1312_v57  ;;  %v1391_v35 = vsub.f32 %v2894_v38, %v1312_v57  ;;  %v1586_v43 = vadd.f32 %v3130_v41, %v3128_v32 }
 0x443   : > { %v3138_v29 = vpop.eup %2318  ;;  %v1315_v10 = vpop.xlane.xlu1 %1314 }
 0x444   : > { %v1486_v20 = vmul.f32 1.442695, %v1390_v33  ;;  %v1488_v54 = vmul.f32 1.442695, %v1391_v35  ;;  %v1392_v8 = vsub.f32 %v2896_v39, %v1315_v10  ;;  %v1393_v31 = vsub.f32 %v2900_v47, %v1315_v10  ;;  %1587 = vadd.xlane.f32.xlu0 %v1586_v43  ;;  %v3560_v47 = vld [vmem:[#allocation2_spill] sm:$0xff]  ;;  %v3561_v43 = vld [vmem:[#allocation3_spill] sm:$0xff] }
 0x445   : > { %v1589_v9 = vadd.f32 %v3138_v29, %v3132_v40 }
 0x446   : > { %2328 = vpow2.f32 %v1486_v20  ;;  %v1490_v37 = vmul.f32 1.442695, %v1392_v8  ;;  %v1492_v21 = vmul.f32 1.442695, %v1393_v31  ;;  %v3562_v20 = vld [vmem:[#allocation4_spill] sm:$0xff] }
 0x447   : > { %2330 = vpow2.f32 %v1488_v54  ;;  %1590 = vadd.xlane.f32.xlu1 %v1589_v9 }
 0x448   : > { %v3144_v38 = vpop.eup %2320  ;;  %2332 = vpow2.f32 %v1490_v37 }
 0x449   : > { %3559 = vst [vmem:[#allocation15_spill] sm:$0xff] %v3144_v38  ;;  %v3146_v56 = vpop.eup %2322  ;;  %2334 = vpow2.f32 %v1492_v21  ;;  %v1318_v24 = vpop.xlane.xlu0 %1317 }
 0x44a   : > { %v3148_v34 = vpop.eup %2324  ;;  %v1394_v39 = vsub.f32 %v2904_v51, %v1318_v24  ;;  %v1395_v46 = vsub.f32 %v3560_v47, %v1318_v24  ;;  %v1592_v27 = vadd.f32 %v3146_v56, %v3144_v38 }
 0x44b   : > { %v3154_v17 = vpop.eup %2326  ;;  %v1321_v57 = vpop.xlane.xlu1 %1320 }
 0x44c   : > { %v1494_v33 = vmul.f32 1.442695, %v1394_v39  ;;  %v1496_v35 = vmul.f32 1.442695, %v1395_v46  ;;  %v1396_v10 = vsub.f32 %v3561_v43, %v1321_v57  ;;  %v1397_v54 = vsub.f32 %v3562_v20, %v1321_v57  ;;  %1593 = vadd.xlane.f32.xlu0 %v1592_v27  ;;  %v3566_v39 = vld [vmem:[#allocation5_spill] sm:$0xff]  ;;  %v3567_v46 = vld [vmem:[#allocation6_spill] sm:$0xff] }
 0x44d   : > { %v1595_v8 = vadd.f32 %v3154_v17, %v3148_v34  ;;  %v3569_v20 = vld [vmem:[#allocation7_spill] sm:$0xff] }
 0x44e   : > { %2336 = vpow2.f32 %v1494_v33  ;;  %v1498_v51 = vmul.f32 1.442695, %v1396_v10  ;;  %v1500_v31 = vmul.f32 1.442695, %v1397_v54 }
 0x44f   : > { %2338 = vpow2.f32 %v1496_v35  ;;  %1596 = vadd.xlane.f32.xlu1 %v1595_v8  ;;  %v3570_v8 = vld [vmem:[#allocation8_spill] sm:$0xff] }
 0x450   : > { %v3160_v9 = vpop.eup %2328  ;;  %2340 = vpow2.f32 %v1498_v51 }
 0x451   : > { %3563 = vst [vmem:[#allocation2_spill] sm:$0xff] %v3160_v9  ;;  %v3162_v37 = vpop.eup %2330  ;;  %2342 = vpow2.f32 %v1500_v31  ;;  %v1324_v21 = vpop.xlane.xlu0 %1323 }
 0x452   : > { %3564 = vst [vmem:[#allocation3_spill] sm:$0xff] %v3162_v37  ;;  %v3164_v24 = vpop.eup %2332  ;;  %v1398_v47 = vsub.f32 %v3566_v39, %v1324_v21  ;;  %v1399_v27 = vsub.f32 %v3567_v46, %v1324_v21  ;;  %v1598_v57 = vadd.f32 %v3162_v37, %v3160_v9  ;;  %v3573_v9 = vld [vmem:[#allocation11_spill] sm:$0xff] }
 0x453   : > { %3565 = vst [vmem:[#allocation4_spill] sm:$0xff] %v3164_v24  ;;  %v3170_v33 = vpop.eup %2334  ;;  %v1327_v35 = vpop.xlane.xlu1 %1326 }
 0x454   : > { %3568 = vst [vmem:[#allocation5_spill] sm:$0xff] %v3170_v33  ;;  %v1502_v43 = vmul.f32 1.442695, %v1398_v47  ;;  %v1504_v10 = vmul.f32 1.442695, %v1399_v27  ;;  %v1400_v54 = vsub.f32 %v3569_v20, %v1327_v35  ;;  %v1401_v51 = vsub.f32 %v3570_v8, %v1327_v35  ;;  %1599 = vadd.xlane.f32.xlu0 %v1598_v57  ;;  %v3571_v20 = vld [vmem:[#allocation9_spill] sm:$0xff] }
 0x455   : > { %v1601_v31 = vadd.f32 %v3170_v33, %v3164_v24  ;;  %v3572_v57 = vld [vmem:[#allocation10_spill] sm:$0xff]  ;;  %v3574_v24 = vld [vmem:[#allocation12_spill] sm:$0xff] }
 0x456   : > { %2344 = vpow2.f32 %v1502_v43  ;;  %v1506_v39 = vmul.f32 1.442695, %v1400_v54  ;;  %v1508_v38 = vmul.f32 1.442695, %v1401_v51 }
 0x457   : > { %2346 = vpow2.f32 %v1504_v10  ;;  %1602 = vadd.xlane.f32.xlu1 %v1601_v31 }
 0x458   : > { %v3176_v21 = vpop.eup %2336  ;;  %2348 = vpow2.f32 %v1506_v39 }
 0x459   : > { %v3178_v46 = vpop.eup %2338  ;;  %2350 = vpow2.f32 %v1508_v38  ;;  %v1330_v47 = vpop.xlane.xlu0 %1329 }
 0x45a   : > { %v3180_v27 = vpop.eup %2340  ;;  %v1402_v35 = vsub.f32 %v3571_v20, %v1330_v47  ;;  %v1403_v8 = vsub.f32 %v3572_v57, %v1330_v47  ;;  %v1604_v43 = vadd.f32 %v3178_v46, %v3176_v21 }
 0x45b   : > { %v3186_v54 = vpop.eup %2342  ;;  %v1333_v10 = vpop.xlane.xlu1 %1332 }
 0x45c   : > { %v1510_v51 = vmul.f32 1.442695, %v1402_v35  ;;  %v1512_v31 = vmul.f32 1.442695, %v1403_v8  ;;  %v1404_v39 = vsub.f32 %v3573_v9, %v1333_v10  ;;  %v1405_v33 = vsub.f32 %v3574_v24, %v1333_v10  ;;  %1605 = vadd.xlane.f32.xlu0 %v1604_v43  ;;  %v3578_v43 = vld [vmem:[#allocation13_spill] sm:$0xff] }
 0x45d   : > { %v1607_v38 = vadd.f32 %v3186_v54, %v3180_v27 }
 0x45e   : > { %2352 = vpow2.f32 %v1510_v51  ;;  %v1514_v20 = vmul.f32 1.442695, %v1404_v39  ;;  %v1516_v37 = vmul.f32 1.442695, %v1405_v33  ;;  %v3579_v51 = vld [vmem:[#allocation14_spill] sm:$0xff] }
 0x45f   : > { %2354 = vpow2.f32 %v1512_v31  ;;  %1608 = vadd.xlane.f32.xlu1 %v1607_v38 }
 0x460   : > { %v3192_v47 = vpop.eup %2344  ;;  %2356 = vpow2.f32 %v1514_v20 }
 0x461   : > { %3575 = vst [vmem:[#allocation6_spill] sm:$0xff] %v3192_v47  ;;  %v3194_v57 = vpop.eup %2346  ;;  %2358 = vpow2.f32 %v1516_v37 }
 0x462   : > { %3576 = vst [vmem:[#allocation7_spill] sm:$0xff] %v3194_v57  ;;  %v3196_v35 = vpop.eup %2348  ;;  %v1610_v9 = vadd.f32 %v3194_v57, %v3192_v47 }
 0x463   : > { %3577 = vst [vmem:[#allocation8_spill] sm:$0xff] %v3196_v35  ;;  %v3200_v24 = vpop.eup %2350  ;;  %v1339_v8 = vpop.xlane.xlu1 %1338 }
 0x464   : > { %v1408_v10 = vsub.f32 %v3578_v43, %v1339_v8  ;;  %v1409_v33 = vsub.f32 %v3579_v51, %v1339_v8  ;;  %1611 = vadd.xlane.f32.xlu0 %v1610_v9  ;;  %v1613_v31 = vadd.f32 %v3200_v24, %v3196_v35 }
 0x466   : > { %v1522_v39 = vmul.f32 1.442695, %v1408_v10  ;;  %v1524_v38 = vmul.f32 1.442695, %v1409_v33  ;;  %1614 = vadd.xlane.f32.xlu1 %v1613_v31 }
 0x468   : > { %v3206_v37 = vpop.eup %2352  ;;  %2360 = vpow2.f32 %v1522_v39 }
 0x469   : > { %3580 = vst [vmem:[#allocation9_spill] sm:$0xff] %v3206_v37  ;;  %v3208_v20 = vpop.eup %2354  ;;  %2362 = vpow2.f32 %v1524_v38 }
 0x46a   : > { %3581 = vst [vmem:[#allocation10_spill] sm:$0xff] %v3208_v20  ;;  %v3210_v47 = vpop.eup %2356  ;;  %v1616_v43 = vadd.f32 %v3208_v20, %v3206_v37 }
 0x46b   : > { %3582 = vst [vmem:[#allocation11_spill] sm:$0xff] %v3210_v47  ;;  %v3214_v57 = vpop.eup %2358 }
 0x46c   : > { %3583 = vst [vmem:[#allocation12_spill] sm:$0xff] %v3214_v57  ;;  %1617 = vadd.xlane.f32.xlu0 %v1616_v43  ;;  %v1619_v9 = vadd.f32 %v3214_v57, %v3210_v47 }
 0x46e   : > { %1620 = vadd.xlane.f32.xlu1 %v1619_v9 }
 0x472   : > { %v3218_v8 = vpop.eup %2360 }
 0x473   : > { %3584 = vst [vmem:[#allocation13_spill] sm:$0xff] %v3218_v8  ;;  %v3220_v10 = vpop.eup %2362 }
 0x474   : > { %3585 = vst [vmem:[#allocation14_spill] sm:$0xff] %v3220_v10  ;;  %v1625_v51 = vadd.f32 %v3220_v10, %v3218_v8 }
 0x476   : > { %1626 = vadd.xlane.f32.xlu1 %v1625_v51 }
 0x4a1   : > { %v1552_v33 = vpop.xlane.xlu0 %1551 }
 0x4a2   : > { %2364 = vrcp.f32 %v1552_v33 }
 0x4a4   : > { %v1555_v31 = vpop.xlane.xlu1 %1554 }
 0x4a5   : > { %2366 = vrcp.f32 %v1555_v31  ;;  %v1336_v39 = vpop.xlane.xlu0 %1335 }
 0x4a6   : > { %v1406_v38 = vsub.f32 %v2940_v19, %v1336_v39  ;;  %v1407_v43 = vsub.f32 %v2942_v55, %v1336_v39 }
 0x4a8   : > { %v1518_v37 = vmul.f32 1.442695, %v1406_v38  ;;  %v1520_v47 = vmul.f32 1.442695, %v1407_v43  ;;  %v1345_v9 = vpop.xlane.xlu1 %1344 }
 0x4a9   : > { %v1412_v57 = vsub.f32 %v2956_v49, %v1345_v9  ;;  %v1413_v20 = vsub.f32 %v2960_v3, %v1345_v9  ;;  %v1558_v35 = vpop.xlane.xlu0 %1557 }
 0x4aa   : > { %2368 = vpow2.f32 %v1518_v37 }
 0x4ab   : > { %2370 = vpow2.f32 %v1520_v47  ;;  %v1530_v51 = vmul.f32 1.442695, %v1412_v57  ;;  %v1532_v8 = vmul.f32 1.442695, %v1413_v20 }
 0x4ac   : > { %v2365_v33 = vpop.eup %2364  ;;  %2372 = vrcp.f32 %v1558_v35  ;;  %v1561_v31 = vpop.xlane.xlu1 %1560 }
 0x4ad   : > { %2374 = vpow2.f32 %v1530_v51  ;;  %v1342_v10 = vpop.xlane.xlu0 %1341  ;;  %v1679_v49 = vmul.f32 %v2365_v33, %v3013_v53  ;;  %v1678_v3 = vmul.f32 %v2365_v33, %v3011_v2 }
 0x4ae   : > { %2376 = vpow2.f32 %v1532_v8  ;;  %v1410_v19 = vsub.f32 %v2952_v36, %v1342_v10  ;;  %v1411_v55 = vsub.f32 %v2954_v45, %v1342_v10 }
 0x4af   : > { %v2367_v39 = vpop.eup %2366  ;;  %2378 = vrcp.f32 %v1561_v31 }
 0x4b0   : > { %v1526_v37 = vmul.f32 1.442695, %v1410_v19  ;;  %v1528_v47 = vmul.f32 1.442695, %v1411_v55  ;;  %v1351_v57 = vpop.xlane.xlu1 %1350  ;;  %v1681_v20 = vmul.f32 %v2367_v39, %v3021_v58  ;;  %v1680_v35 = vmul.f32 %v2367_v39, %v3015_v63 }
 0x4b1   : > { %v1416_v38 = vsub.f32 %v2968_v18, %v1351_v57  ;;  %v1417_v8 = vsub.f32 %v2972_v7, %v1351_v57  ;;  %v1564_v36 = vpop.xlane.xlu0 %1563 }
 0x4b2   : > { %2380 = vpow2.f32 %v1526_v37  ;;  %v1747_v45 = vpack.c.bf16 %v1681_v20, %v1679_v49  ;;  %v1746_v10 = vpack.c.bf16 %v1680_v35, %v1678_v3 }
 0x4b3   : > { %2382 = vpow2.f32 %v1528_v47  ;;  %v1538_v43 = vmul.f32 1.442695, %v1416_v38  ;;  %v1540_v53 = vmul.f32 1.442695, %v1417_v8 }
 0x4b4   : > { %v3236_v9 = vpop.eup %2368  ;;  %2384 = vrcp.f32 %v1564_v36  ;;  %v1567_v2 = vpop.xlane.xlu1 %1566  ;;  %1778 = vmatprep.subr.bf16.mxu0 %v1747_v45 }
 0x4b5   : > { %v3238_v51 = vpop.eup %2370  ;;  %2386 = vpow2.f32 %v1538_v43  ;;  %1779 = vmatpush1.bf16.xpose.msra.mxu0 %v1746_v10  ;;  %v1348_v63 = vpop.xlane.xlu0 %1347 }
 0x4b6   : > { %v2373_v18 = vpop.eup %2372  ;;  %2388 = vpow2.f32 %v1540_v53  ;;  %v1414_v7 = vsub.f32 %v2964_v14, %v1348_v63  ;;  %v1415_v58 = vsub.f32 %v2966_v59, %v1348_v63  ;;  %v1622_v33 = vadd.f32 %v3238_v51, %v3236_v9 }
 0x4b7   : > { %v3244_v31 = vpop.eup %2374  ;;  %2390 = vrcp.f32 %v1567_v2  ;;  %v1683_v59 = vmul.f32 %v2373_v18, %v3032_v13  ;;  %v1682_v57 = vmul.f32 %v2373_v18, %v3027_v5 }
 0x4b8   : > { %v3246_v19 = vpop.eup %2376  ;;  %v1534_v55 = vmul.f32 1.442695, %v1414_v7  ;;  %v1536_v39 = vmul.f32 1.442695, %v1415_v58  ;;  %v3248_v49 = vpop.xlane.xlu1 %1356  ;;  %1623 = vadd.xlane.f32.xlu0 %v1622_v33 }
 0x4b9   : > { %v2379_v3 = vpop.eup %2378  ;;  %v1631_v37 = vadd.f32 %v3246_v19, %v3244_v31  ;;  %v1570_v14 = vpop.xlane.xlu0 %1569 }
 0x4ba   : > { %2392 = vpow2.f32 %v1534_v55  ;;  %v1685_v47 = vmul.f32 %v2379_v3, %v3040_v16  ;;  %v1684_v20 = vmul.f32 %v2379_v3, %v3034_v26 }
 0x4bb   : > { %2394 = vpow2.f32 %v1536_v39  ;;  %1632 = vadd.xlane.f32.xlu1 %v1631_v37 }
 0x4bc   : > { %v3256_v35 = vpop.eup %2380  ;;  %v1573_v38 = vpop.xlane.xlu1 %1572  ;;  %v1749_v8 = vpack.c.bf16 %v1685_v47, %v1683_v59  ;;  %v1748_v36 = vpack.c.bf16 %v1684_v20, %v1682_v57  ;;  %2396 = vrcp.f32 %v1570_v14 }
 0x4bd   : > { %v3258_v45 = vpop.eup %2382  ;;  %v1354_v10 = vpop.xlane.xlu0 %1353  ;;  %2398 = vrcp.f32 %v1573_v38 }
 0x4be   : > { %v2385_v43 = vpop.eup %2384  ;;  %1780 = vmatprep.subr.bf16.mxu0 %v1749_v8  ;;  %v1418_v13 = vsub.f32 %v2976_v1, %v1354_v10  ;;  %v1419_v16 = vsub.f32 %v2978_v25, %v1354_v10  ;;  %v1628_v5 = vadd.f32 %v3258_v45, %v3256_v35 }
 0x4bf   : > { %v3264_v26 = vpop.eup %2386  ;;  %1781 = vmatpush1.bf16.xpose.msra.mxu0 %v1748_v36  ;;  %v1687_v1 = vmul.f32 %v2385_v43, %v3054_v30  ;;  %v1686_v33 = vmul.f32 %v2385_v43, %v3049_v60 }
 0x4c0   : > { %v3266_v53 = vpop.eup %2388  ;;  %v1542_v2 = vmul.f32 1.442695, %v1418_v13  ;;  %v1544_v63 = vmul.f32 1.442695, %v1419_v16  ;;  %1629 = vadd.xlane.f32.xlu0 %v1628_v5 }
 0x4c1   : > { %v2391_v18 = vpop.eup %2390  ;;  %v1637_v7 = vadd.f32 %v3266_v53, %v3264_v26  ;;  %v1576_v58 = vpop.xlane.xlu0 %1575 }
 0x4c2   : > { %2400 = vpow2.f32 %v1542_v2  ;;  %v1689_v25 = vmul.f32 %v2391_v18, %v3062_v4  ;;  %v1688_v55 = vmul.f32 %v2391_v18, %v3056_v50 }
 0x4c3   : > { %2402 = vpow2.f32 %v1544_v63  ;;  %1638 = vadd.xlane.f32.xlu1 %v1637_v7  ;;  %v899_v63 = vld [vmem:[%s3505_s9 + $0x8] sm:$0xff]  ;;  %v3297_v7 = vpop.f32.mrb[8].mxu0 }
 0x4c4   : > { %v3274_v39 = vpop.eup %2392  ;;  %2404 = vrcp.f32 %v1576_v58  ;;  %v1579_v3 = vpop.xlane.xlu1 %1578  ;;  %v1751_v37 = vpack.c.bf16 %v1689_v25, %v1687_v1  ;;  %v1750_v14 = vpack.c.bf16 %v1688_v55, %v1686_v33 }
 0x4c5   : > { %v3276_v59 = vpop.eup %2394  ;;  %2406 = vrcp.f32 %v1579_v3  ;;  %v3299_v1 = vpop.f32.mrb[9].mxu0 }
 0x4c6   : > { %1782 = vmatprep.subr.bf16.mxu0 %v1751_v37  ;;  %v1634_v30 = vadd.f32 %v3276_v59, %v3274_v39  ;;  %v2397_v4 = vpop.eup %2396  ;;  %v3301_v33 = vpop.f32.mrb[10].mxu0 }
 0x4c7   : > { %1783 = vmatpush1.bf16.xpose.msra.mxu0 %v1750_v14  ;;  %v2399_v60 = vpop.eup %2398  ;;  %v1691_v47 = vmul.f32 %v2397_v4, %v3076_v42  ;;  %v1690_v20 = vmul.f32 %v2397_v4, %v3071_v15 }
 0x4c8   : > { %1635 = vadd.xlane.f32.xlu0 %v1634_v30  ;;  %v1693_v57 = vmul.f32 %v2399_v60, %v3084_v48  ;;  %v1692_v38 = vmul.f32 %v2399_v60, %v3078_v6 }
 0x4c9   : > { %v1582_v50 = vpop.xlane.xlu0 %1581 }
 0x4ca   : > { %2408 = vrcp.f32 %v1582_v50  ;;  %v1753_v10 = vpack.c.bf16 %v1693_v57, %v1691_v47  ;;  %v1752_v43 = vpack.c.bf16 %v1692_v38, %v1690_v20  ;;  %v1420_v20 = vsub.f32 %v2980_v11, %v3248_v49 }
 0x4cc   : > { %v3284_v8 = vpop.eup %2400  ;;  %v1585_v36 = vpop.xlane.xlu1 %1584  ;;  %1784 = vmatprep.subr.bf16.mxu0 %v1753_v10  ;;  %v1546_v11 = vmul.f32 1.442695, %v1420_v20 }
 0x4cd   : > { %v3286_v13 = vpop.eup %2402  ;;  %2410 = vrcp.f32 %v1585_v36 }
 0x4ce   : > { %v2405_v16 = vpop.eup %2404  ;;  %v1640_v42 = vadd.f32 %v3286_v13, %v3284_v8 }
 0x4cf   : > { %v2407_v5 = vpop.eup %2406  ;;  %1785 = vmatpush1.bf16.xpose.msra.mxu0 %v1752_v43  ;;  %v1695_v15 = vmul.f32 %v2405_v16, %v3098_v52  ;;  %v1694_v18 = vmul.f32 %v2405_v16, %v3093_v23  ;;  %v898_v16 = vld [vmem:[%s3505_s9] sm:$0xff] }
 0x4d0   : > { %1641 = vadd.xlane.f32.xlu0 %v1640_v42  ;;  %v1697_v6 = vmul.f32 %v2407_v5, %v3106_v0  ;;  %v1696_v48 = vmul.f32 %v2407_v5, %v3100_v12  ;;  %v3303_v0 = vpop.f32.mrb[11].mxu0 }
 0x4d1   : > { %v1588_v2 = vpop.xlane.xlu0 %1587 }
 0x4d2   : > { %v1755_v58 = vpack.c.bf16 %v1697_v6, %v1695_v15  ;;  %2412 = vrcp.f32 %v1588_v2  ;;  %v1754_v25 = vpack.c.bf16 %v1696_v48, %v1694_v18  ;;  %v3326_v15 = vpop.f32.mrb[12].mxu0  ;;  %v3586_v48 = vld [vmem:[#allocation15_spill] sm:$0xff] }
 0x4d4   : > { %909 = vperm.xlu1 %2239, %v899_v63   ;;  %v1591_v52 = vpop.xlane.xlu1 %1590  ;;  %1786 = vmatprep.subr.bf16.mxu0 %v1755_v58  ;;  %v2409_v12 = vpop.eup %2408 }
 0x4d5   : > { %2414 = vrcp.f32 %v1591_v52  ;;  %v1699_v23 = vmul.f32 %v2409_v12, %v3114_v44  ;;  %v1698_v30 = vmul.f32 %v2409_v12, %v3112_v28  ;;  %v1421_v28 = vsub.f32 %v2984_v62, %v3248_v49  ;;  %v901_v62 = vld [vmem:[%s3505_s9 + $0x18] sm:$0xff]  ;;  %v3329_v63 = vpop.f32.mrb[13].mxu0 }
 0x4d6   : > { %v3331_v58 = vpop.f32.mrb[14].mxu0 }
 0x4d7   : > { %v2411_v55 = vpop.eup %2410  ;;  %1787 = vmatpush1.bf16.xpose.msra.mxu0 %v1754_v25 }
 0x4d8   : > { %v1701_v3 = vmul.f32 %v2411_v55, %v3122_v22  ;;  %v1700_v37 = vmul.f32 %v2411_v55, %v3116_v61  ;;  %v1844_v55 = vld [vmem:[%s3507_s11 + $0x18] sm:$0xff] }
 0x4d9   : > { %v1594_v14 = vpop.xlane.xlu0 %1593 }
 0x4da   : > { %v1757_v4 = vpack.c.bf16 %v1701_v3, %v1699_v23  ;;  %2416 = vrcp.f32 %v1594_v14  ;;  %v1756_v60 = vpack.c.bf16 %v1700_v37, %v1698_v30  ;;  %v3587_v23 = vld [vmem:[#allocation3_spill] sm:$0xff]  ;;  %v3588_v37 = vld [vmem:[#allocation5_spill] sm:$0xff]  ;;  %v3589_v30 = vld [vmem:[#allocation4_spill] sm:$0xff] }
 0x4dc   : > { %v1597_v50 = vpop.xlane.xlu1 %1596  ;;  %1788 = vmatprep.subr.bf16.mxu0 %v1757_v4  ;;  %v2413_v47 = vpop.eup %2412 }
 0x4dd   : > { %2418 = vrcp.f32 %v1597_v50  ;;  %v1703_v44 = vmul.f32 %v2413_v47, %v3130_v41  ;;  %v1702_v36 = vmul.f32 %v2413_v47, %v3128_v32  ;;  %v3590_v50 = vld [vmem:[#allocation2_spill] sm:$0xff] }
 0x4df   : > { %v2415_v57 = vpop.eup %2414  ;;  %1789 = vmatpush1.bf16.xpose.msra.mxu0 %v1756_v60 }
 0x4e0   : > { %v1705_v22 = vmul.f32 %v2415_v57, %v3138_v29  ;;  %v1704_v61 = vmul.f32 %v2415_v57, %v3132_v40  ;;  %v1548_v29 = vmul.f32 1.442695, %v1421_v28 }
 0x4e1   : > { %v1600_v38 = vpop.xlane.xlu0 %1599 }
 0x4e2   : > { %v1759_v10 = vpack.c.bf16 %v1705_v22, %v1703_v44  ;;  %2420 = vrcp.f32 %v1600_v38  ;;  %v1758_v43 = vpack.c.bf16 %v1704_v61, %v1702_v36 }
 0x4e4   : > { %v1603_v42 = vpop.xlane.xlu1 %1602  ;;  %1790 = vmatprep.subr.bf16.mxu0 %v1759_v10  ;;  %v2417_v41 = vpop.eup %2416 }
 0x4e5   : > { %2422 = vrcp.f32 %v1603_v42  ;;  %v1707_v32 = vmul.f32 %v2417_v41, %v3146_v56  ;;  %v1706_v2 = vmul.f32 %v2417_v41, %v3586_v48  ;;  %v1842_v56 = vld [vmem:[%s3507_s11 + $0x8] sm:$0xff] }
 0x4e6   : > { %904 = vperm.xlu0 %2238, %v898_v16   ;;  %2424 = vpow2.f32 %v1546_v11 }
 0x4e7   : > { %v2419_v40 = vpop.eup %2418  ;;  %1791 = vmatpush1.bf16.xpose.msra.mxu0 %v1758_v43  ;;  %2426 = vpow2.f32 %v1548_v29 }
 0x4e8   : > { %v1709_v49 = vmul.f32 %v2419_v40, %v3154_v17  ;;  %v1708_v5 = vmul.f32 %v2419_v40, %v3148_v34  ;;  %v3336_v17 = vpop.f32.mrb[15].mxu0 }
 0x4e9   : > { %v1606_v6 = vpop.xlane.xlu0 %1605 }
 0x4ea   : > { %919 = vperm.xlu0 %2238, %v901_v62   ;;  %v1761_v18 = vpack.c.bf16 %v1709_v49, %v1707_v32  ;;  %2428 = vrcp.f32 %v1606_v6  ;;  %v1760_v25 = vpack.c.bf16 %v1708_v5, %v1706_v2  ;;  %v3591_v49 = vld [vmem:[#allocation7_spill] sm:$0xff]  ;;  %v3592_v6 = vld [vmem:[#allocation8_spill] sm:$0xff] }
 0x4ec   : > { %v1609_v34 = vpop.xlane.xlu1 %1608  ;;  %1792 = vmatprep.subr.bf16.mxu0 %v1761_v18  ;;  %v2421_v52 = vpop.eup %2420 }
 0x4ed   : > { %2430 = vrcp.f32 %v1609_v34  ;;  %v1711_v3 = vmul.f32 %v2421_v52, %v3587_v23  ;;  %v1710_v47 = vmul.f32 %v2421_v52, %v3590_v50  ;;  %v3594_v34 = vld [vmem:[#allocation10_spill] sm:$0xff]  ;;  %v3596_v23 = vld [vmem:[#allocation11_spill] sm:$0xff] }
 0x4ee   : > { %1852 = vperm.xlu0 %2238, %v1842_v56   ;;  %v900_v56 = vld [vmem:[%s3505_s9 + $0x10] sm:$0xff] }
 0x4ef   : > { %v2423_v12 = vpop.eup %2422  ;;  %1793 = vmatpush1.bf16.xpose.msra.mxu0 %v1760_v25 }
 0x4f0   : > { %v1713_v14 = vmul.f32 %v2423_v12, %v3588_v37  ;;  %v1712_v4 = vmul.f32 %v2423_v12, %v3589_v30  ;;  %v3345_v57 = vpop.eup %2424  ;;  %v3595_v12 = vld [vmem:[#allocation12_spill] sm:$0xff]  ;;  %v3597_v37 = vld [vmem:[#allocation9_spill] sm:$0xff]  ;;  %v1841_v30 = vld [vmem:[%s3507_s11] sm:$0xff] }
 0x4f1   : > { %v1612_v60 = vpop.xlane.xlu0 %1611  ;;  %v3347_v44 = vpop.eup %2426 }
 0x4f2   : > { %1862 = vperm.xlu0 %2238, %v1844_v55   ;;  %2432 = vrcp.f32 %v1612_v60  ;;  %v1763_v20 = vpack.c.bf16 %v1713_v14, %v1711_v3  ;;  %v1762_v61 = vpack.c.bf16 %v1712_v4, %v1710_v47  ;;  %v1643_v38 = vadd.f32 %v3347_v44, %v3345_v57  ;;  %v1843_v60 = vld [vmem:[%s3507_s11 + $0x10] sm:$0xff] }
 0x4f3   : > { %v1615_v22 = vpop.xlane.xlu1 %1614 }
 0x4f4   : > { %2434 = vrcp.f32 %v1615_v22  ;;  %1794 = vmatprep.subr.bf16.mxu0 %v1763_v20  ;;  %v2429_v28 = vpop.eup %2428 }
 0x4f5   : > { %v1715_v10 = vmul.f32 %v2429_v28, %v3178_v46  ;;  %v1714_v42 = vmul.f32 %v2429_v28, %v3176_v21 }
 0x4f7   : > { %v2431_v36 = vpop.eup %2430  ;;  %1795 = vmatpush1.bf16.xpose.msra.mxu0 %v1762_v61 }
 0x4f8   : > { %1644 = vadd.xlane.f32.xlu1 %v1643_v38  ;;  %v1717_v43 = vmul.f32 %v2431_v36, %v3186_v54  ;;  %v1716_v16 = vmul.f32 %v2431_v36, %v3180_v27  ;;  %v3593_v27 = vld [vmem:[#allocation6_spill] sm:$0xff] }
 0x4f9   : > { %v1618_v11 = vpop.xlane.xlu0 %1617 }
 0x4fa   : > { %2436 = vrcp.f32 %v1618_v11  ;;  %v1765_v41 = vpack.c.bf16 %v1717_v43, %v1715_v10  ;;  %v1764_v40 = vpack.c.bf16 %v1716_v16, %v1714_v42  ;;  %v3598_v10 = vld [vmem:[#allocation14_spill] sm:$0xff]  ;;  %v3599_v11 = vld [vmem:[#allocation13_spill] sm:$0xff] }
 0x4fb   : > { %v1621_v29 = vpop.xlane.xlu1 %1620 }
 0x4fc   : > { %v2433_v62 = vpop.eup %2432  ;;  %2438 = vrcp.f32 %v1621_v29  ;;  %1796 = vmatprep.subr.bf16.mxu0 %v1765_v41 }
 0x4fd   : > { %v1719_v5 = vmul.f32 %v2433_v62, %v3591_v49  ;;  %v1718_v2 = vmul.f32 %v2433_v62, %v3593_v27 }
 0x4fe   : > { %v2435_v32 = vpop.eup %2434 }
 0x4ff   : > { %1797 = vmatpush1.bf16.xpose.msra.mxu0 %v1764_v40  ;;  %v1721_v46 = vmul.f32 %v2435_v32, %v3200_v24  ;;  %v1720_v54 = vmul.f32 %v2435_v32, %v3592_v6 }
 0x501   : > { %v1767_v48 = vpack.c.bf16 %v1721_v46, %v1719_v5  ;;  %v1766_v21 = vpack.c.bf16 %v1720_v54, %v1718_v2 }
 0x503   : > { %1798 = vmatprep.subr.bf16.mxu0 %v1767_v48  ;;  %v1627_v50 = vpop.xlane.xlu1 %1626 }
 0x504   : > { %v2437_v18 = vpop.eup %2436  ;;  %2440 = vrcp.f32 %v1627_v50 }
 0x505   : > { %v1723_v52 = vmul.f32 %v2437_v18, %v3594_v34  ;;  %v1722_v14 = vmul.f32 %v2437_v18, %v3597_v37 }
 0x506   : > { %v2439_v25 = vpop.eup %2438 }
 0x507   : > { %1799 = vmatpush1.bf16.xpose.msra.mxu0 %v1766_v21  ;;  %v1725_v55 = vmul.f32 %v2439_v25, %v3595_v12  ;;  %v1724_v24 = vmul.f32 %v2439_v25, %v3596_v23 }
 0x509   : > { %914 = vperm.xlu1 %2239, %v900_v56   ;;  %v1769_v3 = vpack.c.bf16 %v1725_v55, %v1723_v52  ;;  %v1768_v4 = vpack.c.bf16 %v1724_v24, %v1722_v14 }
 0x50b   : > { %1800 = vmatprep.subr.bf16.mxu0 %v1769_v3 }
 0x50d   : > { %1847 = vperm.xlu1 %2239, %v1841_v30  }
 0x50e   : > { %v2441_v61 = vpop.eup %2440 }
 0x50f   : > { %1801 = vmatpush1.bf16.xpose.msra.mxu0 %v1768_v4  ;;  %v1729_v43 = vmul.f32 %v2441_v61, %v3598_v10  ;;  %v1728_v42 = vmul.f32 %v2441_v61, %v3599_v11  ;;  %v1834_v11 = vld [vmem:[%s3506_s10 + $0x18] sm:$0xff] }
 0x511   : > { %1857 = vperm.xlu1 %2239, %v1843_v60  }
 0x545   : > { %v1624_v47 = vpop.xlane.xlu0 %1623 }
 0x546   : > { %2442 = vrcp.f32 %v1624_v47 }
 0x548   : > { %v1633_v20 = vpop.xlane.xlu1 %1632 }
 0x549   : > { %2444 = vrcp.f32 %v1633_v20 }
 0x54d   : > { %v1630_v22 = vpop.xlane.xlu0 %1629 }
 0x54e   : > { %2446 = vrcp.f32 %v1630_v22 }
 0x550   : > { %v2443_v28 = vpop.eup %2442  ;;  %v1639_v38 = vpop.xlane.xlu1 %1638 }
 0x551   : > { %v1727_v36 = vmul.f32 %v2443_v28, %v3238_v51  ;;  %v1726_v16 = vmul.f32 %v2443_v28, %v3236_v9  ;;  %2448 = vrcp.f32 %v1639_v38  ;;  %v1831_v28 = vld [vmem:[%s3506_s10] sm:$0xff]  ;;  %v1832_v38 = vld [vmem:[%s3506_s10 + $0x8] sm:$0xff] }
 0x552   : > { %v1835_v10 = vpack.c.bf16 %v1832_v38, %v1831_v28 }
 0x553   : > { %v1771_v41 = vpack.c.bf16 %v1729_v43, %v1727_v36  ;;  %v1770_v29 = vpack.c.bf16 %v1728_v42, %v1726_v16  ;;  %v2445_v62 = vpop.eup %2444  ;;  %v3600_v43 = vmov 0   ;;  %v1833_v16 = vld [vmem:[%s3506_s10 + $0x10] sm:$0xff] }
 0x554   : > { %v1733_v5 = vmul.f32 %v2445_v62, %v3246_v19  ;;  %v1732_v46 = vmul.f32 %v2445_v62, %v3244_v31  ;;  %v910_v19 = vpop.permute.xlu1 %909  ;;  %v1836_v42 = vpack.c.bf16 %v1834_v11, %v1833_v16 }
 0x555   : > { %1802 = vmatprep.subr.bf16.mxu0 %v1771_v41  ;;  %v1636_v40 = vpop.xlane.xlu0 %1635  ;;  %v967_v56 = vadd.f32 %v3301_v33, %v910_v19  ;;  %v969_v34 = vadd.f32 %v3303_v0, %v910_v19 }
 0x556   : > { %2450 = vrcp.f32 %v1636_v40  ;;  %1803 = vmatpush1.bf16.xpose.msra.mxu0 %v1770_v29 }
 0x558   : > { %v2447_v32 = vpop.eup %2446 }
 0x559   : > { %v1731_v49 = vmul.f32 %v2447_v32, %v3258_v45  ;;  %v1730_v51 = vmul.f32 %v2447_v32, %v3256_v35 }
 0x55b   : > { %v1773_v9 = vpack.c.bf16 %v1733_v5, %v1731_v49  ;;  %v1772_v6 = vpack.c.bf16 %v1732_v46, %v1730_v51  ;;  %v2449_v54 = vpop.eup %2448 }
 0x55c   : > { %v1737_v21 = vmul.f32 %v2449_v54, %v3266_v53  ;;  %v1736_v45 = vmul.f32 %v2449_v54, %v3264_v26 }
 0x55d   : > { %1804 = vmatprep.subr.bf16.mxu0 %v1773_v9  ;;  %v1642_v27 = vpop.xlane.xlu0 %1641 }
 0x55e   : > { %1805 = vmatpush1.bf16.xpose.msra.mxu0 %v1772_v6  ;;  %2452 = vrcp.f32 %v1642_v27 }
 0x560   : > { %v2451_v48 = vpop.eup %2450 }
 0x561   : > { %v1735_v2 = vmul.f32 %v2451_v48, %v3276_v59  ;;  %v1734_v18 = vmul.f32 %v2451_v48, %v3274_v39 }
 0x563   : > { %v1775_v25 = vpack.c.bf16 %v1737_v21, %v1735_v2  ;;  %v1774_v35 = vpack.c.bf16 %v1736_v45, %v1734_v18 }
 0x565   : > { %1806 = vmatprep.subr.bf16.mxu0 %v1775_v25  ;;  %v905_v31 = vpop.permute.xlu0 %904 }
 0x566   : > { %v963_v52 = vadd.f32 %v3297_v7, %v905_v31  ;;  %v965_v12 = vadd.f32 %v3299_v1, %v905_v31  ;;  %1807 = vmatpush1.bf16.xpose.msra.mxu0 %v1774_v35  ;;  %v475_v31 = vld [vmem:[%s453_s17] sm:$0xff] }
 0x568   : > { %v1742_v59 = vpack.c.bf16 %v967_v56, %v963_v52  ;;  %v1743_v53 = vpack.c.bf16 %v969_v34, %v965_v12  ;;  %v2453_v1 = vpop.eup %2452  ;;  %v476_v56 = vld [vmem:[%s453_s17 + $0x8] sm:$0xff]  ;;  %v477_v12 = vld [vmem:[%s453_s17 + $0x10] sm:$0xff] }
 0x569   : > { %v920_v26 = vpop.permute.xlu0 %919  ;;  %v1739_v14 = vmul.f32 %v2453_v1, %v3286_v13  ;;  %v1738_v4 = vmul.f32 %v2453_v1, %v3284_v8 }
 0x56a   : > { %1810 = vmatprep.mubr.bf16.mxu0 %v1743_v53  ;;  %v977_v23 = vadd.f32 %v3331_v58, %v920_v26  ;;  %v979_v24 = vadd.f32 %v3336_v17, %v920_v26  ;;  %v479_v26 = vld [vmem:[%s453_s17 + $0x20] sm:$0xff] }
 0x56d   : > { %v1853_v32 = vpop.permute.xlu0 %1852 }
 0x571   : > { %v1863_v18 = vpop.permute.xlu0 %1862 }
 0x585   : > { %v1645_v39 = vpop.xlane.xlu1 %1644 }
 0x586   : > { %2454 = vrcp.f32 %v1645_v39  ;;  %v1924_v39 = vadd.f32 %v476_v56, %v475_v31 }
 0x589   : > { %v915_v55 = vpop.permute.xlu1 %914 }
 0x58a   : > { %v973_v33 = vadd.f32 %v3326_v15, %v915_v55  ;;  %v975_v0 = vadd.f32 %v3329_v63, %v915_v55  ;;  %v480_v55 = vld [vmem:[%s453_s17 + $0x28] sm:$0xff] }
 0x58c   : > { %v1744_v7 = vpack.c.bf16 %v977_v23, %v973_v33  ;;  %v1745_v3 = vpack.c.bf16 %v979_v24, %v975_v0  ;;  %v481_v24 = vld [vmem:[%s453_s17 + $0x30] sm:$0xff]  ;;  %v482_v33 = vld [vmem:[%s453_s17 + $0x38] sm:$0xff]  ;;  %v1930_v0 = vadd.f32 %v480_v55, %v479_v26 }
 0x58d   : > { %v1848_v41 = vpop.permute.xlu1 %1847 }
 0x590   : > { %v2455_v37 = vpop.eup %2454 }
 0x591   : > { %v1741_v30 = vmul.f32 %v2455_v37, %v3347_v44  ;;  %v1740_v60 = vmul.f32 %v2455_v37, %v3345_v57  ;;  %v1858_v48 = vpop.permute.xlu1 %1857 }
 0x593   : > { %v1777_v50 = vpack.c.bf16 %v1741_v30, %v1739_v14  ;;  %v1776_v58 = vpack.c.bf16 %v1740_v60, %v1738_v4 }
 0x595   : > { %1808 = vmatprep.subr.bf16.mxu0 %v1777_v50 }
 0x596   : > { %1809 = vmatpush1.bf16.xpose.msra.mxu0 %v1776_v58 }
 0x59d   : > { %1811 = vmatmul.mubr.bf16.vlgmr.msra.gmra.mrb[16].mxu0 %v1742_v59  ;;  %v478_v59 = vld [vmem:[%s453_s17 + $0x18] sm:$0xff] }
 0x59e   : > { %1820 = vmatprep.mubr.bf16.mxu0 %v1745_v3  ;;  %v1927_v23 = vadd.f32 %v478_v59, %v477_v12 }
 0x5a5   : > { %1821 = vmatmul.mubr.bf16.gmra.mrb[20].mxu0 %v1744_v7  ;;  %v1933_v7 = vadd.f32 %v482_v33, %v481_v24 }
 0x670   : > { %v1812_v15 = vpop.f32.mrb[16].mxu0 }
 0x671   : > { %v1814_v63 = vpop.f32.mrb[17].mxu0 }
 0x672   : > { %v1816_v17 = vpop.f32.mrb[18].mxu0 }
 0x673   : > { %v1837_v47 = vpack.c.bf16 %v1816_v17, %v1812_v15  ;;  %v1818_v20 = vpop.f32.mrb[19].mxu0 }
 0x674   : > { %v1838_v22 = vpack.c.bf16 %v1818_v20, %v1814_v63 }
 0x676   : > { %1871 = vmatprep.subr.bf16.mxu1 %v1838_v22 }
 0x677   : > { %1872 = vmatpush1.bf16.msra.mxu1 %v1837_v47 }
 0x678   : > { %v1822_v13 = vpop.f32.mrb[20].mxu0 }
 0x679   : > { %v1824_v44 = vpop.f32.mrb[21].mxu0 }
 0x67a   : > { %v1826_v8 = vpop.f32.mrb[22].mxu0 }
 0x67b   : > { %v1839_v61 = vpack.c.bf16 %v1826_v8, %v1822_v13  ;;  %v1828_v57 = vpop.f32.mrb[23].mxu0 }
 0x67c   : > { %v1840_v36 = vpack.c.bf16 %v1828_v57, %v1824_v44 }
 0x67e   : > { %1873 = vmatprep.subr.bf16.mxu1 %v1840_v36 }
 0x67f   : > { %1874 = vmatpush1.bf16.msra.mxu1 %v1839_v61 }
 0x682   : > { %2220 = vmatmul.mubr.msk.bf16.vlgmr.msra.gmra.mrb[72].mxu1 %vm607_vm0, %v1835_v10 }
 0x683   : > { %1913 = vmatprep.mubr.bf16.mxu1 %v3600_v43 }
 0x68a   : > { %2221 = vmatmul.mubr.msk.bf16.gmra.mrb[76].mxu1 %vm607_vm0, %v1836_v42 }
 0x755   : > { %v1905_v29 = vpop.f32.mrb[72].mxu1 }
 0x756   : > { %v1906_v40 = vadd.f32 %v1905_v29, %v1848_v41  ;;  %v1907_v62 = vpop.f32.mrb[73].mxu1 }
 0x757   : > { %v1908_v49 = vadd.f32 %v1907_v62, %v1848_v41  ;;  %v1909_v5 = vpop.f32.mrb[74].mxu1 }
 0x758   : > { %v1910_v51 = vadd.f32 %v1909_v5, %v1853_v32  ;;  %v1911_v46 = vpop.f32.mrb[75].mxu1 }
 0x759   : > { %v1976_v9 = vadd.f32 %v1908_v49, %v1906_v40  ;;  %v1912_v6 = vadd.f32 %v1911_v46, %v1853_v32 }
 0x75b   : > { %v1979_v54 = vadd.f32 %v1912_v6, %v1910_v51  ;;  %1977 = vadd.xlane.f32.xlu1 %v1976_v9 }
 0x75d   : > { %v1915_v27 = vpop.f32.mrb[76].mxu1  ;;  %1980 = vadd.xlane.f32.xlu0 %v1979_v54 }
 0x75e   : > { %v1916_v2 = vadd.f32 %v1915_v27, %v1858_v48  ;;  %v1917_v21 = vpop.f32.mrb[77].mxu1 }
 0x75f   : > { %v1918_v45 = vadd.f32 %v1917_v21, %v1858_v48  ;;  %v1919_v19 = vpop.f32.mrb[78].mxu1 }
 0x760   : > { %v1920_v25 = vadd.f32 %v1919_v19, %v1863_v18  ;;  %v1921_v35 = vpop.f32.mrb[79].mxu1 }
 0x761   : > { %v1982_v34 = vadd.f32 %v1918_v45, %v1916_v2  ;;  %v1922_v52 = vadd.f32 %v1921_v35, %v1863_v18 }
 0x763   : > { %v1985_v53 = vadd.f32 %v1922_v52, %v1920_v25  ;;  %1983 = vadd.xlane.f32.xlu0 %v1982_v34 }
 0x765   : > { %1986 = vadd.xlane.f32.xlu1 %v1985_v53 }
 0x767   : > { %1925 = vadd.xlane.f32.xlu0 %v1924_v39 }
 0x769   : > { %1928 = vadd.xlane.f32.xlu1 %v1927_v23 }
 0x76b   : > { %1931 = vadd.xlane.f32.xlu0 %v1930_v0 }
 0x76d   : > { %1934 = vadd.xlane.f32.xlu1 %v1933_v7 }
 0x7e8   : > { %v1978_v3 = vpop.xlane.xlu1 %1977 }
 0x7e9   : > { %v3415_v1 = vmul.f32 0.00390625, %v1978_v3 }
 0x7ea   : > { %v1981_v37 = vpop.xlane.xlu0 %1980 }
 0x7eb   : > { %v3417_v14 = vmul.f32 0.00390625, %v1981_v37  ;;  %v1992_v30 = vsub.f32 %v1906_v40, %v3415_v1  ;;  %v1993_v4 = vsub.f32 %v1908_v49, %v3415_v1 }
 0x7ed   : > { %v2000_v60 = vmul.f32 %v1992_v30, %v1992_v30  ;;  %v2001_v50 = vmul.f32 %v1993_v4, %v1993_v4  ;;  %v1994_v58 = vsub.f32 %v1910_v51, %v3417_v14  ;;  %v1995_v15 = vsub.f32 %v1912_v6, %v3417_v14 }
 0x7ef   : > { %v2008_v63 = vadd.f32 %v2001_v50, %v2000_v60  ;;  %v2002_v17 = vmul.f32 %v1994_v58, %v1994_v58  ;;  %v2003_v47 = vmul.f32 %v1995_v15, %v1995_v15 }
 0x7f0   : > { %v1984_v20 = vpop.xlane.xlu0 %1983 }
 0x7f1   : > { %v3423_v22 = vmul.f32 0.00390625, %v1984_v20  ;;  %2009 = vadd.xlane.f32.xlu0 %v2008_v63  ;;  %v2011_v13 = vadd.f32 %v2003_v47, %v2002_v17 }
 0x7f2   : > { %v1987_v44 = vpop.xlane.xlu1 %1986 }
 0x7f3   : > { %v3425_v8 = vmul.f32 0.00390625, %v1987_v44  ;;  %2012 = vadd.xlane.f32.xlu1 %v2011_v13  ;;  %v1996_v61 = vsub.f32 %v1916_v2, %v3423_v22  ;;  %v1997_v57 = vsub.f32 %v1918_v45, %v3423_v22 }
 0x7f4   : > { %v1926_v28 = vpop.xlane.xlu0 %1925 }
 0x7f5   : > { %v1936_v38 = vmul.f32 0.00390625, %v1926_v28  ;;  %v2004_v36 = vmul.f32 %v1996_v61, %v1996_v61  ;;  %v2005_v10 = vmul.f32 %v1997_v57, %v1997_v57  ;;  %v1998_v43 = vsub.f32 %v1920_v25, %v3425_v8 }
 0x7f6   : > { %v1929_v16 = vpop.xlane.xlu1 %1928  ;;  %v1999_v11 = vsub.f32 %v1922_v52, %v3425_v8 }
 0x7f7   : > { %v3431_v42 = vsub.f32 %v475_v31, %v1936_v38  ;;  %v3433_v41 = vsub.f32 %v476_v56, %v1936_v38  ;;  %v1937_v29 = vmul.f32 0.00390625, %v1929_v16  ;;  %v2014_v40 = vadd.f32 %v2005_v10, %v2004_v36 }
 0x7f8   : > { %v1932_v62 = vpop.xlane.xlu0 %1931  ;;  %v2006_v32 = vmul.f32 %v1998_v43, %v1998_v43  ;;  %v2007_v49 = vmul.f32 %v1999_v11, %v1999_v11 }
 0x7f9   : > { %v1948_v5 = vmul.f32 %v3431_v42, %v3431_v42  ;;  %v1949_v51 = vmul.f32 %v3433_v41, %v3433_v41  ;;  %v3439_v46 = vsub.f32 %v477_v12, %v1937_v29  ;;  %v3441_v9 = vsub.f32 %v478_v59, %v1937_v29  ;;  %2015 = vadd.xlane.f32.xlu0 %v2014_v40 }
 0x7fa   : > { %v1938_v6 = vmul.f32 0.00390625, %v1932_v62  ;;  %v1935_v54 = vpop.xlane.xlu1 %1934  ;;  %v2017_v48 = vadd.f32 %v2007_v49, %v2006_v32 }
 0x7fb   : > { %v1950_v27 = vmul.f32 %v3439_v46, %v3439_v46  ;;  %v1951_v2 = vmul.f32 %v3441_v9, %v3441_v9  ;;  %v1939_v21 = vmul.f32 0.00390625, %v1935_v54  ;;  %v1956_v18 = vadd.f32 %v1949_v51, %v1948_v5 }
 0x7fc   : > { %v3447_v45 = vsub.f32 %v479_v26, %v1938_v6  ;;  %v3449_v19 = vsub.f32 %v480_v55, %v1938_v6  ;;  %2018 = vadd.xlane.f32.xlu1 %v2017_v48 }
 0x7fd   : > { %v3451_v25 = vsub.f32 %v481_v24, %v1939_v21  ;;  %v3453_v35 = vsub.f32 %v482_v33, %v1939_v21  ;;  %1957 = vadd.xlane.f32.xlu0 %v1956_v18  ;;  %v1959_v31 = vadd.f32 %v1951_v2, %v1950_v27 }
 0x7fe   : > { %v1952_v56 = vmul.f32 %v3447_v45, %v3447_v45  ;;  %v1953_v34 = vmul.f32 %v3449_v19, %v3449_v19 }
 0x7ff   : > { %v1954_v52 = vmul.f32 %v3451_v25, %v3451_v25  ;;  %v1955_v12 = vmul.f32 %v3453_v35, %v3453_v35 }
 0x800   : > { %1960 = vadd.xlane.f32.xlu1 %v1959_v31  ;;  %v1962_v59 = vadd.f32 %v1953_v34, %v1952_v56 }
 0x801   : > { %v1965_v53 = vadd.f32 %v1955_v12, %v1954_v52 }
 0x802   : > { %1963 = vadd.xlane.f32.xlu0 %v1962_v59 }
 0x804   : > { %1966 = vadd.xlane.f32.xlu1 %v1965_v53 }
 0x87e   : > { %v2010_v39 = vpop.xlane.xlu0 %2009 }
 0x87f   : > { %v2020_v26 = vmul.f32 0.003921569, %v2010_v39 }
 0x880   : > { %v2013_v55 = vpop.xlane.xlu1 %2012 }
 0x881   : > { %v2024_v23 = vadd.f32 1e-05, %v2020_v26  ;;  %v2021_v24 = vmul.f32 0.003921569, %v2013_v55 }
 0x883   : > { %2456 = vrsqrt.f32 %v2024_v23  ;;  %v2025_v33 = vadd.f32 1e-05, %v2021_v24  ;;  %vm2030_vm1 = vcmp.eq.f32.partialorder %v2024_v23, inf  ;;  %v2033_v10 = vand.u32 2147483648, %v2024_v23 }
 0x884   : > { %vm2032_vm2 = vcmp.eq.f32.partialorder %v2024_v23, 0.0 }
 0x885   : > { %2458 = vrsqrt.f32 %v2025_v33  ;;  %vm2037_vm3 = vcmp.eq.f32.partialorder %v2025_v33, inf  ;;  %v2040_v32 = vand.u32 2147483648, %v2025_v33  ;;  %vm2039_vm5 = vcmp.eq.f32.partialorder %v2025_v33, 0.0 }
 0x886   : > { %v2016_v0 = vpop.xlane.xlu0 %2015 }
 0x887   : > { %v2022_v7 = vmul.f32 0.003921569, %v2016_v0 }
 0x889   : > { %v2026_v3 = vadd.f32 1e-05, %v2022_v7  ;;  %v2019_v37 = vpop.xlane.xlu1 %2018 }
 0x88a   : > { %v2023_v30 = vmul.f32 0.003921569, %v2019_v37  ;;  %v1958_v4 = vpop.xlane.xlu0 %1957 }
 0x88b   : > { %2460 = vrsqrt.f32 %v2026_v3  ;;  %v1968_v60 = vmul.f32 0.003921569, %v1958_v4  ;;  %vm2044_vm4 = vcmp.eq.f32.partialorder %v2026_v3, inf  ;;  %v2047_v5 = vand.u32 2147483648, %v2026_v3 }
 0x88c   : > { %v2027_v50 = vadd.f32 1e-05, %v2023_v30  ;;  %vm2046_vm6 = vcmp.eq.f32.partialorder %v2026_v3, 0.0 }
 0x88d   : > { %v2457_v58 = vpop.eup %2456  ;;  %v1972_v15 = vadd.f32 1e-05, %v1968_v60  ;;  %v1961_v63 = vpop.xlane.xlu1 %1960 }
 0x88e   : > { %v2029_v17 = vmul.f32 %v2457_v58, %v2024_v23  ;;  %2462 = vrsqrt.f32 %v2027_v50  ;;  %v1969_v20 = vmul.f32 0.003921569, %v1961_v63  ;;  %vm2051_vm7 = vcmp.eq.f32.partialorder %v2027_v50, inf }
 0x88f   : > { %v2459_v47 = vpop.eup %2458  ;;  %2464 = vrsqrt.f32 %v1972_v15  ;;  %v1964_v13 = vpop.xlane.xlu0 %1963  ;;  %v2054_v56 = vand.u32 2147483648, %v2027_v50  ;;  %vm2053_vm8 = vcmp.eq.f32.partialorder %v2027_v50, 0.0 }
 0x890   : > { %v1970_v44 = vmul.f32 0.003921569, %v1964_v13  ;;  %v1973_v61 = vadd.f32 1e-05, %v1969_v20  ;;  %v2036_v28 = vmul.f32 %v2459_v47, %v2025_v33  ;;  %v2031_v38 = vsel %vm2030_vm1, %v2024_v23, %v2029_v17 }
 0x891   : > { %v1967_v57 = vpop.xlane.xlu1 %1966  ;;  %v2034_v11 = vsel %vm2032_vm2, %v2033_v10, %v2031_v38 }
 0x892   : > { %v1974_v36 = vadd.f32 1e-05, %v1970_v44  ;;  %2466 = vrsqrt.f32 %v1973_v61  ;;  %v1971_v43 = vmul.f32 0.003921569, %v1967_v57  ;;  %v2038_v62 = vsel %vm2037_vm3, %v2025_v33, %v2036_v28 }
 0x893   : > { %v2056_v51 = vmul.f32 %v2034_v11, %v3431_v42  ;;  %v2057_v6 = vmul.f32 %v2034_v11, %v3433_v41  ;;  %v2041_v2 = vsel %vm2039_vm5, %v2040_v32, %v2038_v62 }
 0x894   : > { %2468 = vrsqrt.f32 %v1974_v36  ;;  %v1975_v29 = vadd.f32 1e-05, %v1971_v43  ;;  %v2058_v52 = vmul.f32 %v2041_v2, %v3439_v46  ;;  %v2059_v12 = vmul.f32 %v2041_v2, %v3441_v9 }
 0x895   : > { %v2461_v16 = vpop.eup %2460 }
 0x896   : > { %v2043_v40 = vmul.f32 %v2461_v16, %v2026_v3  ;;  %2470 = vrsqrt.f32 %v1975_v29 }
 0x898   : > { %v2463_v49 = vpop.eup %2462  ;;  %v2045_v54 = vsel %vm2044_vm4, %v2026_v3, %v2043_v40 }
 0x899   : > { %v2465_v48 = vpop.eup %2464  ;;  %v2050_v27 = vmul.f32 %v2463_v49, %v2027_v50  ;;  %v2048_v31 = vsel %vm2046_vm6, %v2047_v5, %v2045_v54 }
 0x89a   : > { %v2068_v21 = vmul.f32 %v2465_v48, %v2056_v51  ;;  %v2069_v18 = vmul.f32 %v2465_v48, %v2057_v6  ;;  %v2060_v53 = vmul.f32 %v2048_v31, %v3447_v45  ;;  %v2061_v39 = vmul.f32 %v2048_v31, %v3449_v19 }
 0x89b   : > { %v2052_v42 = vsel %vm2051_vm7, %v2027_v50, %v2050_v27 }
 0x89c   : > { %v2076_v41 = vadd.f32 %v2068_v21, %v3415_v1  ;;  %v2077_v34 = vadd.f32 %v2069_v18, %v3415_v1  ;;  %v2467_v59 = vpop.eup %2466  ;;  %v2055_v26 = vsel %vm2053_vm8, %v2054_v56, %v2052_v42 }
 0x89d   : > { %v2070_v23 = vmul.f32 %v2467_v59, %v2058_v52  ;;  %v2071_v24 = vmul.f32 %v2467_v59, %v2059_v12  ;;  %v2062_v45 = vmul.f32 %v2055_v26, %v3451_v25  ;;  %v2063_v19 = vmul.f32 %v2055_v26, %v3453_v35 }
 0x89e   : > { %v2469_v55 = vpop.eup %2468  ;;  %2084 = vst [vmem:[%s3469_s20] sm:$0xff] %v2076_v41  ;;  %2085 = vst [vmem:[%s3469_s20 + $0x8] sm:$0xff] %v2077_v34 }
 0x89f   : > { %v2072_v1 = vmul.f32 %v2469_v55, %v2060_v53  ;;  %v2073_v33 = vmul.f32 %v2469_v55, %v2061_v39  ;;  %v2078_v46 = vadd.f32 %v2070_v23, %v3417_v14  ;;  %v2079_v9 = vadd.f32 %v2071_v24, %v3417_v14 }
 0x8a0   : > { %v2471_v0 = vpop.eup %2470 }
 0x8a1   : > { %v2080_v7 = vadd.f32 %v2072_v1, %v3423_v22  ;;  %v2081_v3 = vadd.f32 %v2073_v33, %v3423_v22  ;;  %2086 = vst [vmem:[%s3469_s20 + $0x10] sm:$0xff] %v2078_v46  ;;  %2087 = vst [vmem:[%s3469_s20 + $0x18] sm:$0xff] %v2079_v9  ;;  %v2074_v37 = vmul.f32 %v2471_v0, %v2062_v45 }
 0x8a2   : > { %v2075_v30 = vmul.f32 %v2471_v0, %v2063_v19 }
 0x8a3   : > { %2088 = vst [vmem:[%s3469_s20 + $0x20] sm:$0xff] %v2080_v7  ;;  %2089 = vst [vmem:[%s3469_s20 + $0x28] sm:$0xff] %v2081_v3  ;;  %v2082_v4 = vadd.f32 %v2074_v37, %v3425_v8 }
 0x8a4   : > { %v2083_v60 = vadd.f32 %v2075_v30, %v3425_v8 }
 0x8a5   : > { %2090 = vst [vmem:[%s3469_s20 + $0x30] sm:$0xff] %v2082_v4 }
 0x8a6   : > { %2091 = vst [vmem:[%s3469_s20 + $0x38] sm:$0xff] %v2083_v60 }
 0x8a7 PF: > { %s22_s21 = sadd.s32 1, %s2478_s21  }
 0x8a8   : > { %p19_p4 = scmp.ge.s32.totalorder %s22_s21, 4  }
 0x8aa   :  { %21 = sbr.rel (!%p19_p4) target bundleno = 1 (0x1), region = 107 }

// kernel: transformer_forward.5
= control target key start
LH: loop header
LB: loop body
LE: loop exit
PB: predicated region body
PF: predicated region fallthrough
CT: control target
= control target key end

     0   :  { %s568_s12 = smov 0   ;;  %s727_s0 = inlined_call_operand.vmem [shape: f32[2,288,256], index: 0, kind: input, shape index: {}]   ;;  %s728_s1 = inlined_call_operand.vmem [shape: f32[32,288], index: 1, kind: input, shape index: {}]   ;;  %s729_s2 = inlined_call_operand.vmem [shape: f32[32,1], index: 2, kind: input, shape index: {}]   ;;  %s730_s3 = inlined_call_operand.vmem [shape: f32[2,32,256], index: 3, kind: output, shape index: {}]  }
   0x1 LB: > { %s498_s13 = sadd.s32 4294967295, %s545_s12   ;;  %p502_p0 = scmp.ge.s32.totalorder %s545_s12, 1  ;;  %s545_s12 = sphi %s568_s12, %s13_s12  }
   0x2   : > { %p137_p1 = scmp.lt.s32.totalorder %s545_s12, 3 }
   0x4   : > { %p138_p2 = pnand %p502_p0, %p137_p1 }
   0x5   : > { %p161_p3 = scmp.lt.s32.totalorder (!%p138_p2), %s498_s13, 1  ;;  %v173_v0 = vld [vmem:[%s728_s1 + $0x8] sm:$0xff] (!%p138_p2)  ;;  %v176_v1 = vld [vmem:[%s728_s1 + $0x20] sm:$0xff] (!%p138_p2)  ;;  %v547_v2 = vmov (!%p138_p2), 0   ;;  %v300_v5 = vld [vmem:[%s729_s2 + $0x10] sm:$0xff] (!%p138_p2)  ;;  %vm322_vm0 = vcmask (!%p138_p2), 261120  }
   0x6   : > { %141 = sbr.rel (%p138_p2) target bundleno = 312 (0x138), region = 32  ;;  %414 = vmatprep.mubr.bf16.mxu0 (!%p138_p2), %v547_v2  ;;  %v185_v3 = vpack.c.bf16 (!%p138_p2), %v176_v1, %v173_v0  ;;  %537 = vset.pattern.permute.xlu0 (!%p138_p2), %v547_v2  ;;  %v298_v4 = vld [vmem:[%s729_s2] sm:$0xff] (!%p138_p2)  ;;  %v299_v6 = vld [vmem:[%s729_s2 + $0x8] sm:$0xff] (!%p138_p2)  ;;  %v301_v7 = vld [vmem:[%s729_s2 + $0x18] sm:$0xff] (!%p138_p2) }
   0x7   : > { %538 = vset.pattern.permute.xlu1 (!%p138_p2), %v547_v2  ;;  %304 = vperm.xlu0 (!%p138_p2), %537, %v298_v4   ;;  %v174_v62 = vld [vmem:[%s728_s1 + $0x10] sm:$0xff] (!%p138_p2)  ;;  %v177_v63 = vld [vmem:[%s728_s1 + $0x28] sm:$0xff] (!%p138_p2) }
   0x8   : > { %361 = vmatprep.mubr.bf16.mxu1 (!%p138_p2), %v185_v3  ;;  %314 = vperm.xlu1 (!%p138_p2), %538, %v300_v5  }
   0xb   : > { %309 = vperm.xlu0 (!%p138_p2), %537, %v299_v6  }
   0xc   : > { %319 = vperm.xlu1 (!%p138_p2), %538, %v301_v7  }
   0xd   : > { %s732_s13 = smov (!%p161_p3, %s498_s13), 1 }
   0xe   : > { %s527_s18 = smul.u32 576, %s732_s13 }
  0x10   : > { %s597_s25 = scalar_lea.vmem %s727_s0, %s527_s18 }
  0x11   : > { %v191_v8 = vld [vmem:[%s597_s25 + $0x8] sm:$0xff]  ;;  %v193_v9 = vld [vmem:[%s597_s25 + $0x18] sm:$0xff]  ;;  %v190_v10 = vld [vmem:[%s597_s25] sm:$0xff] }
  0x12   : > { %v263_v11 = vpack.c.bf16 %v193_v9, %v191_v8  ;;  %v192_v12 = vld [vmem:[%s597_s25 + $0x10] sm:$0xff]  ;;  %v195_v13 = vld [vmem:[%s597_s25 + $0x28] sm:$0xff]  ;;  %v197_v14 = vld [vmem:[%s597_s25 + $0x38] sm:$0xff]  ;;  %v186_v8 = vpack.c.bf16 %v177_v63, %v174_v62 }
  0x13   : > { %v262_v15 = vpack.c.bf16 %v192_v12, %v190_v10  ;;  %v265_v16 = vpack.c.bf16 %v197_v14, %v195_v13  ;;  %v194_v17 = vld [vmem:[%s597_s25 + $0x20] sm:$0xff]  ;;  %v196_v18 = vld [vmem:[%s597_s25 + $0x30] sm:$0xff]  ;;  %v199_v19 = vld [vmem:[%s597_s25 + $0x48] sm:$0xff] }
  0x14   : > { %329 = vmatprep.subr.bf16.mxu1 %v263_v11  ;;  %v201_v20 = vld [vmem:[%s597_s25 + $0x58] sm:$0xff]  ;;  %v264_v21 = vpack.c.bf16 %v196_v18, %v194_v17  ;;  %v198_v23 = vld [vmem:[%s597_s25 + $0x40] sm:$0xff]  ;;  %v200_v24 = vld [vmem:[%s597_s25 + $0x50] sm:$0xff] }
  0x15   : > { %330 = vmatpush1.bf16.msra.mxu1 %v262_v15  ;;  %v267_v22 = vpack.c.bf16 %v201_v20, %v199_v19  ;;  %v203_v25 = vld [vmem:[%s597_s25 + $0x68] sm:$0xff]  ;;  %v205_v26 = vld [vmem:[%s597_s25 + $0x78] sm:$0xff]  ;;  %v266_v27 = vpack.c.bf16 %v200_v24, %v198_v23  ;;  %v202_v29 = vld [vmem:[%s597_s25 + $0x60] sm:$0xff] }
  0x16   : > { %331 = vmatprep.subr.bf16.mxu1 %v265_v16  ;;  %v269_v28 = vpack.c.bf16 %v205_v26, %v203_v25  ;;  %v204_v30 = vld [vmem:[%s597_s25 + $0x70] sm:$0xff]  ;;  %v207_v31 = vld [vmem:[%s597_s25 + $0x88] sm:$0xff]  ;;  %v209_v32 = vld [vmem:[%s597_s25 + $0x98] sm:$0xff] }
  0x17   : > { %v268_v33 = vpack.c.bf16 %v204_v30, %v202_v29  ;;  %v271_v34 = vpack.c.bf16 %v209_v32, %v207_v31  ;;  %v206_v35 = vld [vmem:[%s597_s25 + $0x80] sm:$0xff]  ;;  %v208_v36 = vld [vmem:[%s597_s25 + $0x90] sm:$0xff]  ;;  %v211_v37 = vld [vmem:[%s597_s25 + $0xa8] sm:$0xff] }
  0x18   : > { %v213_v38 = vld [vmem:[%s597_s25 + $0xb8] sm:$0xff]  ;;  %v270_v39 = vpack.c.bf16 %v208_v36, %v206_v35  ;;  %v210_v41 = vld [vmem:[%s597_s25 + $0xa0] sm:$0xff]  ;;  %v212_v42 = vld [vmem:[%s597_s25 + $0xb0] sm:$0xff] }
  0x19   : > { %332 = vmatpush1.bf16.msra.mxu1 %v264_v21  ;;  %v273_v40 = vpack.c.bf16 %v213_v38, %v211_v37  ;;  %v215_v43 = vld [vmem:[%s597_s25 + $0xc8] sm:$0xff]  ;;  %v217_v44 = vld [vmem:[%s597_s25 + $0xd8] sm:$0xff]  ;;  %v272_v47 = vpack.c.bf16 %v212_v42, %v210_v41  ;;  %v214_v48 = vld [vmem:[%s597_s25 + $0xc0] sm:$0xff] }
  0x1a   : > { %333 = vmatprep.subr.bf16.mxu1 %v267_v22  ;;  %v255_v45 = vld [vmem:[%s597_s25 + $0x208] sm:$0xff]  ;;  %v257_v46 = vld [vmem:[%s597_s25 + $0x218] sm:$0xff]  ;;  %v254_v50 = vld [vmem:[%s597_s25 + $0x200] sm:$0xff]  ;;  %v275_v52 = vpack.c.bf16 %v217_v44, %v215_v43 }
  0x1b   : > { %v295_v49 = vpack.c.bf16 %v257_v46, %v255_v45  ;;  %v256_v51 = vld [vmem:[%s597_s25 + $0x210] sm:$0xff]  ;;  %v259_v55 = vld [vmem:[%s597_s25 + $0x228] sm:$0xff]  ;;  %v261_v56 = vld [vmem:[%s597_s25 + $0x238] sm:$0xff] }
  0x1c   : > { %v216_v53 = vld [vmem:[%s597_s25 + $0xd0] sm:$0xff]  ;;  %v294_v54 = vpack.c.bf16 %v256_v51, %v254_v50  ;;  %v219_v57 = vld [vmem:[%s597_s25 + $0xe8] sm:$0xff]  ;;  %v221_v58 = vld [vmem:[%s597_s25 + $0xf8] sm:$0xff]  ;;  %v297_v59 = vpack.c.bf16 %v261_v56, %v259_v55 }
  0x1d   : > { %334 = vmatpush1.bf16.msra.mxu1 %v266_v27  ;;  %382 = vmatprep.subr.bf16.mxu0 %v295_v49  ;;  %v258_v60 = vld [vmem:[%s597_s25 + $0x220] sm:$0xff]  ;;  %v260_v61 = vld [vmem:[%s597_s25 + $0x230] sm:$0xff]  ;;  %v274_v0 = vpack.c.bf16 %v216_v53, %v214_v48  ;;  %v277_v3 = vpack.c.bf16 %v221_v58, %v219_v57  ;;  %v223_v6 = vld [vmem:[%s597_s25 + $0x108] sm:$0xff] }
  0x1e   : > { %335 = vmatprep.subr.bf16.mxu1 %v269_v28  ;;  %383 = vmatpush1.bf16.msra.mxu0 %v294_v54  ;;  %v296_v1 = vpack.c.bf16 %v260_v61, %v258_v60  ;;  %v218_v4 = vld [vmem:[%s597_s25 + $0xe0] sm:$0xff]  ;;  %v220_v5 = vld [vmem:[%s597_s25 + $0xf0] sm:$0xff]  ;;  %v225_v7 = vld [vmem:[%s597_s25 + $0x118] sm:$0xff] }
  0x1f   : > { %384 = vmatprep.subr.bf16.mxu0 %v297_v59  ;;  %v276_v9 = vpack.c.bf16 %v220_v5, %v218_v4  ;;  %v279_v10 = vpack.c.bf16 %v225_v7, %v223_v6  ;;  %v222_v11 = vld [vmem:[%s597_s25 + $0x100] sm:$0xff]  ;;  %v224_v12 = vld [vmem:[%s597_s25 + $0x110] sm:$0xff]  ;;  %v227_v13 = vld [vmem:[%s597_s25 + $0x128] sm:$0xff] }
  0x20   : > { %v229_v14 = vld [vmem:[%s597_s25 + $0x138] sm:$0xff]  ;;  %v180_v15 = vld [vmem:[%s728_s1 + $0x40] sm:$0xff]  ;;  %v278_v17 = vpack.c.bf16 %v224_v12, %v222_v11  ;;  %v228_v20 = vld [vmem:[%s597_s25 + $0x130] sm:$0xff] }
  0x21   : > { %336 = vmatpush1.bf16.msra.mxu1 %v268_v33  ;;  %v183_v16 = vld [vmem:[%s728_s1 + $0x58] sm:$0xff]  ;;  %v281_v18 = vpack.c.bf16 %v229_v14, %v227_v13  ;;  %v226_v19 = vld [vmem:[%s597_s25 + $0x120] sm:$0xff]  ;;  %v231_v21 = vld [vmem:[%s597_s25 + $0x148] sm:$0xff] }
  0x22   : > { %337 = vmatprep.subr.bf16.mxu1 %v271_v34  ;;  %385 = vmatpush1.bf16.msra.mxu0 %v296_v1  ;;  %v189_v22 = vpack.c.bf16 %v183_v16, %v180_v15  ;;  %v280_v23 = vpack.c.bf16 %v228_v20, %v226_v19  ;;  %v230_v25 = vld [vmem:[%s597_s25 + $0x140] sm:$0xff]  ;;  %v232_v26 = vld [vmem:[%s597_s25 + $0x150] sm:$0xff]  ;;  %v235_v27 = vld [vmem:[%s597_s25 + $0x168] sm:$0xff] }
  0x23   : > { %v237_v28 = vld [vmem:[%s597_s25 + $0x178] sm:$0xff]  ;;  %v282_v29 = vpack.c.bf16 %v232_v26, %v230_v25  ;;  %v234_v31 = vld [vmem:[%s597_s25 + $0x160] sm:$0xff]  ;;  %v236_v32 = vld [vmem:[%s597_s25 + $0x170] sm:$0xff] }
  0x24   : > { %v285_v30 = vpack.c.bf16 %v237_v28, %v235_v27  ;;  %v239_v33 = vld [vmem:[%s597_s25 + $0x188] sm:$0xff]  ;;  %v241_v34 = vld [vmem:[%s597_s25 + $0x198] sm:$0xff]  ;;  %v284_v35 = vpack.c.bf16 %v236_v32, %v234_v31  ;;  %v238_v37 = vld [vmem:[%s597_s25 + $0x180] sm:$0xff] }
  0x25   : > { %338 = vmatpush1.bf16.msra.mxu1 %v270_v39  ;;  %506 = vmatmul.mubr.msk.bf16.vlgmr.msra.gmra.mrb[0].mxu0 %vm322_vm0, %v186_v8  ;;  %v287_v36 = vpack.c.bf16 %v241_v34, %v239_v33  ;;  %v240_v38 = vld [vmem:[%s597_s25 + $0x190] sm:$0xff]  ;;  %v243_v39 = vld [vmem:[%s597_s25 + $0x1a8] sm:$0xff]  ;;  %v242_v43 = vld [vmem:[%s597_s25 + $0x1a0] sm:$0xff] }
  0x26   : > { %339 = vmatprep.subr.bf16.mxu1 %v273_v40  ;;  %424 = vmatprep.mubr.bf16.mxu0 %v547_v2  ;;  %v233_v2 = vld [vmem:[%s597_s25 + $0x158] sm:$0xff]  ;;  %v286_v41 = vpack.c.bf16 %v240_v38, %v238_v37  ;;  %v244_v44 = vld [vmem:[%s597_s25 + $0x1b0] sm:$0xff]  ;;  %v247_v45 = vld [vmem:[%s597_s25 + $0x1c8] sm:$0xff] }
  0x27   : > { %v283_v24 = vpack.c.bf16 %v233_v2, %v231_v21  ;;  %v245_v40 = vld [vmem:[%s597_s25 + $0x1b8] sm:$0xff]  ;;  %v246_v49 = vld [vmem:[%s597_s25 + $0x1c0] sm:$0xff]  ;;  %v248_v50 = vld [vmem:[%s597_s25 + $0x1d0] sm:$0xff] }
  0x28   : > { %v289_v42 = vpack.c.bf16 %v245_v40, %v243_v39  ;;  %v249_v46 = vld [vmem:[%s597_s25 + $0x1d8] sm:$0xff]  ;;  %v251_v51 = vld [vmem:[%s597_s25 + $0x1e8] sm:$0xff]  ;;  %v290_v53 = vpack.c.bf16 %v248_v50, %v246_v49  ;;  %v250_v55 = vld [vmem:[%s597_s25 + $0x1e0] sm:$0xff] }
  0x29   : > { %340 = vmatpush1.bf16.msra.mxu1 %v272_v47  ;;  %v288_v47 = vpack.c.bf16 %v244_v44, %v242_v43  ;;  %v291_v48 = vpack.c.bf16 %v249_v46, %v247_v45  ;;  %v252_v56 = vld [vmem:[%s597_s25 + $0x1f0] sm:$0xff]  ;;  %v172_v58 = vld [vmem:[%s728_s1] sm:$0xff]  ;;  %v175_v59 = vld [vmem:[%s728_s1 + $0x18] sm:$0xff] }
  0x2a   : > { %341 = vmatprep.subr.bf16.mxu1 %v275_v52  ;;  %v253_v52 = vld [vmem:[%s597_s25 + $0x1f8] sm:$0xff]  ;;  %v292_v57 = vpack.c.bf16 %v252_v56, %v250_v55  ;;  %v182_v61 = vld [vmem:[%s728_s1 + $0x50] sm:$0xff]  ;;  %v184_v62 = vpack.c.bf16 %v175_v59, %v172_v58  ;;  %v181_v1 = vld [vmem:[%s728_s1 + $0x48] sm:$0xff]  ;;  %s510_s25 = sshll.u32 %s732_s13, 6 }
  0x2b   : > { %v293_v54 = vpack.c.bf16 %v253_v52, %v251_v51  ;;  %v179_v60 = vld [vmem:[%s728_s1 + $0x38] sm:$0xff]  ;;  %s714_s28 = scalar_lea.vmem %s730_s3, %s510_s25 }
  0x2c   : > { %v188_v63 = vpack.c.bf16 %v182_v61, %v179_v60 }
  0x2d   : > { %342 = vmatpush1.bf16.msra.mxu1 %v274_v0  ;;  %507 = vmatmul.mubr.msk.bf16.gmra.mrb[4].mxu0 %vm322_vm0, %v189_v22  ;;  %v178_v0 = vld [vmem:[%s728_s1 + $0x30] sm:$0xff] }
  0x2e   : > { %343 = vmatprep.subr.bf16.mxu1 %v277_v3  ;;  %v187_v3 = vpack.c.bf16 %v181_v1, %v178_v0 }
  0x31   : > { %344 = vmatpush1.bf16.msra.mxu1 %v276_v9 }
  0x32   : > { %345 = vmatprep.subr.bf16.mxu1 %v279_v10 }
  0x35   : > { %346 = vmatpush1.bf16.msra.mxu1 %v278_v17 }
  0x36   : > { %347 = vmatprep.subr.bf16.mxu1 %v281_v18 }
  0x39   : > { %348 = vmatpush1.bf16.msra.mxu1 %v280_v23 }
  0x3a   : > { %349 = vmatprep.subr.bf16.mxu1 %v283_v24 }
  0x3d   : > { %350 = vmatpush1.bf16.msra.mxu1 %v282_v29 }
  0x3e   : > { %351 = vmatprep.subr.bf16.mxu1 %v285_v30 }
  0x41   : > { %352 = vmatpush1.bf16.msra.mxu1 %v284_v35 }
  0x42   : > { %353 = vmatprep.subr.bf16.mxu1 %v287_v36 }
  0x45   : > { %354 = vmatpush1.bf16.msra.mxu1 %v286_v41 }
  0x46   : > { %355 = vmatprep.subr.bf16.mxu1 %v289_v42 }
  0x49   : > { %356 = vmatpush1.bf16.msra.mxu1 %v288_v47 }
  0x4a   : > { %357 = vmatprep.subr.bf16.mxu1 %v291_v48 }
  0x4d   : > { %358 = vmatpush1.bf16.msra.mxu1 %v290_v53 }
  0x4e   : > { %359 = vmatprep.subr.bf16.mxu1 %v293_v54 }
  0x51   : > { %360 = vmatpush1.bf16.msra.mxu1 %v292_v57 }
  0x54   : > { %362 = vmatmul.mubr.bf16.vlgmr.msra.gmra.mrb[0].mxu1 %v184_v62 }
  0x55   : > { %371 = vmatprep.mubr.bf16.mxu1 %v188_v63 }
  0x5c   : > { %372 = vmatmul.mubr.bf16.gmra.mrb[4].mxu1 %v187_v3 }
  0x86   : > { %v305_v12 = vpop.permute.xlu0 %304 }
  0x87   : > { %v315_v22 = vpop.permute.xlu1 %314 }
  0x8a   : > { %v310_v14 = vpop.permute.xlu0 %309 }
  0x8b   : > { %v320_v29 = vpop.permute.xlu1 %319 }
  0xf8   : > { %v416_v4 = vpop.f32.mrb[0].mxu0 }
  0xf9   : > { %v418_v5 = vpop.f32.mrb[1].mxu0 }
  0xfa   : > { %v420_v6 = vpop.f32.mrb[2].mxu0 }
  0xfb   : > { %v422_v7 = vpop.f32.mrb[3].mxu0 }
 0x100   : > { %v426_v8 = vpop.f32.mrb[4].mxu0 }
 0x101   : > { %v428_v9 = vpop.f32.mrb[5].mxu0 }
 0x102   : > { %v430_v10 = vpop.f32.mrb[6].mxu0 }
 0x103   : > { %v432_v11 = vpop.f32.mrb[7].mxu0 }
 0x127   : > { %v363_v13 = vpop.f32.mrb[0].mxu1 }
 0x128   : > { %v364_v15 = vadd.f32 %v363_v13, %v305_v12  ;;  %v365_v16 = vpop.f32.mrb[1].mxu1 }
 0x129   : > { %v366_v17 = vadd.f32 %v365_v16, %v305_v12  ;;  %v367_v18 = vpop.f32.mrb[2].mxu1 }
 0x12a   : > { %v417_v19 = vadd.f32 %v416_v4, %v364_v15  ;;  %v368_v20 = vadd.f32 %v367_v18, %v310_v14  ;;  %v369_v21 = vpop.f32.mrb[3].mxu1 }
 0x12b   : > { %v419_v2 = vadd.f32 %v418_v5, %v366_v17  ;;  %v370_v23 = vadd.f32 %v369_v21, %v310_v14 }
 0x12c   : > { %435 = vst [vmem:[%s714_s28] sm:$0xff] %v417_v19  ;;  %v421_v24 = vadd.f32 %v420_v6, %v368_v20 }
 0x12d   : > { %436 = vst [vmem:[%s714_s28 + $0x8] sm:$0xff] %v419_v2  ;;  %v423_v25 = vadd.f32 %v422_v7, %v370_v23 }
 0x12e   : > { %437 = vst [vmem:[%s714_s28 + $0x10] sm:$0xff] %v421_v24 }
 0x12f   : > { %438 = vst [vmem:[%s714_s28 + $0x18] sm:$0xff] %v423_v25  ;;  %v373_v26 = vpop.f32.mrb[4].mxu1 }
 0x130   : > { %v374_v27 = vadd.f32 %v373_v26, %v315_v22  ;;  %v375_v28 = vpop.f32.mrb[5].mxu1 }
 0x131   : > { %v376_v30 = vadd.f32 %v375_v28, %v315_v22  ;;  %v377_v31 = vpop.f32.mrb[6].mxu1 }
 0x132   : > { %v427_v32 = vadd.f32 %v426_v8, %v374_v27  ;;  %v378_v33 = vadd.f32 %v377_v31, %v320_v29  ;;  %v379_v34 = vpop.f32.mrb[7].mxu1 }
 0x133   : > { %v429_v35 = vadd.f32 %v428_v9, %v376_v30  ;;  %v380_v36 = vadd.f32 %v379_v34, %v320_v29 }
 0x134   : > { %439 = vst [vmem:[%s714_s28 + $0x20] sm:$0xff] %v427_v32  ;;  %v431_v37 = vadd.f32 %v430_v10, %v378_v33 }
 0x135   : > { %440 = vst [vmem:[%s714_s28 + $0x28] sm:$0xff] %v429_v35  ;;  %v433_v38 = vadd.f32 %v432_v11, %v380_v36 }
 0x136   : > { %441 = vst [vmem:[%s714_s28 + $0x30] sm:$0xff] %v431_v37 }
 0x137   : > { %442 = vst [vmem:[%s714_s28 + $0x38] sm:$0xff] %v433_v38 }
 0x138 PF: > { %s13_s12 = sadd.s32 1, %s545_s12  }
 0x139   : > { %p10_p4 = scmp.ge.s32.totalorder %s13_s12, 4  }
 0x13b   :  { %12 = sbr.rel (!%p10_p4) target bundleno = 1 (0x1), region = 62 }

</bundles_post_ra>
